<compile_context>
chip_gen: v7x
topology: tpu7x:2x2x1
jax: 0.10.0
libtpu: 0.0.40
codegen_flags: <defaults>
</compile_context>

<pallas_src>
import functools

import jax
import jax.numpy as jnp
import numpy as np
from jax import lax
from jax.experimental import pallas as pl
from jax.experimental.pallas import tpu as pltpu

KSIZE = 15
PAD = 7
BN_EPS = 1e-5
LANES = 128
SUBLANES = 8


def _round_up(x, m):
    return (x + m - 1) // m * m


def _pad_kc(kc):
    """Pad the contraction dim to a 128-lane multiple only when nearly free."""
    kcp = _round_up(kc, LANES)
    return kcp if (kcp - kc) <= 0.15 * kc else kc


def _pick_bands(h, max_rows_per_band=128):
    """Number of halo'd row bands per image.

    Prefer >=2 bands whenever each band keeps >=8 output rows (gives the
    2-D parallel grid >=2 units even for N == 1 -> both v7x TensorCores busy)
    and keep bands small enough that per-step patch/output blocks stay modest
    in VMEM for large H (re-derived for v7x's 64 MiB).
    """
    best = 1
    for b in range(1, h + 1):
        if h % b:
            continue
        rows = h // b
        if rows < SUBLANES:
            break
        best = b
        if b >= 2 and rows <= max_rows_per_band:
            return b
    return best


# ----------------------------- Pallas kernel -------------------------------
def _stage_kernel(a_ref, w_ref, b_ref, o_ref, *, width):
    """One Conv_Block half: 15x15 conv (+folded 1x1 conv +BN) -> bias -> ReLU.

    a_ref: ((Hb+14)*Wr, KCp) bf16  kx-unfolded, height-padded row band
    w_ref: (15, KCp, Cp)     bf16  fused (conv15 @ conv1x1) * bn_scale weights
    b_ref: (1, Cp)           f32   bn shift (bias), channel-padded
    o_ref: (Hb*Wr, Cp)       bf16  output rows for this (image, band)
    """
    hw = o_ref.shape[0]
    # ky-tap reduction: chain 15 MXU dots through a traced f32 accumulator.
    # No VMEM scratch read-modify-write (saves ~15x full-tile vld/vst traffic
    # and 128 KB+ of VMEM); partials stay in the MXU result path.
    acc = jnp.dot(a_ref[pl.ds(0, hw), :], w_ref[0],
                  preferred_element_type=jnp.float32)
    for ky in range(1, KSIZE):
        # static start, multiple of the sublane-aligned row pitch `width`
        acc += jnp.dot(a_ref[pl.ds(ky * width, hw), :], w_ref[ky],
                       preferred_element_type=jnp.float32)
    o_ref[...] = jnp.maximum(acc + b_ref[...], 0.0).astype(o_ref.dtype)


# ------------------------------- glue (JAX) --------------------------------
def _kx_unfold_bands(x_nhwc, n_bands, kc_p, w_r):
    """(N,H,W,C) -> (N, n_bands, (Hb+14)*Wr, KCp) bf16 patch tensor.

    Pad H and W by 7, unfold only the kx taps (minor index = kx*C + ci); the
    ky taps are handled inside the kernel by row-shifted slices.  The output
    x-axis is zero-padded to Wr (multiple of 8) so the row pitch is sublane-
    aligned, and the minor dim is zero-padded to KCp.  Rows are then split
    into n_bands halo'd bands of Hb+14 padded rows each.
    """
    N, H, W, C = x_nhwc.shape
    hb = H // n_bands
    kc = KSIZE * C
    xp = jnp.pad(x_nhwc, ((0, 0), (PAD, PAD), (PAD, PAD), (0, 0)))
    cols = [xp[:, :, kx:kx + W, :] for kx in range(KSIZE)]     # (N,Hp,W,C) each
    a = jnp.stack(cols, axis=3)                                # (N,Hp,W,15,C)
    a = a.reshape(N, H + 2 * PAD, W, kc)
    if w_r > W:                                   # sublane-aligned row pitch
        a = jnp.pad(a, ((0, 0), (0, 0), (0, w_r - W), (0, 0)))
    if kc_p > kc:                                 # lane-dense contraction dim
        a = jnp.pad(a, ((0, 0), (0, 0), (0, 0), (0, kc_p - kc)))
    # halo'd bands: band b needs padded rows [b*hb, b*hb + hb + 14)
    bands = [a[:, b * hb: b * hb + hb + 2 * PAD] for b in range(n_bands)]
    a = jnp.stack(bands, axis=1)                  # (N, nb, hb+14, Wr, KCp)
    return a.reshape(N, n_bands, (hb + 2 * PAD) * w_r, kc_p).astype(jnp.bfloat16)


def _fuse_weights(w15, w1, scale, shift, kc_p, cp):
    """Fold 1x1 conv + BN scale into the 15x15 weight; BN shift -> bias.

    w15: (Cmid, Cin, 15, 15) torch layout; w1: (Cout, Cmid, 1, 1).
    Returns wfk (15, KCp, Cp) bf16 and bias (1, Cp) f32 (K and Cout padded).
    """
    wf = jnp.einsum("mcyx,om->yxco", w15, w1[:, :, 0, 0],
                    precision=lax.Precision.HIGHEST)           # (15,15,Cin,Cout)
    wf = wf * scale[None, None, None, :]
    cin, cout = wf.shape[2], wf.shape[3]
    wfk = wf.reshape(KSIZE, KSIZE * cin, cout)
    wfk = jnp.pad(wfk, ((0, 0), (0, kc_p - KSIZE * cin), (0, cp - cout)))
    bias = jnp.pad(shift, (0, cp - cout)).reshape(1, cp)
    return wfk.astype(jnp.bfloat16), bias.astype(jnp.float32)


def _stage(x_nhwc, w15, w1, scale, shift):
    """conv15 -> conv1x1 -> BN -> (dropout eval=id) -> ReLU, fully fused."""
    N, H, W, Cin = x_nhwc.shape
    Cout = w1.shape[0]
    Cp = _round_up(Cout, LANES)          # lane-dense output channels
    KC = KSIZE * Cin
    KCp = _pad_kc(KC)
    Wr = _round_up(W, SUBLANES)          # sublane-aligned row pitch
    n_bands = _pick_bands(H)
    Hb = H // n_bands
    band_rows = (Hb + 2 * PAD) * Wr
    out_rows = Hb * Wr

    wfk, bias = _fuse_weights(w15, w1, scale, shift, KCp, Cp)
    a4 = _kx_unfold_bands(x_nhwc, n_bands, KCp, Wr)   # (N, nb, band_rows, KCp)

    # VMEM budget derived from the actual per-step footprint: 2x for the
    # default double buffering, 2x headroom for compiler temps/relayouts;
    # floor 8 MiB, cap 48 MiB (v7x has 64 MiB physical VMEM per TC).
    in_bytes = band_rows * KCp * 2
    out_bytes = out_rows * Cp * 2
    w_bytes = KSIZE * KCp * Cp * 2
    b_bytes = SUBLANES * LANES * 4
    vmem_need = 2 * (in_bytes + out_bytes + w_bytes + b_bytes)
    vmem_limit = int(min(max(2 * vmem_need, 8 << 20), 48 << 20))

    flops = 2 * N * n_bands * out_rows * KSIZE * KCp * Cp
    bytes_accessed = (N * n_bands * band_rows * KCp * 2   # bf16 patches
                      + w_bytes + b_bytes                  # fused weight + bias
                      + N * n_bands * out_rows * Cp * 2)   # bf16 output

    out = pl.pallas_call(
        functools.partial(_stage_kernel, width=Wr),
        out_shape=jax.ShapeDtypeStruct((N, n_bands, out_rows, Cp), jnp.bfloat16),
        grid_spec=pltpu.PrefetchScalarGridSpec(
            num_scalar_prefetch=0,
            grid=(N, n_bands),
            in_specs=[
                pl.BlockSpec((None, None, band_rows, KCp),
                             lambda n, b: (n, b, 0, 0)),
                pl.BlockSpec((KSIZE, KCp, Cp), lambda n, b: (0, 0, 0)),  # resident
                pl.BlockSpec((1, Cp), lambda n, b: (0, 0)),              # resident
            ],
            out_specs=pl.BlockSpec((None, None, out_rows, Cp),
                                   lambda n, b: (n, b, 0, 0)),
        ),
        compiler_params=pltpu.CompilerParams(
            dimension_semantics=("parallel", "parallel"),
            vmem_limit_bytes=vmem_limit,
            # Let XLA fuse the pad/unfold producer into the patch operand
            # instead of materializing the 15x-expanded tensor separately.
            allow_input_fusion=[True, False, False],
        ),
        cost_estimate=pl.CostEstimate(
            flops=flops, transcendentals=0, bytes_accessed=bytes_accessed),
    )(a4, wfk, bias)

    # (N, nb, Hb*Wr, Cp) -> (N, H, Wr, Cp); drop x/channel padding.
    return out.reshape(N, H, Wr, Cp)[:, :, :W, :Cout]


def conv_block_forward(x_nchw, p):
    x = jnp.transpose(x_nchw, (0, 2, 3, 1)).astype(jnp.float32)   # NCHW->NHWC
    h = _stage(x, p["w15_1"], p["w1_1"], p["scale1"], p["shift1"])
    h = _stage(h, p["w15_2"], p["w1_2"], p["scale2"], p["shift2"])
    return jnp.transpose(h, (0, 3, 1, 2)).astype(jnp.float32)     # NHWC->NCHW


# --------------------------- params & reference ----------------------------
def init_params(key, in_ch, out_ch):
    ks = jax.random.split(key, 8)

    def conv_w(k, cout, cin, kh, kw):
        fan_in = cin * kh * kw
        return (jax.random.normal(k, (cout, cin, kh, kw), jnp.float32)
                / jnp.sqrt(fan_in))

    def bn(kg, kb, c):
        gamma = 1.0 + 0.1 * jax.random.normal(kg, (c,), jnp.float32)
        beta = 0.1 * jax.random.normal(kb, (c,), jnp.float32)
        mean = jnp.zeros((c,), jnp.float32)     # PyTorch default running stats
        var = jnp.ones((c,), jnp.float32)
        scale = gamma / jnp.sqrt(var + BN_EPS)
        shift = beta - mean * scale
        return scale, shift

    s1, sh1 = bn(ks[4], ks[5], out_ch)
    s2, sh2 = bn(ks[6], ks[7], out_ch)
    return {
        "w15_1": conv_w(ks[0], in_ch, in_ch, KSIZE, KSIZE),
        "w1_1": conv_w(ks[1], out_ch, in_ch, 1, 1),
        "scale1": s1, "shift1": sh1,
        "w15_2": conv_w(ks[2], out_ch, out_ch, KSIZE, KSIZE),
        "w1_2": conv_w(ks[3], out_ch, out_ch, 1, 1),
        "scale2": s2, "shift2": sh2,
    }


def _ref_conv(x, w, pad):
    return lax.conv_general_dilated(
        x, w, (1, 1), [(pad, pad), (pad, pad)],
        dimension_numbers=("NCHW", "OIHW", "NCHW"),
        precision=lax.Precision.HIGHEST)


def reference_forward(x, p):
    h = _ref_conv(x, p["w15_1"], PAD)
    h = _ref_conv(h, p["w1_1"], 0)
    h = h * p["scale1"][None, :, None, None] + p["shift1"][None, :, None, None]
    h = jnp.maximum(h, 0.0)
    h = _ref_conv(h, p["w15_2"], PAD)
    h = _ref_conv(h, p["w1_2"], 0)
    h = h * p["scale2"][None, :, None, None] + p["shift2"][None, :, None, None]
    return jnp.maximum(h, 0.0)


# --------------------------------- main -------------------------------------
if __name__ == "__main__":
    key = jax.random.PRNGKey(0)
    k_x, k_p = jax.random.split(key)

    in_channels, out_channels = 4, 8
    N, H, W = 2, 16, 16

    x = jax.random.normal(k_x, (N, in_channels, H, W), jnp.float32)
    params = init_params(k_p, in_channels, out_channels)

    y = jax.jit(conv_block_forward)(x, params)
    jax.block_until_ready(y)

    y_ref = reference_forward(x, params)
    assert y.shape == (N, out_channels, H, W), y.shape
    err = float(jnp.max(jnp.abs(y - y_ref)))
    scale = float(jnp.max(jnp.abs(y_ref)))
    # bf16 streaming operands + bf16 inter-stage/output activations with f32
    # accumulation across two 15x15 conv stages: expected max abs error ~3e-2
    # against the f32 HIGHEST-precision reference.
    assert np.isfinite(err) and np.isfinite(scale)
    assert err <= 5e-2 + 3e-2 * scale, f"max abs diff {err} (ref scale {scale})"

    print("KERNEL_OK")
</pallas_src>

<mosaic_0001>
module attributes {stable_mosaic.version = 11 : i64} {
  func.func @_stage_kernel(%arg0: i32, %arg1: i32, %arg2: memref<1x1x352x60xbf16, #tpu.memory_space<vmem>>, %arg3: memref<15x60x128xbf16, #tpu.memory_space<vmem>>, %arg4: memref<1x128xf32, #tpu.memory_space<vmem>>, %arg5: memref<1x1x128x128xbf16, #tpu.memory_space<vmem>>) attributes {dimension_semantics = [#tpu.dimension_semantics<parallel>, #tpu.dimension_semantics<parallel>], iteration_bounds = array<i64: 2, 2>, scalar_prefetch = 0 : i64, scratch_operands = 0 : i64, tpu.core_type = #tpu.core_type<tc>, window_params = [{transform_indices = @transform_0, window_bounds = array<i64: 1, 1, 352, 60>}, {pipeline_mode = #tpu.pipeline_mode<synchronous>, transform_indices = @transform_1, window_bounds = array<i64: 15, 60, 128>}, {pipeline_mode = #tpu.pipeline_mode<synchronous>, transform_indices = @transform_2, window_bounds = array<i64: 1, 128>}, {transform_indices = @transform_3, window_bounds = array<i64: 1, 1, 128, 128>}]} {
    %c0 = arith.constant 0 : index
    %c0_0 = arith.constant 0 : index
    %c0_1 = arith.constant 0 : index
    %c0_2 = arith.constant 0 : index
    %0 = vector.load %arg2[%c0, %c0_0, %c0_1, %c0_2] : memref<1x1x352x60xbf16, #tpu.memory_space<vmem>>, vector<1x1x128x60xbf16>
    %1 = vector.shape_cast %0 : vector<1x1x128x60xbf16> to vector<128x60xbf16>
    %c0_3 = arith.constant 0 : index
    %c0_4 = arith.constant 0 : index
    %c0_5 = arith.constant 0 : index
    %2 = vector.load %arg3[%c0_3, %c0_4, %c0_5] : memref<15x60x128xbf16, #tpu.memory_space<vmem>>, vector<1x60x128xbf16>
    %3 = vector.shape_cast %2 : vector<1x60x128xbf16> to vector<60x128xbf16>
    %cst = arith.constant dense<0.000000e+00> : vector<128x128xf32>
    %4 = tpu.matmul %1, %3, %cst {dimension_numbers = #tpu.dot_dimension_numbers<[1], [0], [0], [1], [0, 0, 1, 1], [], []>} : vector<128x60xbf16>, vector<60x128xbf16>, vector<128x128xf32> -> vector<128x128xf32>
    %c0_6 = arith.constant 0 : index
    %c0_7 = arith.constant 0 : index
    %c16 = arith.constant 16 : index
    %c0_8 = arith.constant 0 : index
    %5 = vector.load %arg2[%c0_6, %c0_7, %c16, %c0_8] : memref<1x1x352x60xbf16, #tpu.memory_space<vmem>>, vector<1x1x128x60xbf16>
    %6 = vector.shape_cast %5 : vector<1x1x128x60xbf16> to vector<128x60xbf16>
    %c1 = arith.constant 1 : index
    %c0_9 = arith.constant 0 : index
    %c0_10 = arith.constant 0 : index
    %7 = vector.load %arg3[%c1, %c0_9, %c0_10] : memref<15x60x128xbf16, #tpu.memory_space<vmem>>, vector<1x60x128xbf16>
    %8 = vector.shape_cast %7 : vector<1x60x128xbf16> to vector<60x128xbf16>
    %cst_11 = arith.constant dense<0.000000e+00> : vector<128x128xf32>
    %9 = tpu.matmul %6, %8, %cst_11 {dimension_numbers = #tpu.dot_dimension_numbers<[1], [0], [0], [1], [0, 0, 1, 1], [], []>} : vector<128x60xbf16>, vector<60x128xbf16>, vector<128x128xf32> -> vector<128x128xf32>
    %10 = arith.addf %4, %9 : vector<128x128xf32>
    %c0_12 = arith.constant 0 : index
    %c0_13 = arith.constant 0 : index
    %c32 = arith.constant 32 : index
    %c0_14 = arith.constant 0 : index
    %11 = vector.load %arg2[%c0_12, %c0_13, %c32, %c0_14] : memref<1x1x352x60xbf16, #tpu.memory_space<vmem>>, vector<1x1x128x60xbf16>
    %12 = vector.shape_cast %11 : vector<1x1x128x60xbf16> to vector<128x60xbf16>
    %c2 = arith.constant 2 : index
    %c0_15 = arith.constant 0 : index
    %c0_16 = arith.constant 0 : index
    %13 = vector.load %arg3[%c2, %c0_15, %c0_16] : memref<15x60x128xbf16, #tpu.memory_space<vmem>>, vector<1x60x128xbf16>
    %14 = vector.shape_cast %13 : vector<1x60x128xbf16> to vector<60x128xbf16>
    %cst_17 = arith.constant dense<0.000000e+00> : vector<128x128xf32>
    %15 = tpu.matmul %12, %14, %cst_17 {dimension_numbers = #tpu.dot_dimension_numbers<[1], [0], [0], [1], [0, 0, 1, 1], [], []>} : vector<128x60xbf16>, vector<60x128xbf16>, vector<128x128xf32> -> vector<128x128xf32>
    %16 = arith.addf %10, %15 : vector<128x128xf32>
    %c0_18 = arith.constant 0 : index
    %c0_19 = arith.constant 0 : index
    %c48 = arith.constant 48 : index
    %c0_20 = arith.constant 0 : index
    %17 = vector.load %arg2[%c0_18, %c0_19, %c48, %c0_20] : memref<1x1x352x60xbf16, #tpu.memory_space<vmem>>, vector<1x1x128x60xbf16>
    %18 = vector.shape_cast %17 : vector<1x1x128x60xbf16> to vector<128x60xbf16>
    %c3 = arith.constant 3 : index
    %c0_21 = arith.constant 0 : index
    %c0_22 = arith.constant 0 : index
    %19 = vector.load %arg3[%c3, %c0_21, %c0_22] : memref<15x60x128xbf16, #tpu.memory_space<vmem>>, vector<1x60x128xbf16>
    %20 = vector.shape_cast %19 : vector<1x60x128xbf16> to vector<60x128xbf16>
    %cst_23 = arith.constant dense<0.000000e+00> : vector<128x128xf32>
    %21 = tpu.matmul %18, %20, %cst_23 {dimension_numbers = #tpu.dot_dimension_numbers<[1], [0], [0], [1], [0, 0, 1, 1], [], []>} : vector<128x60xbf16>, vector<60x128xbf16>, vector<128x128xf32> -> vector<128x128xf32>
    %22 = arith.addf %16, %21 : vector<128x128xf32>
    %c0_24 = arith.constant 0 : index
    %c0_25 = arith.constant 0 : index
    %c64 = arith.constant 64 : index
    %c0_26 = arith.constant 0 : index
    %23 = vector.load %arg2[%c0_24, %c0_25, %c64, %c0_26] : memref<1x1x352x60xbf16, #tpu.memory_space<vmem>>, vector<1x1x128x60xbf16>
    %24 = vector.shape_cast %23 : vector<1x1x128x60xbf16> to vector<128x60xbf16>
    %c4 = arith.constant 4 : index
    %c0_27 = arith.constant 0 : index
    %c0_28 = arith.constant 0 : index
    %25 = vector.load %arg3[%c4, %c0_27, %c0_28] : memref<15x60x128xbf16, #tpu.memory_space<vmem>>, vector<1x60x128xbf16>
    %26 = vector.shape_cast %25 : vector<1x60x128xbf16> to vector<60x128xbf16>
    %cst_29 = arith.constant dense<0.000000e+00> : vector<128x128xf32>
    %27 = tpu.matmul %24, %26, %cst_29 {dimension_numbers = #tpu.dot_dimension_numbers<[1], [0], [0], [1], [0, 0, 1, 1], [], []>} : vector<128x60xbf16>, vector<60x128xbf16>, vector<128x128xf32> -> vector<128x128xf32>
    %28 = arith.addf %22, %27 : vector<128x128xf32>
    %c0_30 = arith.constant 0 : index
    %c0_31 = arith.constant 0 : index
    %c80 = arith.constant 80 : index
    %c0_32 = arith.constant 0 : index
    %29 = vector.load %arg2[%c0_30, %c0_31, %c80, %c0_32] : memref<1x1x352x60xbf16, #tpu.memory_space<vmem>>, vector<1x1x128x60xbf16>
    %30 = vector.shape_cast %29 : vector<1x1x128x60xbf16> to vector<128x60xbf16>
    %c5 = arith.constant 5 : index
    %c0_33 = arith.constant 0 : index
    %c0_34 = arith.constant 0 : index
    %31 = vector.load %arg3[%c5, %c0_33, %c0_34] : memref<15x60x128xbf16, #tpu.memory_space<vmem>>, vector<1x60x128xbf16>
    %32 = vector.shape_cast %31 : vector<1x60x128xbf16> to vector<60x128xbf16>
    %cst_35 = arith.constant dense<0.000000e+00> : vector<128x128xf32>
    %33 = tpu.matmul %30, %32, %cst_35 {dimension_numbers = #tpu.dot_dimension_numbers<[1], [0], [0], [1], [0, 0, 1, 1], [], []>} : vector<128x60xbf16>, vector<60x128xbf16>, vector<128x128xf32> -> vector<128x128xf32>
    %34 = arith.addf %28, %33 : vector<128x128xf32>
    %c0_36 = arith.constant 0 : index
    %c0_37 = arith.constant 0 : index
    %c96 = arith.constant 96 : index
    %c0_38 = arith.constant 0 : index
    %35 = vector.load %arg2[%c0_36, %c0_37, %c96, %c0_38] : memref<1x1x352x60xbf16, #tpu.memory_space<vmem>>, vector<1x1x128x60xbf16>
    %36 = vector.shape_cast %35 : vector<1x1x128x60xbf16> to vector<128x60xbf16>
    %c6 = arith.constant 6 : index
    %c0_39 = arith.constant 0 : index
    %c0_40 = arith.constant 0 : index
    %37 = vector.load %arg3[%c6, %c0_39, %c0_40] : memref<15x60x128xbf16, #tpu.memory_space<vmem>>, vector<1x60x128xbf16>
    %38 = vector.shape_cast %37 : vector<1x60x128xbf16> to vector<60x128xbf16>
    %cst_41 = arith.constant dense<0.000000e+00> : vector<128x128xf32>
    %39 = tpu.matmul %36, %38, %cst_41 {dimension_numbers = #tpu.dot_dimension_numbers<[1], [0], [0], [1], [0, 0, 1, 1], [], []>} : vector<128x60xbf16>, vector<60x128xbf16>, vector<128x128xf32> -> vector<128x128xf32>
    %40 = arith.addf %34, %39 : vector<128x128xf32>
    %c0_42 = arith.constant 0 : index
    %c0_43 = arith.constant 0 : index
    %c112 = arith.constant 112 : index
    %c0_44 = arith.constant 0 : index
    %41 = vector.load %arg2[%c0_42, %c0_43, %c112, %c0_44] : memref<1x1x352x60xbf16, #tpu.memory_space<vmem>>, vector<1x1x128x60xbf16>
    %42 = vector.shape_cast %41 : vector<1x1x128x60xbf16> to vector<128x60xbf16>
    %c7 = arith.constant 7 : index
    %c0_45 = arith.constant 0 : index
    %c0_46 = arith.constant 0 : index
    %43 = vector.load %arg3[%c7, %c0_45, %c0_46] : memref<15x60x128xbf16, #tpu.memory_space<vmem>>, vector<1x60x128xbf16>
    %44 = vector.shape_cast %43 : vector<1x60x128xbf16> to vector<60x128xbf16>
    %cst_47 = arith.constant dense<0.000000e+00> : vector<128x128xf32>
    %45 = tpu.matmul %42, %44, %cst_47 {dimension_numbers = #tpu.dot_dimension_numbers<[1], [0], [0], [1], [0, 0, 1, 1], [], []>} : vector<128x60xbf16>, vector<60x128xbf16>, vector<128x128xf32> -> vector<128x128xf32>
    %46 = arith.addf %40, %45 : vector<128x128xf32>
    %c0_48 = arith.constant 0 : index
    %c0_49 = arith.constant 0 : index
    %c128 = arith.constant 128 : index
    %c0_50 = arith.constant 0 : index
    %47 = vector.load %arg2[%c0_48, %c0_49, %c128, %c0_50] : memref<1x1x352x60xbf16, #tpu.memory_space<vmem>>, vector<1x1x128x60xbf16>
    %48 = vector.shape_cast %47 : vector<1x1x128x60xbf16> to vector<128x60xbf16>
    %c8 = arith.constant 8 : index
    %c0_51 = arith.constant 0 : index
    %c0_52 = arith.constant 0 : index
    %49 = vector.load %arg3[%c8, %c0_51, %c0_52] : memref<15x60x128xbf16, #tpu.memory_space<vmem>>, vector<1x60x128xbf16>
    %50 = vector.shape_cast %49 : vector<1x60x128xbf16> to vector<60x128xbf16>
    %cst_53 = arith.constant dense<0.000000e+00> : vector<128x128xf32>
    %51 = tpu.matmul %48, %50, %cst_53 {dimension_numbers = #tpu.dot_dimension_numbers<[1], [0], [0], [1], [0, 0, 1, 1], [], []>} : vector<128x60xbf16>, vector<60x128xbf16>, vector<128x128xf32> -> vector<128x128xf32>
    %52 = arith.addf %46, %51 : vector<128x128xf32>
    %c0_54 = arith.constant 0 : index
    %c0_55 = arith.constant 0 : index
    %c144 = arith.constant 144 : index
    %c0_56 = arith.constant 0 : index
    %53 = vector.load %arg2[%c0_54, %c0_55, %c144, %c0_56] : memref<1x1x352x60xbf16, #tpu.memory_space<vmem>>, vector<1x1x128x60xbf16>
    %54 = vector.shape_cast %53 : vector<1x1x128x60xbf16> to vector<128x60xbf16>
    %c9 = arith.constant 9 : index
    %c0_57 = arith.constant 0 : index
    %c0_58 = arith.constant 0 : index
    %55 = vector.load %arg3[%c9, %c0_57, %c0_58] : memref<15x60x128xbf16, #tpu.memory_space<vmem>>, vector<1x60x128xbf16>
    %56 = vector.shape_cast %55 : vector<1x60x128xbf16> to vector<60x128xbf16>
    %cst_59 = arith.constant dense<0.000000e+00> : vector<128x128xf32>
    %57 = tpu.matmul %54, %56, %cst_59 {dimension_numbers = #tpu.dot_dimension_numbers<[1], [0], [0], [1], [0, 0, 1, 1], [], []>} : vector<128x60xbf16>, vector<60x128xbf16>, vector<128x128xf32> -> vector<128x128xf32>
    %58 = arith.addf %52, %57 : vector<128x128xf32>
    %c0_60 = arith.constant 0 : index
    %c0_61 = arith.constant 0 : index
    %c160 = arith.constant 160 : index
    %c0_62 = arith.constant 0 : index
    %59 = vector.load %arg2[%c0_60, %c0_61, %c160, %c0_62] : memref<1x1x352x60xbf16, #tpu.memory_space<vmem>>, vector<1x1x128x60xbf16>
    %60 = vector.shape_cast %59 : vector<1x1x128x60xbf16> to vector<128x60xbf16>
    %c10 = arith.constant 10 : index
    %c0_63 = arith.constant 0 : index
    %c0_64 = arith.constant 0 : index
    %61 = vector.load %arg3[%c10, %c0_63, %c0_64] : memref<15x60x128xbf16, #tpu.memory_space<vmem>>, vector<1x60x128xbf16>
    %62 = vector.shape_cast %61 : vector<1x60x128xbf16> to vector<60x128xbf16>
    %cst_65 = arith.constant dense<0.000000e+00> : vector<128x128xf32>
    %63 = tpu.matmul %60, %62, %cst_65 {dimension_numbers = #tpu.dot_dimension_numbers<[1], [0], [0], [1], [0, 0, 1, 1], [], []>} : vector<128x60xbf16>, vector<60x128xbf16>, vector<128x128xf32> -> vector<128x128xf32>
    %64 = arith.addf %58, %63 : vector<128x128xf32>
    %c0_66 = arith.constant 0 : index
    %c0_67 = arith.constant 0 : index
    %c176 = arith.constant 176 : index
    %c0_68 = arith.constant 0 : index
    %65 = vector.load %arg2[%c0_66, %c0_67, %c176, %c0_68] : memref<1x1x352x60xbf16, #tpu.memory_space<vmem>>, vector<1x1x128x60xbf16>
    %66 = vector.shape_cast %65 : vector<1x1x128x60xbf16> to vector<128x60xbf16>
    %c11 = arith.constant 11 : index
    %c0_69 = arith.constant 0 : index
    %c0_70 = arith.constant 0 : index
    %67 = vector.load %arg3[%c11, %c0_69, %c0_70] : memref<15x60x128xbf16, #tpu.memory_space<vmem>>, vector<1x60x128xbf16>
    %68 = vector.shape_cast %67 : vector<1x60x128xbf16> to vector<60x128xbf16>
    %cst_71 = arith.constant dense<0.000000e+00> : vector<128x128xf32>
    %69 = tpu.matmul %66, %68, %cst_71 {dimension_numbers = #tpu.dot_dimension_numbers<[1], [0], [0], [1], [0, 0, 1, 1], [], []>} : vector<128x60xbf16>, vector<60x128xbf16>, vector<128x128xf32> -> vector<128x128xf32>
    %70 = arith.addf %64, %69 : vector<128x128xf32>
    %c0_72 = arith.constant 0 : index
    %c0_73 = arith.constant 0 : index
    %c192 = arith.constant 192 : index
    %c0_74 = arith.constant 0 : index
    %71 = vector.load %arg2[%c0_72, %c0_73, %c192, %c0_74] : memref<1x1x352x60xbf16, #tpu.memory_space<vmem>>, vector<1x1x128x60xbf16>
    %72 = vector.shape_cast %71 : vector<1x1x128x60xbf16> to vector<128x60xbf16>
    %c12 = arith.constant 12 : index
    %c0_75 = arith.constant 0 : index
    %c0_76 = arith.constant 0 : index
    %73 = vector.load %arg3[%c12, %c0_75, %c0_76] : memref<15x60x128xbf16, #tpu.memory_space<vmem>>, vector<1x60x128xbf16>
    %74 = vector.shape_cast %73 : vector<1x60x128xbf16> to vector<60x128xbf16>
    %cst_77 = arith.constant dense<0.000000e+00> : vector<128x128xf32>
    %75 = tpu.matmul %72, %74, %cst_77 {dimension_numbers = #tpu.dot_dimension_numbers<[1], [0], [0], [1], [0, 0, 1, 1], [], []>} : vector<128x60xbf16>, vector<60x128xbf16>, vector<128x128xf32> -> vector<128x128xf32>
    %76 = arith.addf %70, %75 : vector<128x128xf32>
    %c0_78 = arith.constant 0 : index
    %c0_79 = arith.constant 0 : index
    %c208 = arith.constant 208 : index
    %c0_80 = arith.constant 0 : index
    %77 = vector.load %arg2[%c0_78, %c0_79, %c208, %c0_80] : memref<1x1x352x60xbf16, #tpu.memory_space<vmem>>, vector<1x1x128x60xbf16>
    %78 = vector.shape_cast %77 : vector<1x1x128x60xbf16> to vector<128x60xbf16>
    %c13 = arith.constant 13 : index
    %c0_81 = arith.constant 0 : index
    %c0_82 = arith.constant 0 : index
    %79 = vector.load %arg3[%c13, %c0_81, %c0_82] : memref<15x60x128xbf16, #tpu.memory_space<vmem>>, vector<1x60x128xbf16>
    %80 = vector.shape_cast %79 : vector<1x60x128xbf16> to vector<60x128xbf16>
    %cst_83 = arith.constant dense<0.000000e+00> : vector<128x128xf32>
    %81 = tpu.matmul %78, %80, %cst_83 {dimension_numbers = #tpu.dot_dimension_numbers<[1], [0], [0], [1], [0, 0, 1, 1], [], []>} : vector<128x60xbf16>, vector<60x128xbf16>, vector<128x128xf32> -> vector<128x128xf32>
    %82 = arith.addf %76, %81 : vector<128x128xf32>
    %c0_84 = arith.constant 0 : index
    %c0_85 = arith.constant 0 : index
    %c224 = arith.constant 224 : index
    %c0_86 = arith.constant 0 : index
    %83 = vector.load %arg2[%c0_84, %c0_85, %c224, %c0_86] : memref<1x1x352x60xbf16, #tpu.memory_space<vmem>>, vector<1x1x128x60xbf16>
    %84 = vector.shape_cast %83 : vector<1x1x128x60xbf16> to vector<128x60xbf16>
    %c14 = arith.constant 14 : index
    %c0_87 = arith.constant 0 : index
    %c0_88 = arith.constant 0 : index
    %85 = vector.load %arg3[%c14, %c0_87, %c0_88] : memref<15x60x128xbf16, #tpu.memory_space<vmem>>, vector<1x60x128xbf16>
    %86 = vector.shape_cast %85 : vector<1x60x128xbf16> to vector<60x128xbf16>
    %cst_89 = arith.constant dense<0.000000e+00> : vector<128x128xf32>
    %87 = tpu.matmul %84, %86, %cst_89 {dimension_numbers = #tpu.dot_dimension_numbers<[1], [0], [0], [1], [0, 0, 1, 1], [], []>} : vector<128x60xbf16>, vector<60x128xbf16>, vector<128x128xf32> -> vector<128x128xf32>
    %88 = arith.addf %82, %87 : vector<128x128xf32>
    %c0_90 = arith.constant 0 : index
    %c0_91 = arith.constant 0 : index
    %89 = vector.load %arg4[%c0_90, %c0_91] : memref<1x128xf32, #tpu.memory_space<vmem>>, vector<1x128xf32>
    %90 = vector.broadcast %89 : vector<1x128xf32> to vector<128x128xf32>
    %91 = arith.addf %88, %90 : vector<128x128xf32>
    %cst_92 = arith.constant 0.000000e+00 : f32
    %92 = vector.broadcast %cst_92 : f32 to vector<128x128xf32>
    %93 = arith.maximumf %91, %92 : vector<128x128xf32>
    %94 = arith.truncf %93 : vector<128x128xf32> to vector<128x128xbf16>
    %c0_93 = arith.constant 0 : index
    %c0_94 = arith.constant 0 : index
    %c0_95 = arith.constant 0 : index
    %c0_96 = arith.constant 0 : index
    %95 = vector.load %arg5[%c0_93, %c0_94, %c0_95, %c0_96] : memref<1x1x128x128xbf16, #tpu.memory_space<vmem>>, vector<1x1x128x128xbf16>
    %96 = vector.shape_cast %95 : vector<1x1x128x128xbf16> to vector<128x128xbf16>
    %97 = vector.shape_cast %94 : vector<128x128xbf16> to vector<1x1x128x128xbf16>
    tpu.vector_store %arg5[%c0_93, %c0_94, %c0_95, %c0_96], %97 {strides = array<i32>} : memref<1x1x128x128xbf16, #tpu.memory_space<vmem>>, vector<1x1x128x128xbf16>,
    return
  }
  func.func @transform_0(%arg0: i32, %arg1: i32) -> (i32, i32, i32, i32) {
    %c0_i32 = arith.constant 0 : i32
    %c0_i32_0 = arith.constant 0 : i32
    %c0_i32_1 = arith.constant 0 : i32
    return %arg0, %arg1, %c0_i32, %c0_i32_0 : i32, i32, i32, i32
  }
  func.func @transform_1(%arg0: i32, %arg1: i32) -> (i32, i32, i32) {
    %c0_i32 = arith.constant 0 : i32
    %c0_i32_0 = arith.constant 0 : i32
    %c0_i32_1 = arith.constant 0 : i32
    %c0_i32_2 = arith.constant 0 : i32
    return %c0_i32, %c0_i32_0, %c0_i32_1 : i32, i32, i32
  }
  func.func @transform_2(%arg0: i32, %arg1: i32) -> (i32, i32) {
    %c0_i32 = arith.constant 0 : i32
    %c0_i32_0 = arith.constant 0 : i32
    %c0_i32_1 = arith.constant 0 : i32
    return %c0_i32, %c0_i32_0 : i32, i32
  }
  func.func @transform_3(%arg0: i32, %arg1: i32) -> (i32, i32, i32, i32) {
    %c0_i32 = arith.constant 0 : i32
    %c0_i32_0 = arith.constant 0 : i32
    %c0_i32_1 = arith.constant 0 : i32
    return %arg0, %arg1, %c0_i32, %c0_i32_0 : i32, i32, i32, i32
  }
}

module attributes {stable_mosaic.version = 11 : i64} {
  func.func @_stage_kernel(%arg0: i32, %arg1: i32, %arg2: memref<1x1x352x128xbf16, #tpu.memory_space<vmem>>, %arg3: memref<15x128x128xbf16, #tpu.memory_space<vmem>>, %arg4: memref<1x128xf32, #tpu.memory_space<vmem>>, %arg5: memref<1x1x128x128xbf16, #tpu.memory_space<vmem>>) attributes {dimension_semantics = [#tpu.dimension_semantics<parallel>, #tpu.dimension_semantics<parallel>], iteration_bounds = array<i64: 2, 2>, scalar_prefetch = 0 : i64, scratch_operands = 0 : i64, tpu.core_type = #tpu.core_type<tc>, window_params = [{transform_indices = @transform_0, window_bounds = array<i64: 1, 1, 352, 128>}, {pipeline_mode = #tpu.pipeline_mode<synchronous>, transform_indices = @transform_1, window_bounds = array<i64: 15, 128, 128>}, {pipeline_mode = #tpu.pipeline_mode<synchronous>, transform_indices = @transform_2, window_bounds = array<i64: 1, 128>}, {transform_indices = @transform_3, window_bounds = array<i64: 1, 1, 128, 128>}]} {
    %c0 = arith.constant 0 : index
    %c0_0 = arith.constant 0 : index
    %c0_1 = arith.constant 0 : index
    %c0_2 = arith.constant 0 : index
    %0 = vector.load %arg2[%c0, %c0_0, %c0_1, %c0_2] : memref<1x1x352x128xbf16, #tpu.memory_space<vmem>>, vector<1x1x128x128xbf16>
    %1 = vector.shape_cast %0 : vector<1x1x128x128xbf16> to vector<128x128xbf16>
    %c0_3 = arith.constant 0 : index
    %c0_4 = arith.constant 0 : index
    %c0_5 = arith.constant 0 : index
    %2 = vector.load %arg3[%c0_3, %c0_4, %c0_5] : memref<15x128x128xbf16, #tpu.memory_space<vmem>>, vector<1x128x128xbf16>
    %3 = vector.shape_cast %2 : vector<1x128x128xbf16> to vector<128x128xbf16>
    %cst = arith.constant dense<0.000000e+00> : vector<128x128xf32>
    %4 = tpu.matmul %1, %3, %cst {dimension_numbers = #tpu.dot_dimension_numbers<[1], [0], [0], [1], [0, 0, 1, 1], [], []>} : vector<128x128xbf16>, vector<128x128xbf16>, vector<128x128xf32> -> vector<128x128xf32>
    %c0_6 = arith.constant 0 : index
    %c0_7 = arith.constant 0 : index
    %c16 = arith.constant 16 : index
    %c0_8 = arith.constant 0 : index
    %5 = vector.load %arg2[%c0_6, %c0_7, %c16, %c0_8] : memref<1x1x352x128xbf16, #tpu.memory_space<vmem>>, vector<1x1x128x128xbf16>
    %6 = vector.shape_cast %5 : vector<1x1x128x128xbf16> to vector<128x128xbf16>
    %c1 = arith.constant 1 : index
    %c0_9 = arith.constant 0 : index
    %c0_10 = arith.constant 0 : index
    %7 = vector.load %arg3[%c1, %c0_9, %c0_10] : memref<15x128x128xbf16, #tpu.memory_space<vmem>>, vector<1x128x128xbf16>
    %8 = vector.shape_cast %7 : vector<1x128x128xbf16> to vector<128x128xbf16>
    %cst_11 = arith.constant dense<0.000000e+00> : vector<128x128xf32>
    %9 = tpu.matmul %6, %8, %cst_11 {dimension_numbers = #tpu.dot_dimension_numbers<[1], [0], [0], [1], [0, 0, 1, 1], [], []>} : vector<128x128xbf16>, vector<128x128xbf16>, vector<128x128xf32> -> vector<128x128xf32>
    %10 = arith.addf %4, %9 : vector<128x128xf32>
    %c0_12 = arith.constant 0 : index
    %c0_13 = arith.constant 0 : index
    %c32 = arith.constant 32 : index
    %c0_14 = arith.constant 0 : index
    %11 = vector.load %arg2[%c0_12, %c0_13, %c32, %c0_14] : memref<1x1x352x128xbf16, #tpu.memory_space<vmem>>, vector<1x1x128x128xbf16>
    %12 = vector.shape_cast %11 : vector<1x1x128x128xbf16> to vector<128x128xbf16>
    %c2 = arith.constant 2 : index
    %c0_15 = arith.constant 0 : index
    %c0_16 = arith.constant 0 : index
    %13 = vector.load %arg3[%c2, %c0_15, %c0_16] : memref<15x128x128xbf16, #tpu.memory_space<vmem>>, vector<1x128x128xbf16>
    %14 = vector.shape_cast %13 : vector<1x128x128xbf16> to vector<128x128xbf16>
    %cst_17 = arith.constant dense<0.000000e+00> : vector<128x128xf32>
    %15 = tpu.matmul %12, %14, %cst_17 {dimension_numbers = #tpu.dot_dimension_numbers<[1], [0], [0], [1], [0, 0, 1, 1], [], []>} : vector<128x128xbf16>, vector<128x128xbf16>, vector<128x128xf32> -> vector<128x128xf32>
    %16 = arith.addf %10, %15 : vector<128x128xf32>
    %c0_18 = arith.constant 0 : index
    %c0_19 = arith.constant 0 : index
    %c48 = arith.constant 48 : index
    %c0_20 = arith.constant 0 : index
    %17 = vector.load %arg2[%c0_18, %c0_19, %c48, %c0_20] : memref<1x1x352x128xbf16, #tpu.memory_space<vmem>>, vector<1x1x128x128xbf16>
    %18 = vector.shape_cast %17 : vector<1x1x128x128xbf16> to vector<128x128xbf16>
    %c3 = arith.constant 3 : index
    %c0_21 = arith.constant 0 : index
    %c0_22 = arith.constant 0 : index
    %19 = vector.load %arg3[%c3, %c0_21, %c0_22] : memref<15x128x128xbf16, #tpu.memory_space<vmem>>, vector<1x128x128xbf16>
    %20 = vector.shape_cast %19 : vector<1x128x128xbf16> to vector<128x128xbf16>
    %cst_23 = arith.constant dense<0.000000e+00> : vector<128x128xf32>
    %21 = tpu.matmul %18, %20, %cst_23 {dimension_numbers = #tpu.dot_dimension_numbers<[1], [0], [0], [1], [0, 0, 1, 1], [], []>} : vector<128x128xbf16>, vector<128x128xbf16>, vector<128x128xf32> -> vector<128x128xf32>
    %22 = arith.addf %16, %21 : vector<128x128xf32>
    %c0_24 = arith.constant 0 : index
    %c0_25 = arith.constant 0 : index
    %c64 = arith.constant 64 : index
    %c0_26 = arith.constant 0 : index
    %23 = vector.load %arg2[%c0_24, %c0_25, %c64, %c0_26] : memref<1x1x352x128xbf16, #tpu.memory_space<vmem>>, vector<1x1x128x128xbf16>
    %24 = vector.shape_cast %23 : vector<1x1x128x128xbf16> to vector<128x128xbf16>
    %c4 = arith.constant 4 : index
    %c0_27 = arith.constant 0 : index
    %c0_28 = arith.constant 0 : index
    %25 = vector.load %arg3[%c4, %c0_27, %c0_28] : memref<15x128x128xbf16, #tpu.memory_space<vmem>>, vector<1x128x128xbf16>
    %26 = vector.shape_cast %25 : vector<1x128x128xbf16> to vector<128x128xbf16>
    %cst_29 = arith.constant dense<0.000000e+00> : vector<128x128xf32>
    %27 = tpu.matmul %24, %26, %cst_29 {dimension_numbers = #tpu.dot_dimension_numbers<[1], [0], [0], [1], [0, 0, 1, 1], [], []>} : vector<128x128xbf16>, vector<128x128xbf16>, vector<128x128xf32> -> vector<128x128xf32>
    %28 = arith.addf %22, %27 : vector<128x128xf32>
    %c0_30 = arith.constant 0 : index
    %c0_31 = arith.constant 0 : index
    %c80 = arith.constant 80 : index
    %c0_32 = arith.constant 0 : index
    %29 = vector.load %arg2[%c0_30, %c0_31, %c80, %c0_32] : memref<1x1x352x128xbf16, #tpu.memory_space<vmem>>, vector<1x1x128x128xbf16>
    %30 = vector.shape_cast %29 : vector<1x1x128x128xbf16> to vector<128x128xbf16>
    %c5 = arith.constant 5 : index
    %c0_33 = arith.constant 0 : index
    %c0_34 = arith.constant 0 : index
    %31 = vector.load %arg3[%c5, %c0_33, %c0_34] : memref<15x128x128xbf16, #tpu.memory_space<vmem>>, vector<1x128x128xbf16>
    %32 = vector.shape_cast %31 : vector<1x128x128xbf16> to vector<128x128xbf16>
    %cst_35 = arith.constant dense<0.000000e+00> : vector<128x128xf32>
    %33 = tpu.matmul %30, %32, %cst_35 {dimension_numbers = #tpu.dot_dimension_numbers<[1], [0], [0], [1], [0, 0, 1, 1], [], []>} : vector<128x128xbf16>, vector<128x128xbf16>, vector<128x128xf32> -> vector<128x128xf32>
    %34 = arith.addf %28, %33 : vector<128x128xf32>
    %c0_36 = arith.constant 0 : index
    %c0_37 = arith.constant 0 : index
    %c96 = arith.constant 96 : index
    %c0_38 = arith.constant 0 : index
    %35 = vector.load %arg2[%c0_36, %c0_37, %c96, %c0_38] : memref<1x1x352x128xbf16, #tpu.memory_space<vmem>>, vector<1x1x128x128xbf16>
    %36 = vector.shape_cast %35 : vector<1x1x128x128xbf16> to vector<128x128xbf16>
    %c6 = arith.constant 6 : index
    %c0_39 = arith.constant 0 : index
    %c0_40 = arith.constant 0 : index
    %37 = vector.load %arg3[%c6, %c0_39, %c0_40] : memref<15x128x128xbf16, #tpu.memory_space<vmem>>, vector<1x128x128xbf16>
    %38 = vector.shape_cast %37 : vector<1x128x128xbf16> to vector<128x128xbf16>
    %cst_41 = arith.constant dense<0.000000e+00> : vector<128x128xf32>
    %39 = tpu.matmul %36, %38, %cst_41 {dimension_numbers = #tpu.dot_dimension_numbers<[1], [0], [0], [1], [0, 0, 1, 1], [], []>} : vector<128x128xbf16>, vector<128x128xbf16>, vector<128x128xf32> -> vector<128x128xf32>
    %40 = arith.addf %34, %39 : vector<128x128xf32>
    %c0_42 = arith.constant 0 : index
    %c0_43 = arith.constant 0 : index
    %c112 = arith.constant 112 : index
    %c0_44 = arith.constant 0 : index
    %41 = vector.load %arg2[%c0_42, %c0_43, %c112, %c0_44] : memref<1x1x352x128xbf16, #tpu.memory_space<vmem>>, vector<1x1x128x128xbf16>
    %42 = vector.shape_cast %41 : vector<1x1x128x128xbf16> to vector<128x128xbf16>
    %c7 = arith.constant 7 : index
    %c0_45 = arith.constant 0 : index
    %c0_46 = arith.constant 0 : index
    %43 = vector.load %arg3[%c7, %c0_45, %c0_46] : memref<15x128x128xbf16, #tpu.memory_space<vmem>>, vector<1x128x128xbf16>
    %44 = vector.shape_cast %43 : vector<1x128x128xbf16> to vector<128x128xbf16>
    %cst_47 = arith.constant dense<0.000000e+00> : vector<128x128xf32>
    %45 = tpu.matmul %42, %44, %cst_47 {dimension_numbers = #tpu.dot_dimension_numbers<[1], [0], [0], [1], [0, 0, 1, 1], [], []>} : vector<128x128xbf16>, vector<128x128xbf16>, vector<128x128xf32> -> vector<128x128xf32>
    %46 = arith.addf %40, %45 : vector<128x128xf32>
    %c0_48 = arith.constant 0 : index
    %c0_49 = arith.constant 0 : index
    %c128 = arith.constant 128 : index
    %c0_50 = arith.constant 0 : index
    %47 = vector.load %arg2[%c0_48, %c0_49, %c128, %c0_50] : memref<1x1x352x128xbf16, #tpu.memory_space<vmem>>, vector<1x1x128x128xbf16>
    %48 = vector.shape_cast %47 : vector<1x1x128x128xbf16> to vector<128x128xbf16>
    %c8 = arith.constant 8 : index
    %c0_51 = arith.constant 0 : index
    %c0_52 = arith.constant 0 : index
    %49 = vector.load %arg3[%c8, %c0_51, %c0_52] : memref<15x128x128xbf16, #tpu.memory_space<vmem>>, vector<1x128x128xbf16>
    %50 = vector.shape_cast %49 : vector<1x128x128xbf16> to vector<128x128xbf16>
    %cst_53 = arith.constant dense<0.000000e+00> : vector<128x128xf32>
    %51 = tpu.matmul %48, %50, %cst_53 {dimension_numbers = #tpu.dot_dimension_numbers<[1], [0], [0], [1], [0, 0, 1, 1], [], []>} : vector<128x128xbf16>, vector<128x128xbf16>, vector<128x128xf32> -> vector<128x128xf32>
    %52 = arith.addf %46, %51 : vector<128x128xf32>
    %c0_54 = arith.constant 0 : index
    %c0_55 = arith.constant 0 : index
    %c144 = arith.constant 144 : index
    %c0_56 = arith.constant 0 : index
    %53 = vector.load %arg2[%c0_54, %c0_55, %c144, %c0_56] : memref<1x1x352x128xbf16, #tpu.memory_space<vmem>>, vector<1x1x128x128xbf16>
    %54 = vector.shape_cast %53 : vector<1x1x128x128xbf16> to vector<128x128xbf16>
    %c9 = arith.constant 9 : index
    %c0_57 = arith.constant 0 : index
    %c0_58 = arith.constant 0 : index
    %55 = vector.load %arg3[%c9, %c0_57, %c0_58] : memref<15x128x128xbf16, #tpu.memory_space<vmem>>, vector<1x128x128xbf16>
    %56 = vector.shape_cast %55 : vector<1x128x128xbf16> to vector<128x128xbf16>
    %cst_59 = arith.constant dense<0.000000e+00> : vector<128x128xf32>
    %57 = tpu.matmul %54, %56, %cst_59 {dimension_numbers = #tpu.dot_dimension_numbers<[1], [0], [0], [1], [0, 0, 1, 1], [], []>} : vector<128x128xbf16>, vector<128x128xbf16>, vector<128x128xf32> -> vector<128x128xf32>
    %58 = arith.addf %52, %57 : vector<128x128xf32>
    %c0_60 = arith.constant 0 : index
    %c0_61 = arith.constant 0 : index
    %c160 = arith.constant 160 : index
    %c0_62 = arith.constant 0 : index
    %59 = vector.load %arg2[%c0_60, %c0_61, %c160, %c0_62] : memref<1x1x352x128xbf16, #tpu.memory_space<vmem>>, vector<1x1x128x128xbf16>
    %60 = vector.shape_cast %59 : vector<1x1x128x128xbf16> to vector<128x128xbf16>
    %c10 = arith.constant 10 : index
    %c0_63 = arith.constant 0 : index
    %c0_64 = arith.constant 0 : index
    %61 = vector.load %arg3[%c10, %c0_63, %c0_64] : memref<15x128x128xbf16, #tpu.memory_space<vmem>>, vector<1x128x128xbf16>
    %62 = vector.shape_cast %61 : vector<1x128x128xbf16> to vector<128x128xbf16>
    %cst_65 = arith.constant dense<0.000000e+00> : vector<128x128xf32>
    %63 = tpu.matmul %60, %62, %cst_65 {dimension_numbers = #tpu.dot_dimension_numbers<[1], [0], [0], [1], [0, 0, 1, 1], [], []>} : vector<128x128xbf16>, vector<128x128xbf16>, vector<128x128xf32> -> vector<128x128xf32>
    %64 = arith.addf %58, %63 : vector<128x128xf32>
    %c0_66 = arith.constant 0 : index
    %c0_67 = arith.constant 0 : index
    %c176 = arith.constant 176 : index
    %c0_68 = arith.constant 0 : index
    %65 = vector.load %arg2[%c0_66, %c0_67, %c176, %c0_68] : memref<1x1x352x128xbf16, #tpu.memory_space<vmem>>, vector<1x1x128x128xbf16>
    %66 = vector.shape_cast %65 : vector<1x1x128x128xbf16> to vector<128x128xbf16>
    %c11 = arith.constant 11 : index
    %c0_69 = arith.constant 0 : index
    %c0_70 = arith.constant 0 : index
    %67 = vector.load %arg3[%c11, %c0_69, %c0_70] : memref<15x128x128xbf16, #tpu.memory_space<vmem>>, vector<1x128x128xbf16>
    %68 = vector.shape_cast %67 : vector<1x128x128xbf16> to vector<128x128xbf16>
    %cst_71 = arith.constant dense<0.000000e+00> : vector<128x128xf32>
    %69 = tpu.matmul %66, %68, %cst_71 {dimension_numbers = #tpu.dot_dimension_numbers<[1], [0], [0], [1], [0, 0, 1, 1], [], []>} : vector<128x128xbf16>, vector<128x128xbf16>, vector<128x128xf32> -> vector<128x128xf32>
    %70 = arith.addf %64, %69 : vector<128x128xf32>
    %c0_72 = arith.constant 0 : index
    %c0_73 = arith.constant 0 : index
    %c192 = arith.constant 192 : index
    %c0_74 = arith.constant 0 : index
    %71 = vector.load %arg2[%c0_72, %c0_73, %c192, %c0_74] : memref<1x1x352x128xbf16, #tpu.memory_space<vmem>>, vector<1x1x128x128xbf16>
    %72 = vector.shape_cast %71 : vector<1x1x128x128xbf16> to vector<128x128xbf16>
    %c12 = arith.constant 12 : index
    %c0_75 = arith.constant 0 : index
    %c0_76 = arith.constant 0 : index
    %73 = vector.load %arg3[%c12, %c0_75, %c0_76] : memref<15x128x128xbf16, #tpu.memory_space<vmem>>, vector<1x128x128xbf16>
    %74 = vector.shape_cast %73 : vector<1x128x128xbf16> to vector<128x128xbf16>
    %cst_77 = arith.constant dense<0.000000e+00> : vector<128x128xf32>
    %75 = tpu.matmul %72, %74, %cst_77 {dimension_numbers = #tpu.dot_dimension_numbers<[1], [0], [0], [1], [0, 0, 1, 1], [], []>} : vector<128x128xbf16>, vector<128x128xbf16>, vector<128x128xf32> -> vector<128x128xf32>
    %76 = arith.addf %70, %75 : vector<128x128xf32>
    %c0_78 = arith.constant 0 : index
    %c0_79 = arith.constant 0 : index
    %c208 = arith.constant 208 : index
    %c0_80 = arith.constant 0 : index
    %77 = vector.load %arg2[%c0_78, %c0_79, %c208, %c0_80] : memref<1x1x352x128xbf16, #tpu.memory_space<vmem>>, vector<1x1x128x128xbf16>
    %78 = vector.shape_cast %77 : vector<1x1x128x128xbf16> to vector<128x128xbf16>
    %c13 = arith.constant 13 : index
    %c0_81 = arith.constant 0 : index
    %c0_82 = arith.constant 0 : index
    %79 = vector.load %arg3[%c13, %c0_81, %c0_82] : memref<15x128x128xbf16, #tpu.memory_space<vmem>>, vector<1x128x128xbf16>
    %80 = vector.shape_cast %79 : vector<1x128x128xbf16> to vector<128x128xbf16>
    %cst_83 = arith.constant dense<0.000000e+00> : vector<128x128xf32>
    %81 = tpu.matmul %78, %80, %cst_83 {dimension_numbers = #tpu.dot_dimension_numbers<[1], [0], [0], [1], [0, 0, 1, 1], [], []>} : vector<128x128xbf16>, vector<128x128xbf16>, vector<128x128xf32> -> vector<128x128xf32>
    %82 = arith.addf %76, %81 : vector<128x128xf32>
    %c0_84 = arith.constant 0 : index
    %c0_85 = arith.constant 0 : index
    %c224 = arith.constant 224 : index
    %c0_86 = arith.constant 0 : index
    %83 = vector.load %arg2[%c0_84, %c0_85, %c224, %c0_86] : memref<1x1x352x128xbf16, #tpu.memory_space<vmem>>, vector<1x1x128x128xbf16>
    %84 = vector.shape_cast %83 : vector<1x1x128x128xbf16> to vector<128x128xbf16>
    %c14 = arith.constant 14 : index
    %c0_87 = arith.constant 0 : index
    %c0_88 = arith.constant 0 : index
    %85 = vector.load %arg3[%c14, %c0_87, %c0_88] : memref<15x128x128xbf16, #tpu.memory_space<vmem>>, vector<1x128x128xbf16>
    %86 = vector.shape_cast %85 : vector<1x128x128xbf16> to vector<128x128xbf16>
    %cst_89 = arith.constant dense<0.000000e+00> : vector<128x128xf32>
    %87 = tpu.matmul %84, %86, %cst_89 {dimension_numbers = #tpu.dot_dimension_numbers<[1], [0], [0], [1], [0, 0, 1, 1], [], []>} : vector<128x128xbf16>, vector<128x128xbf16>, vector<128x128xf32> -> vector<128x128xf32>
    %88 = arith.addf %82, %87 : vector<128x128xf32>
    %c0_90 = arith.constant 0 : index
    %c0_91 = arith.constant 0 : index
    %89 = vector.load %arg4[%c0_90, %c0_91] : memref<1x128xf32, #tpu.memory_space<vmem>>, vector<1x128xf32>
    %90 = vector.broadcast %89 : vector<1x128xf32> to vector<128x128xf32>
    %91 = arith.addf %88, %90 : vector<128x128xf32>
    %cst_92 = arith.constant 0.000000e+00 : f32
    %92 = vector.broadcast %cst_92 : f32 to vector<128x128xf32>
    %93 = arith.maximumf %91, %92 : vector<128x128xf32>
    %94 = arith.truncf %93 : vector<128x128xf32> to vector<128x128xbf16>
    %c0_93 = arith.constant 0 : index
    %c0_94 = arith.constant 0 : index
    %c0_95 = arith.constant 0 : index
    %c0_96 = arith.constant 0 : index
    %95 = vector.load %arg5[%c0_93, %c0_94, %c0_95, %c0_96] : memref<1x1x128x128xbf16, #tpu.memory_space<vmem>>, vector<1x1x128x128xbf16>
    %96 = vector.shape_cast %95 : vector<1x1x128x128xbf16> to vector<128x128xbf16>
    %97 = vector.shape_cast %94 : vector<128x128xbf16> to vector<1x1x128x128xbf16>
    tpu.vector_store %arg5[%c0_93, %c0_94, %c0_95, %c0_96], %97 {strides = array<i32>} : memref<1x1x128x128xbf16, #tpu.memory_space<vmem>>, vector<1x1x128x128xbf16>,
    return
  }
  func.func @transform_0(%arg0: i32, %arg1: i32) -> (i32, i32, i32, i32) {
    %c0_i32 = arith.constant 0 : i32
    %c0_i32_0 = arith.constant 0 : i32
    %c0_i32_1 = arith.constant 0 : i32
    return %arg0, %arg1, %c0_i32, %c0_i32_0 : i32, i32, i32, i32
  }
  func.func @transform_1(%arg0: i32, %arg1: i32) -> (i32, i32, i32) {
    %c0_i32 = arith.constant 0 : i32
    %c0_i32_0 = arith.constant 0 : i32
    %c0_i32_1 = arith.constant 0 : i32
    %c0_i32_2 = arith.constant 0 : i32
    return %c0_i32, %c0_i32_0, %c0_i32_1 : i32, i32, i32
  }
  func.func @transform_2(%arg0: i32, %arg1: i32) -> (i32, i32) {
    %c0_i32 = arith.constant 0 : i32
    %c0_i32_0 = arith.constant 0 : i32
    %c0_i32_1 = arith.constant 0 : i32
    return %c0_i32, %c0_i32_0 : i32, i32
  }
  func.func @transform_3(%arg0: i32, %arg1: i32) -> (i32, i32, i32, i32) {
    %c0_i32 = arith.constant 0 : i32
    %c0_i32_0 = arith.constant 0 : i32
    %c0_i32_1 = arith.constant 0 : i32
    return %arg0, %arg1, %c0_i32, %c0_i32_0 : i32, i32, i32, i32
  }
}

</mosaic_0001>

<bundles_post_ra>
// kernel: conv_block_forward.4
= control target key start
LH: loop header
LB: loop body
LE: loop exit
PB: predicated region body
PF: predicated region fallthrough
CT: control target
= control target key end

     0   :  { %s8308_s20 = smov 0   ;;  %s8310_s21 = smov 0   ;;  %s9549_s0 = inlined_call_operand.vmem [shape: bf16[15,60,128], index: 0, kind: input, shape index: {}]   ;;  %s9550_s1 = inlined_call_operand.vmem [shape: f32[1,128], index: 1, kind: input, shape index: {}]   ;;  %s9551_s2 = inlined_call_operand.vmem [shape: bf16[2,1,352,60], index: 2, kind: input, shape index: {}]   ;;  %s9552_s3 = inlined_call_operand.<no memory space> [shape: bf16[], index: 3, kind: input, shape index: {}]   ;;  %s9553_s4 = inlined_call_operand.vmem [shape: bf16[2,1,352,60], index: 4, kind: input, shape index: {}]   ;;  %s9554_s5 = inlined_call_operand.vmem [shape: bf16[2,2,128,128], index: 5, kind: output, shape index: {}]  }
   0x1   :  { %v10_v0 = vstv %s9552_s3  ;;  %s8312_s22 = smov 0   ;;  %s8314_s23 = smov 0  }
   0x2   :  { %v8306_v1 = vunpack.i.l.bf16 %v10_v0  ;;  %s8316_s24 = smov 0  }
   0x3 LB: > { %s34_s3 = sadd.s32 1, %s8263_s22  ;;  %s37_s25 = sadd.s32 1, %s8267_s23  ;;  %s8271_s24 = sphi %s8316_s24, %s25_s24   ;;  %s8267_s23 = sphi %s8314_s23, %s9560_s23   ;;  %s8263_s22 = sphi %s8312_s22, %s9559_s22   ;;  %s8259_s21 = sphi %s8310_s21, %s9558_s21   ;;  %s8255_s20 = sphi %s8308_s20, %s9557_s20  }
   0x4   : > { %p35_p0 = scmp.ge.s32.totalorder %s34_s3, 2  ;;  %p6469_p1 = scmp.ge.s32.totalorder %s8271_s24, 1 }
   0x5   : > { %p224_p2 = scmp.lt.s32.totalorder %s8271_s24, 5 }
   0x6   : > { %s9562_s3 = smov (%p35_p0, %s34_s3), 0  ;;  %s9564_s25 = smov (!%p35_p0, %s37_s25), %s8267_s23 }
   0x7   : > { %p225_p3 = pnand %p6469_p1, %p224_p2  ;;  %p39_p4 = scmp.ge.s32.totalorder %s9564_s25, 2 }
   0x9   : > { %s9566_s25 = smov (%p39_p4, %s9564_s25), 0  ;;  %228 = sbr.rel (%p225_p3) target bundleno = 531 (0x213), region = 36 }
  0x10   : > { %v8056_v2 = vld [vmem:[%s9549_s0 + $0x20] sm:$0xff]   ;;  %p279_p5 = scmp.lt.s32.totalorder %s8259_s21, 1  ;;  %v8058_v4 = vld [vmem:[%s9549_s0 + $0x28] sm:$0xff]   ;;  %s8350_s7 = sadd.s32 4294967295, %s8255_s20  ;;  %v8060_v6 = vld [vmem:[%s9549_s0 + $0x30] sm:$0xff]   ;;  %vm3034_vm0 = vcmask 1045504   ;;  %v336_v14 = vlaneseq }
  0x11   : > { %v8057_v3 = vld [vmem:[%s9549_s0 + $0xe0] sm:$0xff]   ;;  %7405 = vmatprep.subr.bf16.mxu1 %v8056_v2  ;;  %v8059_v5 = vld [vmem:[%s9549_s0 + $0xe8] sm:$0xff]   ;;  %v8061_v7 = vld [vmem:[%s9549_s0 + $0xf0] sm:$0xff]   ;;  %p282_p6 = scmp.lt.s32.totalorder %s8350_s7, 0  ;;  %p298_p7 = scmp.lt.s32.totalorder %s8255_s20, 0  ;;  %v333_v17 = vstv %s8350_s7  ;;  %vm3009_vm4 = vcmask 490496  }
  0x12   : > { %7573 = vmatprep.subr.bf16.mxu0 %v8057_v3  ;;  %7406 = vmatpush3.bf16.msra.mxu1 %v8056_v2  ;;  %s9568_s21 = smov (!%p279_p5, %s8259_s21), 1  ;;  %v8062_v8 = vld [vmem:[%s9549_s0 + $0x38] sm:$0x3f]   ;;  %s341_s27 = ssub.s32 0, %s8255_s20  ;;  %v8381_v11 = vld [vmem:[%s9549_s0] sm:$0xff]   ;;  %v8410_v15 = vand.u32 127, %v336_v14 }
  0x13   : > { %7574 = vmatpush3.bf16.msra.mxu0 %v8057_v3  ;;  %7407 = vmatprep.subr.bf16.mxu1 %v8058_v4  ;;  %s8014_s16 = smul.u32 44, %s9568_s21  ;;  %v8063_v9 = vld [vmem:[%s9549_s0 + $0xf8] sm:$0x3f]   ;;  %v3036_v10 = vsel %vm3034_vm0, %v8062_v8, 0  ;;  %v8391_v13 = vld [vmem:[%s9549_s0 + $0x100] sm:$0xff]   ;;  %p342_p8 = scmp.lt.s32.totalorder %s341_s27, 0  ;;  %v8425_v19 = vstv %s341_s27 }
  0x14   : > { %7575 = vmatprep.subr.bf16.mxu0 %v8059_v5  ;;  %s283_s17 = scalar_select %p282_p6, %s8350_s7, 0  ;;  %v8386_v12 = vsel %vm3034_vm0, %v8063_v9, 0  ;;  %v8415_v16 = vld [vmem:[%s9549_s0 + $0x118] sm:$0x3f]   ;;  %vm8429_vm1 = vcmp.lt.s32.totalorder %v333_v17, 0  ;;  %vm339_vm2 = vcmp.lt.s32.totalorder %v8410_v15, 60 }
  0x15   : > { %s299_s28 = scalar_select %p298_p7, %s8255_s20, 0  ;;  %v8421_v18 = vld [vmem:[%s9549_s0 + $0x18] sm:$0x3f]   ;;  %vm358_vm3 = vcmp.lt.s32.totalorder %v8425_v19, 0  ;;  %v8451_v31 = vsel %vm3034_vm0, %v8415_v16, 0  ;;  %v8194_v19 = vld [vmem:[%s9549_s0 + $0x1c0] sm:$0xff]  }
  0x16   : > { %7408 = vmatpush3.bf16.msra.mxu1 %v8058_v4  ;;  %s8013_s26 = smul.u32 44, %s283_s17  ;;  %v8455_v32 = vsel %vm3034_vm0, %v8421_v18, 0  ;;  %p310_p9 = scmp.lt.s32.totalorder %s8255_s20, 1 }
  0x17   : > { %7576 = vmatpush3.bf16.msra.mxu0 %v8059_v5  ;;  %7409 = vmatprep.subr.bf16.mxu1 %v8060_v6  ;;  %s8015_s9 = smul.u32 44, %s299_s28  ;;  %s6474_s28 = sshll.u32 %s9568_s21, 5 }
  0x18   : > { %7577 = vmatprep.subr.bf16.mxu0 %v8061_v7  ;;  %s286_s6 = sadd.s32 %s8014_s16, %s8013_s26  ;;  %s9570_s20 = smov (!%p310_p9, %s8255_s20), 1 }
  0x19   : > { %s6471_s8 = sshll.u32 %s286_s6, 2  ;;  %s302_s12 = sadd.s32 %s8015_s9, %s8014_s16 }
  0x1a   : > { %7410 = vmatpush3.bf16.msra.mxu1 %v8060_v6  ;;  %s8400_s15 = scalar_lea.vmem %s9551_s2, %s6471_s8  ;;  %s6472_s17 = sshll.u32 %s302_s12, 2 }
  0x1b   : > { %7578 = vmatpush3.bf16.msra.mxu0 %v8061_v7  ;;  %7997 = vmatprep.subr.msk.bf16.mxu1 %vm3034_vm0, %v8062_v8  ;;  %s319_s18 = scalar_select %p282_p6, 0, 255 }
  0x1c   : > { %8004 = vmatprep.subr.msk.bf16.mxu0 %vm3034_vm0, %v8063_v9  ;;  %s343_s19 = scalar_select %p342_p8, 0, 255 }
  0x1d   : > { %s8408_s16 = scalar_lea.vmem %s9553_s4, %s6472_s17  ;;  %s320_s29 = sshrl.u32 %s319_s18, 1 }
  0x1e   : > { %7412 = vmatpush3.bf16.msra.mxu1 %v3036_v10  ;;  %s321_s30 = sor.u32 %s320_s29, %s319_s18  ;;  %s344_s6 = sshrl.u32 %s343_s19, 1 }
  0x1f   : > { %7580 = vmatpush3.bf16.msra.mxu0 %v8386_v12  ;;  %7429 = vmatprep.subr.bf16.mxu1 %v8381_v11  ;;  %s322_s9 = sand.u32 85, %s321_s30  ;;  %s345_s8 = sor.u32 %s344_s6, %s343_s19 }
  0x20   : > { %7597 = vmatprep.subr.bf16.mxu0 %v8391_v13  ;;  %s323_s10 = sshrl.u32 %s322_s9, 1  ;;  %s346_s11 = sand.u32 85, %s345_s8 }
  0x21   : > { %s324_s12 = sor.u32 %s323_s10, %s322_s9  ;;  %s347_s13 = sshrl.u32 %s346_s11, 1 }
  0x22   : > { %s325_s14 = sand.u32 51, %s324_s12  ;;  %s348_s26 = sor.u32 %s347_s13, %s346_s11 }
  0x23   : > { %s326_s18 = sshrl.u32 %s325_s14, 2  ;;  %s349_s29 = sand.u32 51, %s348_s26 }
  0x24   : > { %s327_s6 = sor.u32 %s326_s18, %s325_s14  ;;  %s350_s9 = sshrl.u32 %s349_s29, 2 }
  0x25   : > { %s8427_s8 = sand.u32 15, %s327_s6  ;;  %s351_s7 = sor.u32 %s350_s9, %s349_s29 }
  0x26   : > { %s8433_s10 = sand.u32 15, %s351_s7  ;;  %v6483_v21 = vld [vmem:[%s8400_s15 + $0x8] sm:%s8427_s8]  ;;  %v6531_v29 = vld [vmem:[%s8400_s15 + $0x38] sm:%s8427_s8]  ;;  %s6473_s17 = sshll.u32 %s9570_s20, 4 }
  0x27   : > { %v6487_v22 = vld [vmem:[%s8400_s15 + $0xc] sm:%s8427_s8]  ;;  %v446_v23 = vunpack.c.l.bf16 %v6483_v21  ;;  %v6533_v30 = vld [vmem:[%s8408_s16 + $0x38] sm:%s8433_s10]  ;;  %v1154_v35 = vunpack.c.l.bf16 %v6531_v29  ;;  %s314_s19 = sadd.s32 %s6474_s28, %s6473_s17 }
  0x28   : > { %v6485_v24 = vld [vmem:[%s8408_s16 + $0x8] sm:%s8433_s10]  ;;  %v496_v25 = vunpack.c.l.bf16 %v6487_v22  ;;  %v1179_v36 = vunpack.c.l.bf16 %v6533_v30  ;;  %v6535_v37 = vld [vmem:[%s8400_s15 + $0x3c] sm:%s8427_s8]  ;;  %s6475_s20 = sshll.u32 %s314_s19, 2 }
  0x29   : > { %v6489_v26 = vld [vmem:[%s8408_s16 + $0xc] sm:%s8433_s10]  ;;  %v471_v27 = vunpack.c.l.bf16 %v6485_v24  ;;  %v451_v33 = vsel %vm8429_vm1, %v8306_v1, %v446_v23  ;;  %v6537_v38 = vld [vmem:[%s8408_s16 + $0x3c] sm:%s8433_s10]  ;;  %v1159_v48 = vsel %vm8429_vm1, %v8306_v1, %v1154_v35  ;;  %v1204_v54 = vunpack.c.l.bf16 %v6535_v37  ;;  %s9512_s6 = scalar_lea.vmem %s9554_s5, %s6475_s20 }
  0x2a   : > { %v521_v28 = vunpack.c.l.bf16 %v6489_v26  ;;  %v501_v34 = vsel %vm8429_vm1, %v8306_v1, %v496_v25  ;;  %v456_v39 = vsel %vm339_vm2, %v451_v33, %v8306_v1  ;;  %v6491_v43 = vld [vmem:[%s8400_s15 + $0x10] sm:%s8427_s8]  ;;  %v1164_v52 = vsel %vm339_vm2, %v1159_v48, %v8306_v1  ;;  %v6539_v63 = vld [vmem:[%s8400_s15 + $0x40] sm:%s8427_s8] }
  0x2b   : > { %v476_v40 = vsel %vm358_vm3, %v8306_v1, %v471_v27  ;;  %v506_v41 = vsel %vm339_vm2, %v501_v34, %v8306_v1  ;;  %v6493_v44 = vld [vmem:[%s8408_s16 + $0x10] sm:%s8433_s10]  ;;  %v1184_v53 = vsel %vm358_vm3, %v8306_v1, %v1179_v36  ;;  %v1229_v56 = vunpack.c.l.bf16 %v6537_v38  ;;  %v6541_v5 = vld [vmem:[%s8408_s16 + $0x40] sm:%s8433_s10] }
  0x2c   : > { %v526_v42 = vsel %vm358_vm3, %v8306_v1, %v521_v28  ;;  %v481_v45 = vsel %vm339_vm2, %v476_v40, %v8306_v1  ;;  %v532_v47 = vpack.c.bf16 %v506_v41, %v456_v39  ;;  %v6495_v49 = vld [vmem:[%s8400_s15 + $0x14] sm:%s8427_s8]  ;;  %v1189_v55 = vsel %vm339_vm2, %v1184_v53, %v8306_v1  ;;  %v6543_v6 = vld [vmem:[%s8400_s15 + $0x44] sm:%s8427_s8] }
  0x2d   : > { %v531_v46 = vsel %vm339_vm2, %v526_v42, %v8306_v1  ;;  %v6497_v50 = vld [vmem:[%s8408_s16 + $0x14] sm:%s8433_s10]  ;;  %v564_v57 = vunpack.c.l.bf16 %v6491_v43  ;;  %v589_v58 = vunpack.c.l.bf16 %v6493_v44  ;;  %v1209_v60 = vsel %vm8429_vm1, %v8306_v1, %v1204_v54  ;;  %v6545_v23 = vld [vmem:[%s8408_s16 + $0x44] sm:%s8433_s10] }
  0x2e   : > { %v534_v51 = vpack.c.bf16 %v531_v46, %v481_v45  ;;  %v614_v61 = vunpack.c.l.bf16 %v6495_v49  ;;  %v639_v62 = vunpack.c.l.bf16 %v6497_v50  ;;  %v1214_v0 = vsel %vm339_vm2, %v1209_v60, %v8306_v1  ;;  %v6499_v28 = vld [vmem:[%s8400_s15 + $0x18] sm:%s8427_s8]  ;;  %v6547_v42 = vld [vmem:[%s8400_s15 + $0x48] sm:%s8427_s8] }
  0x2f   : > { %v1234_v2 = vsel %vm358_vm3, %v8306_v1, %v1229_v56  ;;  %v569_v3 = vsel %vm8429_vm1, %v8306_v1, %v564_v57  ;;  %v594_v4 = vsel %vm358_vm3, %v8306_v1, %v589_v58  ;;  %v1240_v8 = vpack.c.bf16 %v1214_v0, %v1164_v52  ;;  %v6501_v35 = vld [vmem:[%s8408_s16 + $0x18] sm:%s8433_s10]  ;;  %v6551_v52 = vld [vmem:[%s8400_s15 + $0x4c] sm:%s8427_s8] }
  0x30   : > { %v538_v59 = vmax.bf16 %v534_v51, %v532_v47  ;;  %v1239_v7 = vsel %vm339_vm2, %v1234_v2, %v8306_v1  ;;  %v574_v9 = vsel %vm339_vm2, %v569_v3, %v8306_v1  ;;  %v599_v10 = vsel %vm339_vm2, %v594_v4, %v8306_v1  ;;  %v6503_v36 = vld [vmem:[%s8400_s15 + $0x1c] sm:%s8427_s8]  ;;  %v6549_v51 = vld [vmem:[%s8408_s16 + $0x48] sm:%s8433_s10] }
  0x31   : > { %v1242_v14 = vpack.c.bf16 %v1239_v7, %v1189_v55  ;;  %v619_v17 = vsel %vm8429_vm1, %v8306_v1, %v614_v61  ;;  %v644_v21 = vsel %vm358_vm3, %v8306_v1, %v639_v62  ;;  %v1272_v22 = vunpack.c.l.bf16 %v6539_v63  ;;  %v6505_v41 = vld [vmem:[%s8408_s16 + $0x1c] sm:%s8433_s10]  ;;  %v6553_v53 = vld [vmem:[%s8408_s16 + $0x4c] sm:%s8433_s10] }
  0x32   : > { %7097 = vst [vmem:[#allocation12 + $0x8] sm:$0xff] %v538_v59   ;;  %v624_v24 = vsel %vm339_vm2, %v619_v17, %v8306_v1  ;;  %v649_v25 = vsel %vm339_vm2, %v644_v21, %v8306_v1  ;;  %v1297_v26 = vunpack.c.l.bf16 %v6541_v5  ;;  %v1322_v27 = vunpack.c.l.bf16 %v6543_v6  ;;  %v6507_v63 = vld [vmem:[%s8400_s15 + $0x20] sm:%s8427_s8] }
  0x33   : > { %v1246_v29 = vmax.bf16 %v1242_v14, %v1240_v8  ;;  %v650_v30 = vpack.c.bf16 %v624_v24, %v574_v9  ;;  %v652_v33 = vpack.c.bf16 %v649_v25, %v599_v10  ;;  %v1277_v34 = vsel %vm8429_vm1, %v8306_v1, %v1272_v22  ;;  %v6509_v0 = vld [vmem:[%s8408_s16 + $0x20] sm:%s8433_s10]  ;;  %v6555_v24 = vld [vmem:[%s8400_s15 + $0x50] sm:%s8427_s8] }
  0x34   : > { %v1282_v37 = vsel %vm339_vm2, %v1277_v34, %v8306_v1  ;;  %v1302_v38 = vsel %vm358_vm3, %v8306_v1, %v1297_v26  ;;  %v1327_v39 = vsel %vm8429_vm1, %v8306_v1, %v1322_v27  ;;  %v1347_v40 = vunpack.c.l.bf16 %v6545_v23  ;;  %v6511_v6 = vld [vmem:[%s8400_s15 + $0x24] sm:%s8427_s8] }
  0x35   : > { %7121 = vst [vmem:[#allocation12 + $0x38] sm:$0xff] %v1246_v29   ;;  %v656_v43 = vmax.bf16 %v652_v33, %v650_v30  ;;  %v1307_v44 = vsel %vm339_vm2, %v1302_v38, %v8306_v1  ;;  %v1332_v45 = vsel %vm339_vm2, %v1327_v39, %v8306_v1  ;;  %v682_v46 = vunpack.c.l.bf16 %v6499_v28  ;;  %v6513_v7 = vld [vmem:[%s8408_s16 + $0x24] sm:%s8433_s10] }
  0x36   : > { %v1352_v47 = vsel %vm358_vm3, %v8306_v1, %v1347_v40  ;;  %v1358_v48 = vpack.c.bf16 %v1332_v45, %v1282_v37  ;;  %v707_v49 = vunpack.c.l.bf16 %v6501_v35  ;;  %v732_v50 = vunpack.c.l.bf16 %v6503_v36  ;;  %v8072_v26 = vld [vmem:[%s9549_s0 + $0x8] sm:$0xff]   ;;  %v6557_v37 = vld [vmem:[%s8408_s16 + $0x50] sm:%s8433_s10] }
  0x37   : > { %7101 = vst [vmem:[#allocation12 + $0x10] sm:$0xff] %v656_v43   ;;  %v1357_v55 = vsel %vm339_vm2, %v1352_v47, %v8306_v1  ;;  %v687_v56 = vsel %vm8429_vm1, %v8306_v1, %v682_v46  ;;  %v757_v57 = vunpack.c.l.bf16 %v6505_v41  ;;  %v1390_v58 = vunpack.c.l.bf16 %v6547_v42  ;;  %v6559_v47 = vld [vmem:[%s8400_s15 + $0x54] sm:%s8427_s8] }
  0x38   : > { %v1360_v59 = vpack.c.bf16 %v1357_v55, %v1307_v44  ;;  %v692_v60 = vsel %vm339_vm2, %v687_v56, %v8306_v1  ;;  %v712_v61 = vsel %vm358_vm3, %v8306_v1, %v707_v49  ;;  %v737_v62 = vsel %vm8429_vm1, %v8306_v1, %v732_v50  ;;  %v8070_v55 = vld [vmem:[%s9549_s0 + $0x108] sm:$0xff]  }
  0x39   : > { %v8586_v54 = vld [vmem:[#allocation12 + $0x8] sm:$0xff]   ;;  %v717_v2 = vsel %vm339_vm2, %v712_v61, %v8306_v1  ;;  %v742_v3 = vsel %vm339_vm2, %v737_v62, %v8306_v1  ;;  %v762_v4 = vsel %vm358_vm3, %v8306_v1, %v757_v57  ;;  %v1395_v5 = vsel %vm8429_vm1, %v8306_v1, %v1390_v58 }
  0x3a   : > { %7413 = vmatprep.mubr.msk.bf16.mxu1 %vm3009_vm4, %v8586_v54  ;;  %v1364_v8 = vmax.bf16 %v1360_v59, %v1358_v48  ;;  %v767_v9 = vsel %vm339_vm2, %v762_v4, %v8306_v1  ;;  %v768_v10 = vpack.c.bf16 %v742_v3, %v692_v60  ;;  %v1400_v14 = vsel %vm339_vm2, %v1395_v5, %v8306_v1  ;;  %v6517_v60 = vld [vmem:[%s8408_s16 + $0x28] sm:%s8433_s10] }
  0x3b   : > { %v770_v17 = vpack.c.bf16 %v767_v9, %v717_v2  ;;  %v1415_v21 = vunpack.c.l.bf16 %v6549_v51  ;;  %v1440_v22 = vunpack.c.l.bf16 %v6551_v52  ;;  %v1465_v23 = vunpack.c.l.bf16 %v6553_v53  ;;  %v6561_v52 = vld [vmem:[%s8408_s16 + $0x54] sm:%s8433_s10]  ;;  %v6515_v53 = vld [vmem:[%s8400_s15 + $0x28] sm:%s8427_s8] }
  0x3c   : > { %v8066_v25 = vld [vmem:[#allocation12 + $0x38] sm:$0xff]   ;;  %7125 = vst [vmem:[#allocation12 + $0x40] sm:$0xff] %v1364_v8   ;;  %v800_v27 = vunpack.c.l.bf16 %v6507_v63  ;;  %v825_v28 = vunpack.c.l.bf16 %v6509_v0  ;;  %v850_v29 = vunpack.c.l.bf16 %v6511_v6  ;;  %v875_v30 = vunpack.c.l.bf16 %v6513_v7  ;;  %v6519_v2 = vld [vmem:[%s8400_s15 + $0x2c] sm:%s8427_s8] }
  0x3d   : > { %v774_v33 = vmax.bf16 %v770_v17, %v768_v10  ;;  %v1420_v34 = vsel %vm358_vm3, %v8306_v1, %v1415_v21  ;;  %v1445_v35 = vsel %vm8429_vm1, %v8306_v1, %v1440_v22  ;;  %v1470_v36 = vsel %vm358_vm3, %v8306_v1, %v1465_v23  ;;  %7581 = vmatprep.mubr.msk.bf16.mxu0 %vm3009_vm4, %v8066_v25  ;;  %v6521_v3 = vld [vmem:[%s8408_s16 + $0x2c] sm:%s8433_s10]  ;;  %v6527_v23 = vld [vmem:[%s8400_s15 + $0x34] sm:%s8427_s8] }
  0x3e   : > { %v8648_v38 = vld [vmem:[#allocation12 + $0x10] sm:$0xff]   ;;  %v1425_v39 = vsel %vm339_vm2, %v1420_v34, %v8306_v1  ;;  %v1450_v40 = vsel %vm339_vm2, %v1445_v35, %v8306_v1  ;;  %v1475_v41 = vsel %vm339_vm2, %v1470_v36, %v8306_v1  ;;  %v805_v42 = vsel %vm8429_vm1, %v8306_v1, %v800_v27 }
  0x3f   : > { %7105 = vst [vmem:[#allocation12 + $0x18] sm:$0xff] %v774_v33   ;;  %v1476_v43 = vpack.c.bf16 %v1450_v40, %v1400_v14  ;;  %v1478_v44 = vpack.c.bf16 %v1475_v41, %v1425_v39  ;;  %v810_v45 = vsel %vm339_vm2, %v805_v42, %v8306_v1  ;;  %v830_v46 = vsel %vm358_vm3, %v8306_v1, %v825_v28  ;;  %v6523_v9 = vld [vmem:[%s8400_s15 + $0x30] sm:%s8427_s8] }
  0x40   : > { %7414 = vmatmul.mubr.msk.bf16.vlgmr.msra.gmra.mrb[0].mxu1 %vm3009_vm4, %v8648_v38  ;;  %v835_v48 = vsel %vm339_vm2, %v830_v46, %v8306_v1  ;;  %v855_v49 = vsel %vm8429_vm1, %v8306_v1, %v850_v29  ;;  %v880_v50 = vsel %vm358_vm3, %v8306_v1, %v875_v30  ;;  %v1508_v51 = vunpack.c.l.bf16 %v6555_v24  ;;  %v6525_v10 = vld [vmem:[%s8408_s16 + $0x30] sm:%s8433_s10]  ;;  %v6565_v46 = vld [vmem:[%s8408_s16 + $0x58] sm:%s8433_s10] }
  0x41   : > { %7430 = vmatpush3.bf16.msra.mxu1 %v8381_v11  ;;  %v1482_v56 = vmax.bf16 %v1478_v44, %v1476_v43  ;;  %v860_v57 = vsel %vm339_vm2, %v855_v49, %v8306_v1  ;;  %v885_v58 = vsel %vm339_vm2, %v880_v50, %v8306_v1  ;;  %v1533_v59 = vunpack.c.l.bf16 %v6557_v37  ;;  %v8079_v11 = vld [vmem:[%s9549_s0 + $0x10] sm:$0xff]  }
  0x42   : > { %7431 = vmatprep.subr.bf16.mxu1 %v8072_v26  ;;  %v886_v61 = vpack.c.bf16 %v860_v57, %v810_v45  ;;  %v888_v62 = vpack.c.bf16 %v885_v58, %v835_v48  ;;  %v1513_v63 = vsel %vm8429_vm1, %v8306_v1, %v1508_v51  ;;  %v1558_v0 = vunpack.c.l.bf16 %v6559_v47  ;;  %v6529_v29 = vld [vmem:[%s8408_s16 + $0x34] sm:%s8433_s10]  ;;  %v8770_v47 = vld [vmem:[%s9549_s0 + $0x40] sm:$0xff]  }
  0x43   : > { %v8069_v4 = vld [vmem:[#allocation12 + $0x40] sm:$0xff]   ;;  %7129 = vst [vmem:[#allocation12 + $0x48] sm:$0xff] %v1482_v56   ;;  %v1518_v5 = vsel %vm339_vm2, %v1513_v63, %v8306_v1  ;;  %v1538_v6 = vsel %vm358_vm3, %v8306_v1, %v1533_v59  ;;  %v1583_v7 = vunpack.c.l.bf16 %v6561_v52  ;;  %v918_v8 = vunpack.c.l.bf16 %v6515_v53  ;;  %v8074_v35 = vld [vmem:[%s9549_s0 + $0x110] sm:$0xff]   ;;  %v6563_v45 = vld [vmem:[%s8400_s15 + $0x58] sm:%s8427_s8] }
  0x44   : > { %v892_v14 = vmax.bf16 %v888_v62, %v886_v61  ;;  %v1543_v17 = vsel %vm339_vm2, %v1538_v6, %v8306_v1  ;;  %v1563_v21 = vsel %vm8429_vm1, %v8306_v1, %v1558_v0  ;;  %v943_v22 = vunpack.c.l.bf16 %v6517_v60  ;;  %7582 = vmatmul.mubr.msk.bf16.vlgmr.msra.gmra.mrb[0].mxu0 %vm3009_vm4, %v8069_v4  ;;  %v6567_v52 = vld [vmem:[%s8400_s15 + $0x5c] sm:%s8427_s8] }
  0x45   : > { %7432 = vmatpush3.bf16.msra.mxu1 %v8072_v26  ;;  %v1568_v24 = vsel %vm339_vm2, %v1563_v21, %v8306_v1  ;;  %v1588_v25 = vsel %vm358_vm3, %v8306_v1, %v1583_v7  ;;  %v923_v27 = vsel %vm8429_vm1, %v8306_v1, %v918_v8  ;;  %v968_v28 = vunpack.c.l.bf16 %v6519_v2  ;;  %7598 = vmatpush3.bf16.msra.mxu0 %v8391_v13  ;;  %v6569_v53 = vld [vmem:[%s8408_s16 + $0x5c] sm:%s8433_s10] }
  0x46   : > { %v8738_v30 = vld [vmem:[#allocation12 + $0x18] sm:$0xff]   ;;  %7109 = vst [vmem:[#allocation12 + $0x20] sm:$0xff] %v892_v14   ;;  %v1593_v26 = vsel %vm339_vm2, %v1588_v25, %v8306_v1  ;;  %v1594_v33 = vpack.c.bf16 %v1568_v24, %v1518_v5  ;;  %v928_v34 = vsel %vm339_vm2, %v923_v27, %v8306_v1  ;;  %v948_v13 = vsel %vm358_vm3, %v8306_v1, %v943_v22  ;;  %v329_v63 = vld [vmem:[%s8400_s15] sm:%s8427_s8] }
  0x47   : > { %7599 = vmatprep.subr.bf16.mxu0 %v8070_v55  ;;  %v1596_v36 = vpack.c.bf16 %v1593_v26, %v1543_v17  ;;  %v953_v37 = vsel %vm339_vm2, %v948_v13, %v8306_v1  ;;  %v973_v39 = vsel %vm8429_vm1, %v8306_v1, %v968_v28  ;;  %v993_v40 = vunpack.c.l.bf16 %v6521_v3  ;;  %7433 = vmatprep.subr.bf16.mxu1 %v8079_v11  ;;  %v353_v5 = vld [vmem:[%s8408_s16] sm:%s8433_s10] }
  0x48   : > { %7417 = vmatprep.mubr.msk.bf16.mxu1 %vm3009_vm4, %v8738_v30  ;;  %v978_v41 = vsel %vm339_vm2, %v973_v39, %v8306_v1  ;;  %v1036_v42 = vunpack.c.l.bf16 %v6523_v9  ;;  %v1061_v43 = vunpack.c.l.bf16 %v6525_v10  ;;  %v1086_v44 = vunpack.c.l.bf16 %v6527_v23  ;;  %v8815_v8 = vld [vmem:[%s9549_s0 + $0x120] sm:$0xff]   ;;  %v6579_v39 = vld [vmem:[%s8400_s15 + $0x68] sm:%s8427_s8] }
  0x49   : > { %v1600_v48 = vmax.bf16 %v1596_v36, %v1594_v33  ;;  %v998_v49 = vsel %vm358_vm3, %v8306_v1, %v993_v40  ;;  %v1004_v50 = vpack.c.bf16 %v978_v41, %v928_v34  ;;  %v1111_v51 = vunpack.c.l.bf16 %v6529_v29  ;;  %7434 = vmatpush3.bf16.msra.mxu1 %v8079_v11  ;;  %7600 = vmatpush3.bf16.msra.mxu0 %v8070_v55  ;;  %v6479_v14 = vld [vmem:[%s8400_s15 + $0x4] sm:%s8427_s8] }
  0x4a   : > { %v8073_v56 = vld [vmem:[#allocation12 + $0x48] sm:$0xff]   ;;  %v1003_v57 = vsel %vm339_vm2, %v998_v49, %v8306_v1  ;;  %v1041_v58 = vsel %vm8429_vm1, %v8306_v1, %v1036_v42  ;;  %v1066_v59 = vsel %vm358_vm3, %v8306_v1, %v1061_v43  ;;  %v1091_v60 = vsel %vm8429_vm1, %v8306_v1, %v1086_v44  ;;  %7601 = vmatprep.subr.bf16.mxu0 %v8074_v35  ;;  %v8080_v25 = vld [vmem:[#allocation12 + $0x40] sm:$0xff]  }
  0x4b   : > { %7133 = vst [vmem:[#allocation12 + $0x50] sm:$0xff] %v1600_v48   ;;  %v1006_v55 = vpack.c.bf16 %v1003_v57, %v953_v37  ;;  %v1046_v11 = vsel %vm339_vm2, %v1041_v58, %v8306_v1  ;;  %v1071_v61 = vsel %vm339_vm2, %v1066_v59, %v8306_v1  ;;  %v1096_v62 = vsel %vm339_vm2, %v1091_v60, %v8306_v1  ;;  %v6481_v24 = vld [vmem:[%s8408_s16 + $0x4] sm:%s8433_s10]  ;;  %v6583_v60 = vld [vmem:[%s8400_s15 + $0x6c] sm:%s8427_s8] }
  0x4c   : > { %7585 = vmatprep.mubr.msk.bf16.mxu0 %vm3009_vm4, %v8073_v56  ;;  %v1116_v0 = vsel %vm358_vm3, %v8306_v1, %v1111_v51  ;;  %v1122_v2 = vpack.c.bf16 %v1096_v62, %v1046_v11  ;;  %7998 = vmatprep.subr.msk.bf16.mxu1 %vm3034_vm0, %v8421_v18  ;;  %v1626_v3 = vunpack.c.l.bf16 %v6563_v45  ;;  %v1651_v4 = vunpack.c.l.bf16 %v6565_v46  ;;  %v6573_v33 = vld [vmem:[%s8408_s16 + $0x60] sm:%s8433_s10] }
  0x4d   : > { %v8810_v6 = vld [vmem:[#allocation12 + $0x20] sm:$0xff]   ;;  %v1010_v7 = vmax.bf16 %v1006_v55, %v1004_v50  ;;  %v1121_v9 = vsel %vm339_vm2, %v1116_v0, %v8306_v1  ;;  %7436 = vmatpush3.bf16.msra.mxu1 %v8455_v32  ;;  %v1676_v18 = vunpack.c.l.bf16 %v6567_v52  ;;  %v1701_v10 = vunpack.c.l.bf16 %v6569_v53  ;;  %7602 = vmatpush3.bf16.msra.mxu0 %v8074_v35  ;;  %v6581_v53 = vld [vmem:[%s8408_s16 + $0x68] sm:%s8433_s10]  ;;  %v6587_v0 = vld [vmem:[%s8400_s15 + $0x70] sm:%s8427_s8] }
  0x4e   : > { %v1124_v17 = vpack.c.bf16 %v1121_v9, %v1071_v61  ;;  %v1631_v21 = vsel %vm8429_vm1, %v8306_v1, %v1626_v3  ;;  %v1656_v22 = vsel %vm358_vm3, %v8306_v1, %v1651_v4  ;;  %v330_v23 = vunpack.c.l.bf16 %v329_v63  ;;  %7453 = vmatprep.subr.bf16.mxu1 %v8770_v47  ;;  %v6571_v32 = vld [vmem:[%s8400_s15 + $0x60] sm:%s8427_s8]  ;;  %7418 = vmatmul.mubr.msk.bf16.gmra.mrb[4].mxu1 %vm3009_vm4, %v8810_v6  ;;  %v6585_v63 = vld [vmem:[%s8408_s16 + $0x6c] sm:%s8433_s10] }
  0x4f   : > { %8006 = vmatprep.subr.msk.bf16.mxu0 %vm3034_vm0, %v8415_v16  ;;  %7113 = vst [vmem:[#allocation12 + $0x28] sm:$0xff] %v1010_v7   ;;  %v1636_v27 = vsel %vm339_vm2, %v1631_v21, %v8306_v1  ;;  %v1661_v28 = vsel %vm339_vm2, %v1656_v22, %v8306_v1  ;;  %v1681_v29 = vsel %vm8429_vm1, %v8306_v1, %v1676_v18  ;;  %v354_v26 = vunpack.c.l.bf16 %v353_v5  ;;  %v6575_v34 = vld [vmem:[%s8400_s15 + $0x64] sm:%s8427_s8]  ;;  %v8910_v5 = vld [vmem:[#allocation12 + $0x38] sm:$0xff]  }
  0x50   : > { %v1128_v13 = vmax.bf16 %v1124_v17, %v1122_v2  ;;  %v1686_v16 = vsel %vm339_vm2, %v1681_v29, %v8306_v1  ;;  %v1706_v35 = vsel %vm358_vm3, %v8306_v1, %v1701_v10  ;;  %v335_v36 = vsel %vm8429_vm1, %v8306_v1, %v330_v23  ;;  %v6577_v37 = vld [vmem:[%s8408_s16 + $0x64] sm:%s8433_s10]  ;;  %v6589_v2 = vld [vmem:[%s8408_s16 + $0x70] sm:%s8433_s10] }
  0x51   : > { %v1711_v40 = vsel %vm339_vm2, %v1706_v35, %v8306_v1  ;;  %v1712_v41 = vpack.c.bf16 %v1686_v16, %v1636_v27  ;;  %v340_v42 = vsel %vm339_vm2, %v335_v36, %v8306_v1  ;;  %v359_v43 = vsel %vm358_vm3, %v8306_v1, %v354_v26  ;;  %7604 = vmatpush3.bf16.msra.mxu0 %v8451_v31  ;;  %v8083_v4 = vld [vmem:[#allocation12 + $0x48] sm:$0xff]   ;;  %v6593_v17 = vld [vmem:[%s8408_s16 + $0x74] sm:%s8433_s10] }
  0x52   : > { %v8076_v44 = vld [vmem:[#allocation12 + $0x50] sm:$0xff]   ;;  %7117 = vst [vmem:[#allocation12 + $0x30] sm:$0xff] %v1128_v13   ;;  %v1714_v45 = vpack.c.bf16 %v1711_v40, %v1661_v28  ;;  %v364_v46 = vsel %vm339_vm2, %v359_v43, %v8306_v1  ;;  %v379_v48 = vunpack.c.l.bf16 %v6479_v14  ;;  %v404_v49 = vunpack.c.l.bf16 %v6481_v24  ;;  %7621 = vmatprep.subr.bf16.mxu0 %v8815_v8  ;;  %v8087_v27 = vld [vmem:[%s9549_s0 + $0x128] sm:$0xff]  }
  0x53   : > { %v1744_v50 = vunpack.c.l.bf16 %v6571_v32  ;;  %v1769_v51 = vunpack.c.l.bf16 %v6573_v33  ;;  %v1794_v52 = vunpack.c.l.bf16 %v6575_v34  ;;  %v1819_v31 = vunpack.c.l.bf16 %v6577_v37  ;;  %7586 = vmatmul.mubr.msk.bf16.gmra.mrb[4].mxu0 %vm3009_vm4, %v8076_v44  ;;  %v6591_v14 = vld [vmem:[%s8400_s15 + $0x74] sm:%s8427_s8] }
  0x54   : > { %v1718_v56 = vmax.bf16 %v1714_v45, %v1712_v41  ;;  %v384_v57 = vsel %vm8429_vm1, %v8306_v1, %v379_v48  ;;  %v409_v58 = vsel %vm358_vm3, %v8306_v1, %v404_v49  ;;  %v1862_v59 = vunpack.c.l.bf16 %v6579_v39  ;;  %7605 = vmatprep.mubr.msk.bf16.mxu0 %vm3009_vm4, %v8080_v25  ;;  %v6595_v32 = vld [vmem:[%s8400_s15 + $0x78] sm:%s8427_s8]  ;;  %v8086_v25 = vld [vmem:[#allocation12 + $0x50] sm:$0xff]  }
  0x55   : > { %v389_v55 = vsel %vm339_vm2, %v384_v57, %v8306_v1  ;;  %v414_v11 = vsel %vm339_vm2, %v409_v58, %v8306_v1  ;;  %v1749_v61 = vsel %vm8429_vm1, %v8306_v1, %v1744_v50  ;;  %v1774_v62 = vsel %vm358_vm3, %v8306_v1, %v1769_v51  ;;  %v8093_v48 = vld [vmem:[%s9549_s0 + $0x130] sm:$0xff]  }
  0x56   : > { %v8908_v3 = vld [vmem:[#allocation12 + $0x28] sm:$0xff]   ;;  %7137 = vst [vmem:[#allocation12 + $0x58] sm:$0xff] %v1718_v56   ;;  %v415_v7 = vpack.c.bf16 %v389_v55, %v340_v42  ;;  %v417_v9 = vpack.c.bf16 %v414_v11, %v364_v46  ;;  %v1754_v18 = vsel %vm339_vm2, %v1749_v61, %v8306_v1  ;;  %v1779_v10 = vsel %vm339_vm2, %v1774_v62, %v8306_v1  ;;  %v6597_v42 = vld [vmem:[%s8408_s16 + $0x78] sm:%s8433_s10]  ;;  %v8088_v56 = vld [vmem:[#allocation12 + $0x40] sm:$0xff]  }
  0x57   : > { %v1799_v21 = vsel %vm8429_vm1, %v8306_v1, %v1794_v52  ;;  %v1824_v22 = vsel %vm358_vm3, %v8306_v1, %v1819_v31  ;;  %v1867_v23 = vsel %vm8429_vm1, %v8306_v1, %v1862_v59  ;;  %v1887_v24 = vunpack.c.l.bf16 %v6581_v53  ;;  %7421 = vmatprep.mubr.msk.bf16.mxu1 %vm3009_vm4, %v8908_v3  ;;  %v6599_v31 = vld [vmem:[%s8400_s15 + $0x7c] sm:%s8427_s8] }
  0x58   : > { %v421_v28 = vmax.bf16 %v417_v9, %v415_v7  ;;  %v1804_v29 = vsel %vm339_vm2, %v1799_v21, %v8306_v1  ;;  %v1829_v26 = vsel %vm339_vm2, %v1824_v22, %v8306_v1  ;;  %v1872_v33 = vsel %vm339_vm2, %v1867_v23, %v8306_v1  ;;  %v6601_v53 = vld [vmem:[%s8408_s16 + $0x7c] sm:%s8433_s10]  ;;  %v6609_v22 = vld [vmem:[%s8408_s16 + $0x84] sm:%s8433_s10] }
  0x59   : > { %v8947_v34 = vld [vmem:[#allocation12 + $0x30] sm:$0xff]   ;;  %v1830_v13 = vpack.c.bf16 %v1804_v29, %v1754_v18  ;;  %v1832_v16 = vpack.c.bf16 %v1829_v26, %v1779_v10  ;;  %v1892_v35 = vsel %vm358_vm3, %v8306_v1, %v1887_v24  ;;  %v1912_v36 = vunpack.c.l.bf16 %v6583_v60  ;;  %v6603_v55 = vld [vmem:[%s8400_s15 + $0x80] sm:%s8427_s8]  ;;  %v8097_v26 = vld [vmem:[%s9549_s0 + $0x138] sm:$0x3f]  }
  0x5a   : > { %7093 = vst [vmem:[#allocation12] sm:$0xff] %v421_v28   ;;  %v1897_v37 = vsel %vm339_vm2, %v1892_v35, %v8306_v1  ;;  %v1937_v39 = vunpack.c.l.bf16 %v6585_v63  ;;  %v1980_v40 = vunpack.c.l.bf16 %v6587_v0  ;;  %v2005_v41 = vunpack.c.l.bf16 %v6589_v2  ;;  %7422 = vmatmul.mubr.msk.bf16.gmra.mrb[8].mxu1 %vm3009_vm4, %v8947_v34  ;;  %v6605_v63 = vld [vmem:[%s8408_s16 + $0x80] sm:%s8433_s10] }
  0x5b   : > { %v1836_v43 = vmax.bf16 %v1832_v16, %v1830_v13  ;;  %v1917_v44 = vsel %vm8429_vm1, %v8306_v1, %v1912_v36  ;;  %v2030_v45 = vunpack.c.l.bf16 %v6591_v14  ;;  %v2055_v46 = vunpack.c.l.bf16 %v6593_v17  ;;  %7606 = vmatmul.mubr.msk.bf16.vlgmr.msra.gmra.mrb[0].mxu0 %vm3009_vm4, %v8083_v4  ;;  %7425 = vmatprep.mubr.msk.bf16.mxu1 %vm3009_vm4, %v8910_v5  ;;  %v6607_v18 = vld [vmem:[%s8400_s15 + $0x84] sm:%s8427_s8] }
  0x5c   : > { %v1922_v49 = vsel %vm339_vm2, %v1917_v44, %v8306_v1  ;;  %v1942_v50 = vsel %vm358_vm3, %v8306_v1, %v1937_v39  ;;  %v1985_v51 = vsel %vm8429_vm1, %v8306_v1, %v1980_v40  ;;  %v2098_v52 = vunpack.c.l.bf16 %v6595_v32  ;;  %7622 = vmatpush3.bf16.msra.mxu0 %v8815_v8  ;;  %7609 = vmatprep.mubr.msk.bf16.mxu0 %vm3009_vm4, %v8086_v25 }
  0x5d   : > { %7141 = vst [vmem:[#allocation12 + $0x60] sm:$0xff] %v1836_v43   ;;  %v1947_v57 = vsel %vm339_vm2, %v1942_v50, %v8306_v1  ;;  %v1948_v58 = vpack.c.bf16 %v1922_v49, %v1872_v33  ;;  %v1990_v59 = vsel %vm339_vm2, %v1985_v51, %v8306_v1  ;;  %v2123_v60 = vunpack.c.l.bf16 %v6597_v42  ;;  %7623 = vmatprep.subr.bf16.mxu0 %v8087_v27  ;;  %v8089_v0 = vld [vmem:[#allocation12 + $0x58] sm:$0xff]  }
  0x5e   : > { %v1950_v8 = vpack.c.bf16 %v1947_v57, %v1897_v37  ;;  %v2010_v11 = vsel %vm358_vm3, %v8306_v1, %v2005_v41  ;;  %v2035_v61 = vsel %vm8429_vm1, %v8306_v1, %v2030_v45  ;;  %v2060_v62 = vsel %vm358_vm3, %v8306_v1, %v2055_v46  ;;  %v8095_v57 = vld [vmem:[%s9549_s0 + $0x48] sm:$0xff]  }
  0x5f   : > { %v2015_v2 = vsel %vm339_vm2, %v2010_v11, %v8306_v1  ;;  %v2040_v4 = vsel %vm339_vm2, %v2035_v61, %v8306_v1  ;;  %v2065_v7 = vsel %vm339_vm2, %v2060_v62, %v8306_v1  ;;  %v2103_v9 = vsel %vm8429_vm1, %v8306_v1, %v2098_v52  ;;  %v8108_v61 = vld [vmem:[%s9549_s0 + $0x60] sm:$0xff]   ;;  %v8102_v62 = vld [vmem:[#allocation12 + $0x50] sm:$0xff]  }
  0x60   : > { %v1954_v10 = vmax.bf16 %v1950_v8, %v1948_v58  ;;  %v2066_v14 = vpack.c.bf16 %v2040_v4, %v1990_v59  ;;  %v2068_v17 = vpack.c.bf16 %v2065_v7, %v2015_v2  ;;  %v2108_v21 = vsel %vm339_vm2, %v2103_v9, %v8306_v1  ;;  %7624 = vmatpush3.bf16.msra.mxu0 %v8087_v27  ;;  %v8099_v8 = vld [vmem:[%s9549_s0 + $0x50] sm:$0xff]   ;;  %v6611_v4 = vld [vmem:[%s8400_s15 + $0x88] sm:%s8427_s8] }
  0x61   : > { %v8090_v23 = vld [vmem:[#allocation12] sm:$0xff]   ;;  %v2128_v24 = vsel %vm358_vm3, %v8306_v1, %v2123_v60  ;;  %v2148_v32 = vunpack.c.l.bf16 %v6599_v31  ;;  %v2173_v25 = vunpack.c.l.bf16 %v6601_v53  ;;  %v2216_v28 = vunpack.c.l.bf16 %v6603_v55  ;;  %7625 = vmatprep.subr.bf16.mxu0 %v8093_v48  ;;  %v6615_v9 = vld [vmem:[%s8400_s15 + $0x8c] sm:%s8427_s8] }
  0x62   : > { %7145 = vst [vmem:[#allocation12 + $0x68] sm:$0xff] %v1954_v10   ;;  %v2072_v29 = vmax.bf16 %v2068_v17, %v2066_v14  ;;  %v2133_v33 = vsel %vm339_vm2, %v2128_v24, %v8306_v1  ;;  %v2241_v27 = vunpack.c.l.bf16 %v6605_v63  ;;  %v2266_v13 = vunpack.c.l.bf16 %v6607_v18  ;;  %7426 = vmatmul.mubr.msk.bf16.gmra.mrb[12].mxu1 %vm3009_vm4, %v8088_v56  ;;  %v8110_v63 = vld [vmem:[%s9549_s0 + $0x150] sm:$0xff]  }
  0x63   : > { %v2153_v16 = vsel %vm8429_vm1, %v8306_v1, %v2148_v32  ;;  %v2178_v35 = vsel %vm358_vm3, %v8306_v1, %v2173_v25  ;;  %v2221_v36 = vsel %vm8429_vm1, %v8306_v1, %v2216_v28  ;;  %v2291_v37 = vunpack.c.l.bf16 %v6609_v22  ;;  %7610 = vmatmul.mubr.msk.bf16.gmra.mrb[4].mxu0 %vm3009_vm4, %v8089_v0  ;;  %7437 = vmatprep.mubr.msk.bf16.mxu1 %vm3009_vm4, %v8090_v23  ;;  %v8107_v0 = vld [vmem:[#allocation12 + $0x10] sm:$0xff]  }
  0x64   : > { %v8092_v39 = vld [vmem:[#allocation12 + $0x60] sm:$0xff]   ;;  %7149 = vst [vmem:[#allocation12 + $0x70] sm:$0xff] %v2072_v29   ;;  %v2158_v40 = vsel %vm339_vm2, %v2153_v16, %v8306_v1  ;;  %v2183_v41 = vsel %vm339_vm2, %v2178_v35, %v8306_v1  ;;  %v2226_v42 = vsel %vm339_vm2, %v2221_v36, %v8306_v1  ;;  %7626 = vmatpush3.bf16.msra.mxu0 %v8093_v48  ;;  %v4975_v49 = vsel %vm3034_vm0, %v8097_v26, 0  ;;  %v6617_v17 = vld [vmem:[%s8408_s16 + $0x8c] sm:%s8433_s10]  ;;  %v8111_v29 = vld [vmem:[#allocation12 + $0x18] sm:$0xff]  }
  0x65   : > { %v2184_v43 = vpack.c.bf16 %v2158_v40, %v2108_v21  ;;  %v2186_v44 = vpack.c.bf16 %v2183_v41, %v2133_v33  ;;  %v2246_v45 = vsel %vm358_vm3, %v8306_v1, %v2241_v27  ;;  %v2271_v46 = vsel %vm8429_vm1, %v8306_v1, %v2266_v13  ;;  %7613 = vmatprep.mubr.msk.bf16.mxu0 %vm3009_vm4, %v8092_v39  ;;  %v8101_v48 = vld [vmem:[%s9549_s0 + $0x140] sm:$0xff]   ;;  %v8114_v39 = vld [vmem:[%s9549_s0 + $0x68] sm:$0xff]   ;;  %v8120_v41 = vld [vmem:[%s9549_s0 + $0x70] sm:$0xff]  }
  0x66   : > { %8007 = vmatprep.subr.msk.bf16.mxu0 %vm3034_vm0, %v8097_v26  ;;  %v2251_v50 = vsel %vm339_vm2, %v2246_v45, %v8306_v1  ;;  %v2276_v51 = vsel %vm339_vm2, %v2271_v46, %v8306_v1  ;;  %v2296_v52 = vsel %vm358_vm3, %v8306_v1, %v2291_v37  ;;  %v8106_v2 = vld [vmem:[#allocation12 + $0x60] sm:$0xff]   ;;  %v2334_v7 = vunpack.c.l.bf16 %v6611_v4  ;;  %v8121_v45 = vld [vmem:[#allocation12 + $0x50] sm:$0xff]   ;;  %v8126_v46 = vld [vmem:[%s9549_s0 + $0x78] sm:$0x3f]  }
  0x67   : > { %v2190_v31 = vmax.bf16 %v2186_v44, %v2184_v43  ;;  %v2301_v53 = vsel %vm339_vm2, %v2296_v52, %v8306_v1  ;;  %v2302_v56 = vpack.c.bf16 %v2276_v51, %v2226_v42  ;;  %v2384_v14 = vunpack.c.l.bf16 %v6615_v9  ;;  %v8122_v13 = vld [vmem:[%s9549_s0 + $0x160] sm:$0xff]   ;;  %v8117_v42 = vld [vmem:[#allocation12 + $0x28] sm:$0xff]   ;;  %v8119_v43 = vld [vmem:[#allocation12 + $0x30] sm:$0xff]  }
  0x68   : > { %v2304_v58 = vpack.c.bf16 %v2301_v53, %v2251_v50  ;;  %7628 = vmatpush3.bf16.msra.mxu0 %v4975_v49  ;;  %v2339_v21 = vsel %vm8429_vm1, %v8306_v1, %v2334_v7  ;;  %v2409_v22 = vunpack.c.l.bf16 %v6617_v17  ;;  %v8113_v35 = vld [vmem:[#allocation12 + $0x20] sm:$0xff]   ;;  %v8123_v49 = vld [vmem:[#allocation12 + $0x38] sm:$0xff]   ;;  %v3607_v51 = vsel %vm3034_vm0, %v8126_v46, 0  ;;  %v8128_v53 = vld [vmem:[%s9549_s0 + $0x168] sm:$0xff]  }
  0x69   : > { %v8094_v59 = vld [vmem:[#allocation12 + $0x68] sm:$0xff]   ;;  %7153 = vst [vmem:[#allocation12 + $0x78] sm:$0xff] %v2190_v31   ;;  %7645 = vmatprep.subr.bf16.mxu0 %v8101_v48  ;;  %v2344_v23 = vsel %vm339_vm2, %v2339_v21, %v8306_v1  ;;  %v2389_v32 = vsel %vm8429_vm1, %v8306_v1, %v2384_v14  ;;  %v8125_v50 = vld [vmem:[#allocation12 + $0x40] sm:$0xff]  }
  0x6a   : > { %v2308_v60 = vmax.bf16 %v2304_v58, %v2302_v56  ;;  %7438 = vmatmul.mubr.msk.bf16.vlgmr.msra.gmra.mrb[0].mxu1 %vm3009_vm4, %v8586_v54  ;;  %v8100_v54 = vld [vmem:[#allocation12 + $0x48] sm:$0xff]   ;;  %v2394_v25 = vsel %vm339_vm2, %v2389_v32, %v8306_v1  ;;  %v2414_v28 = vsel %vm358_vm3, %v8306_v1, %v2409_v22  ;;  %v8132_v52 = vld [vmem:[%s9549_s0 + $0x80] sm:$0xff]   ;;  %v6619_v56 = vld [vmem:[%s8400_s15 + $0x90] sm:%s8427_s8] }
  0x6b   : > { %v8096_v55 = vld [vmem:[#allocation12 + $0x70] sm:$0xff]   ;;  %7454 = vmatpush3.bf16.msra.mxu1 %v8770_v47  ;;  %7614 = vmatmul.mubr.msk.bf16.gmra.mrb[8].mxu0 %vm3009_vm4, %v8094_v59  ;;  %v8103_v47 = vld [vmem:[%s9549_s0 + $0x58] sm:$0x3f]   ;;  %v8109_v18 = vld [vmem:[#allocation12 + $0x68] sm:$0xff]   ;;  %v2419_v26 = vsel %vm339_vm2, %v2414_v28, %v8306_v1  ;;  %v2420_v33 = vpack.c.bf16 %v2394_v25, %v2344_v23  ;;  %v2452_v58 = vunpack.c.l.bf16 %v6619_v56 }
  0x6c   : > { %7157 = vst [vmem:[#allocation12 + $0x80] sm:$0xff] %v2308_v60   ;;  %7441 = vmatprep.mubr.msk.bf16.mxu1 %vm3009_vm4, %v8648_v38  ;;  %7455 = vmatprep.subr.bf16.mxu1 %v8095_v57  ;;  %v3379_v38 = vsel %vm3034_vm0, %v8103_v47, 0  ;;  %v8112_v36 = vld [vmem:[#allocation12 + $0x70] sm:$0xff]   ;;  %v8127_v31 = vld [vmem:[#allocation12 + $0x60] sm:$0xff]   ;;  %v8137_v23 = vld [vmem:[#allocation12 + $0x28] sm:$0xff]  }
  0x6d   : > { %7617 = vmatprep.mubr.msk.bf16.mxu0 %vm3009_vm4, %v8096_v55  ;;  %v6623_v60 = vld [vmem:[%s8400_s15 + $0x94] sm:%s8427_s8]  ;;  %v8135_v17 = vld [vmem:[#allocation12 + $0x20] sm:$0xff]  }
  0x6e   : > { %v6625_v55 = vld [vmem:[%s8408_s16 + $0x94] sm:%s8433_s10]  ;;  %v8146_v21 = vld [vmem:[%s9549_s0 + $0x180] sm:$0xff]  }
  0x6f   : > { %7456 = vmatpush3.bf16.msra.mxu1 %v8095_v57  ;;  %v6621_v57 = vld [vmem:[%s8408_s16 + $0x90] sm:%s8433_s10]  ;;  %v8143_v28 = vld [vmem:[#allocation12 + $0x38] sm:$0xff]  }
  0x70   : > { %v8098_v11 = vld [vmem:[#allocation12 + $0x78] sm:$0xff]   ;;  %7457 = vmatprep.subr.bf16.mxu1 %v8099_v8  ;;  %v2477_v59 = vunpack.c.l.bf16 %v6621_v57  ;;  %v8144_v25 = vld [vmem:[%s9549_s0 + $0x90] sm:$0xff]  }
  0x71   : > { %v8115_v40 = vld [vmem:[#allocation12 + $0x78] sm:$0xff]  }
  0x72   : > { %7442 = vmatmul.mubr.msk.bf16.gmra.mrb[4].mxu1 %vm3009_vm4, %v8738_v30  ;;  %v8104_v30 = vld [vmem:[#allocation12 + $0x58] sm:$0xff]  }
  0x73   : > { %7618 = vmatmul.mubr.msk.bf16.gmra.mrb[12].mxu0 %vm3009_vm4, %v8098_v11  ;;  %7445 = vmatprep.mubr.msk.bf16.mxu1 %vm3009_vm4, %v8810_v6  ;;  %v8105_v6 = vld [vmem:[%s9549_s0 + $0x148] sm:$0xff]   ;;  %v8118_v44 = vld [vmem:[#allocation12 + $0x80] sm:$0xff]   ;;  %v2527_v11 = vunpack.c.l.bf16 %v6625_v55  ;;  %v8136_v22 = vld [vmem:[#allocation12 + $0x78] sm:$0xff]  }
  0x74   : > { %7629 = vmatprep.mubr.msk.bf16.mxu0 %vm3009_vm4, %v8100_v54  ;;  %7458 = vmatpush3.bf16.msra.mxu1 %v8099_v8  ;;  %v2502_v8 = vunpack.c.l.bf16 %v6623_v60  ;;  %v2457_v54 = vsel %vm8429_vm1, %v8306_v1, %v2452_v58  ;;  %v8139_v32 = vld [vmem:[#allocation12 + $0x80] sm:$0xff]   ;;  %v8151_v58 = vld [vmem:[#allocation12 + $0x68] sm:$0xff]   ;;  %v8153_v55 = vld [vmem:[#allocation12 + $0x50] sm:$0xff]  }
  0x75   : > { %7999 = vmatprep.subr.msk.bf16.mxu1 %vm3034_vm0, %v8103_v47  ;;  %v2482_v47 = vsel %vm358_vm3, %v8306_v1, %v2477_v59  ;;  %v8152_v59 = vld [vmem:[%s9549_s0 + $0x188] sm:$0xff]  }
  0x78   : > { %7460 = vmatpush3.bf16.msra.mxu1 %v3379_v38  ;;  %v8129_v38 = vld [vmem:[#allocation12 + $0x48] sm:$0xff]  }
  0x79   : > { %7477 = vmatprep.subr.bf16.mxu1 %v8108_v61 }
  0x7a   : > { %7446 = vmatmul.mubr.msk.bf16.gmra.mrb[8].mxu1 %vm3009_vm4, %v8908_v3  ;;  %v6613_v3 = vld [vmem:[%s8408_s16 + $0x88] sm:%s8433_s10] }
  0x7b   : > { %7630 = vmatmul.mubr.msk.bf16.vlgmr.msra.gmra.mrb[0].mxu0 %vm3009_vm4, %v8102_v62  ;;  %7449 = vmatprep.mubr.msk.bf16.mxu1 %vm3009_vm4, %v8947_v34  ;;  %v2359_v10 = vunpack.c.l.bf16 %v6613_v3  ;;  %v8116_v34 = vld [vmem:[%s9549_s0 + $0x158] sm:$0x3f]   ;;  %v2487_v62 = vsel %vm339_vm2, %v2482_v47, %v8306_v1 }
  0x7c   : > { %7646 = vmatpush3.bf16.msra.mxu0 %v8101_v48  ;;  %7633 = vmatprep.mubr.msk.bf16.mxu0 %vm3009_vm4, %v8104_v30  ;;  %v5203_v27 = vsel %vm3034_vm0, %v8116_v34, 0  ;;  %v8124_v48 = vld [vmem:[#allocation12 + $0x58] sm:$0xff]   ;;  %v2507_v30 = vsel %vm8429_vm1, %v8306_v1, %v2502_v8  ;;  %v8158_v8 = vld [vmem:[%s9549_s0 + $0x190] sm:$0xff]  }
  0x7d   : > { %7647 = vmatprep.subr.bf16.mxu0 %v8105_v6  ;;  %v2364_v24 = vsel %vm358_vm3, %v8306_v1, %v2359_v10  ;;  %v8131_v3 = vld [vmem:[#allocation12 + $0x18] sm:$0xff]  }
  0x7e   : > { %v8140_v10 = vld [vmem:[%s9549_s0 + $0x178] sm:$0x3f]  }
  0x7f   : > { %v8157_v47 = vld [vmem:[#allocation12 + $0x78] sm:$0xff]  }
  0x80   : > { %7648 = vmatpush3.bf16.msra.mxu0 %v8105_v6  ;;  %v8134_v6 = vld [vmem:[%s9549_s0 + $0x170] sm:$0xff]  }
  0x81   : > { %7649 = vmatprep.subr.bf16.mxu0 %v8110_v63 }
  0x82   : > { %7450 = vmatmul.mubr.msk.bf16.gmra.mrb[12].mxu1 %vm3009_vm4, %v8910_v5  ;;  %v2369_v5 = vsel %vm339_vm2, %v2364_v24, %v8306_v1  ;;  %v8138_v24 = vld [vmem:[%s9549_s0 + $0x88] sm:$0xff]  }
  0x83   : > { %7634 = vmatmul.mubr.msk.bf16.gmra.mrb[4].mxu0 %vm3009_vm4, %v8106_v2  ;;  %7461 = vmatprep.mubr.msk.bf16.mxu1 %vm3009_vm4, %v8107_v0  ;;  %v2422_v16 = vpack.c.bf16 %v2419_v26, %v2369_v5  ;;  %v2532_v0 = vsel %vm358_vm3, %v8306_v1, %v2527_v11  ;;  %v8130_v2 = vld [vmem:[#allocation12 + $0x68] sm:$0xff]   ;;  %v8141_v5 = vld [vmem:[#allocation12 + $0x30] sm:$0xff]  }
  0x84   : > { %7637 = vmatprep.mubr.msk.bf16.mxu0 %vm3009_vm4, %v8109_v18  ;;  %7650 = vmatpush3.bf16.msra.mxu0 %v8110_v63  ;;  %v2512_v63 = vsel %vm339_vm2, %v2507_v30, %v8306_v1  ;;  %v2537_v4 = vsel %vm339_vm2, %v2532_v0, %v8306_v1  ;;  %v8133_v18 = vld [vmem:[#allocation12 + $0x70] sm:$0xff]   ;;  %v8162_v0 = vld [vmem:[%s9549_s0 + $0xa8] sm:$0xff]  }
  0x85   : > { %8008 = vmatprep.subr.msk.bf16.mxu0 %vm3034_vm0, %v8116_v34  ;;  %v2426_v37 = vmax.bf16 %v2422_v16, %v2420_v33  ;;  %v2540_v9 = vpack.c.bf16 %v2537_v4, %v2487_v62  ;;  %v5431_v34 = vsel %vm3034_vm0, %v8140_v10, 0  ;;  %v8150_v33 = vld [vmem:[%s9549_s0 + $0x98] sm:$0x3f]   ;;  %v8154_v11 = vld [vmem:[#allocation12 + $0x70] sm:$0xff]   ;;  %v8160_v62 = vld [vmem:[#allocation12 + $0x80] sm:$0xff]  }
  0x86   : > { %v6635_v4 = vld [vmem:[%s8400_s15 + $0xa0] sm:%s8427_s8] }
  0x87   : > { %7161 = vst [vmem:[#allocation12 + $0x88] sm:$0xff] %v2426_v37   ;;  %v6633_v37 = vld [vmem:[%s8408_s16 + $0x9c] sm:%s8433_s10] }
  0x88   : > { %7652 = vmatpush3.bf16.msra.mxu0 %v5203_v27  ;;  %v6627_v27 = vld [vmem:[%s8400_s15 + $0x98] sm:%s8427_s8] }
  0x89   : > { %7669 = vmatprep.subr.bf16.mxu0 %v8122_v13  ;;  %v2570_v16 = vunpack.c.l.bf16 %v6627_v27 }
  0x8a   : > { %7462 = vmatmul.mubr.msk.bf16.vlgmr.msra.gmra.mrb[0].mxu1 %vm3009_vm4, %v8111_v29  ;;  %v8145_v29 = vld [vmem:[#allocation12 + $0x58] sm:$0xff]  }
  0x8b   : > { %7478 = vmatpush3.bf16.msra.mxu1 %v8108_v61  ;;  %7638 = vmatmul.mubr.msk.bf16.gmra.mrb[8].mxu0 %vm3009_vm4, %v8112_v36  ;;  %v2462_v61 = vsel %vm339_vm2, %v2457_v54, %v8306_v1  ;;  %v6631_v36 = vld [vmem:[%s8400_s15 + $0x9c] sm:%s8427_s8] }
  0x8c   : > { %7465 = vmatprep.mubr.msk.bf16.mxu1 %vm3009_vm4, %v8113_v35  ;;  %7479 = vmatprep.subr.bf16.mxu1 %v8114_v39  ;;  %v2538_v7 = vpack.c.bf16 %v2512_v63, %v2462_v61  ;;  %v8155_v54 = vld [vmem:[#allocation12 + $0x20] sm:$0xff]   ;;  %v8159_v61 = vld [vmem:[#allocation12 + $0x28] sm:$0xff]   ;;  %v8161_v63 = vld [vmem:[#allocation12 + $0x30] sm:$0xff]  }
  0x8d   : > { %7641 = vmatprep.mubr.msk.bf16.mxu0 %vm3009_vm4, %v8115_v40  ;;  %v2645_v40 = vunpack.c.l.bf16 %v6633_v37  ;;  %v8171_v37 = vld [vmem:[#allocation12 + $0x48] sm:$0xff]  }
  0x8e   : > { %v2544_v14 = vmax.bf16 %v2540_v9, %v2538_v7  ;;  %v8142_v26 = vld [vmem:[#allocation12 + $0x88] sm:$0xff]   ;;  %v2688_v7 = vunpack.c.l.bf16 %v6635_v4 }
  0x8f   : > { %7480 = vmatpush3.bf16.msra.mxu1 %v8114_v39  ;;  %v2620_v39 = vunpack.c.l.bf16 %v6631_v36  ;;  %v6639_v9 = vld [vmem:[%s8400_s15 + $0xa4] sm:%s8427_s8] }
  0x90   : > { %7481 = vmatprep.subr.bf16.mxu1 %v8120_v41  ;;  %7165 = vst [vmem:[#allocation12 + $0x90] sm:$0xff] %v2544_v14   ;;  %v6641_v14 = vld [vmem:[%s8408_s16 + $0xa4] sm:%s8433_s10] }
  0x91   : > { %v8186_v4 = vld [vmem:[%s9549_s0 + $0xc8] sm:$0xff]  }
  0x92   : > { %7466 = vmatmul.mubr.msk.bf16.gmra.mrb[4].mxu1 %vm3009_vm4, %v8117_v42  ;;  %v3835_v42 = vsel %vm3034_vm0, %v8150_v33, 0 }
  0x93   : > { %7642 = vmatmul.mubr.msk.bf16.gmra.mrb[12].mxu0 %vm3009_vm4, %v8118_v44  ;;  %7469 = vmatprep.mubr.msk.bf16.mxu1 %vm3009_vm4, %v8119_v43  ;;  %v2575_v43 = vsel %vm8429_vm1, %v8306_v1, %v2570_v16  ;;  %v8169_v16 = vld [vmem:[#allocation12 + $0x60] sm:$0xff]  }
  0x94   : > { %7653 = vmatprep.mubr.msk.bf16.mxu0 %vm3009_vm4, %v8121_v45  ;;  %7482 = vmatpush3.bf16.msra.mxu1 %v8120_v41  ;;  %v8147_v41 = vld [vmem:[#allocation12 + $0x40] sm:$0xff]  }
  0x95   : > { %8000 = vmatprep.subr.msk.bf16.mxu1 %vm3034_vm0, %v8126_v46  ;;  %v8156_v45 = vld [vmem:[%s9549_s0 + $0xa0] sm:$0xff]   ;;  %v2580_v46 = vsel %vm339_vm2, %v2575_v43, %v8306_v1  ;;  %v8176_v43 = vld [vmem:[%s9549_s0 + $0x1a8] sm:$0xff]  }
  0x97   : > { %v8166_v27 = vld [vmem:[#allocation12 + $0x90] sm:$0xff]  }
  0x98   : > { %7484 = vmatpush3.bf16.msra.mxu1 %v3607_v51  ;;  %v8148_v51 = vld [vmem:[#allocation12 + $0x60] sm:$0xff]  }
  0x99   : > { %7501 = vmatprep.subr.bf16.mxu1 %v8132_v52 }
  0x9a   : > { %7470 = vmatmul.mubr.msk.bf16.gmra.mrb[8].mxu1 %vm3009_vm4, %v8123_v49 }
  0x9b   : > { %7654 = vmatmul.mubr.msk.bf16.vlgmr.msra.gmra.mrb[0].mxu0 %vm3009_vm4, %v8124_v48  ;;  %7473 = vmatprep.mubr.msk.bf16.mxu1 %vm3009_vm4, %v8125_v50  ;;  %v2625_v48 = vsel %vm8429_vm1, %v8306_v1, %v2620_v39  ;;  %v2650_v50 = vsel %vm358_vm3, %v8306_v1, %v2645_v40  ;;  %v8172_v39 = vld [vmem:[#allocation12 + $0x68] sm:$0xff]  }
  0x9c   : > { %7670 = vmatpush3.bf16.msra.mxu0 %v8122_v13  ;;  %7657 = vmatprep.mubr.msk.bf16.mxu0 %vm3009_vm4, %v8127_v31  ;;  %v6629_v13 = vld [vmem:[%s8408_s16 + $0x98] sm:%s8433_s10]  ;;  %v2655_v31 = vsel %vm339_vm2, %v2650_v50, %v8306_v1  ;;  %v6647_v50 = vld [vmem:[%s8400_s15 + $0xac] sm:%s8427_s8] }
  0x9d   : > { %7671 = vmatprep.subr.bf16.mxu0 %v8128_v53  ;;  %v2595_v35 = vunpack.c.l.bf16 %v6629_v13 }
  0x9f   : > { %v2600_v44 = vsel %vm358_vm3, %v8306_v1, %v2595_v35  ;;  %v8174_v35 = vld [vmem:[%s9549_s0 + $0xb8] sm:$0x3f]  }
  0xa0   : > { %7672 = vmatpush3.bf16.msra.mxu0 %v8128_v53  ;;  %v2605_v49 = vsel %vm339_vm2, %v2600_v44, %v8306_v1  ;;  %v8149_v53 = vld [vmem:[#allocation12 + $0x48] sm:$0xff]   ;;  %v4063_v40 = vsel %vm3034_vm0, %v8174_v35, 0  ;;  %v8175_v44 = vld [vmem:[#allocation12 + $0x70] sm:$0xff]  }
  0xa1   : > { %7673 = vmatprep.subr.bf16.mxu0 %v8134_v6  ;;  %v2658_v57 = vpack.c.bf16 %v2655_v31, %v2605_v49 }
  0xa2   : > { %7474 = vmatmul.mubr.msk.bf16.gmra.mrb[12].mxu1 %vm3009_vm4, %v8129_v38  ;;  %v8164_v38 = vld [vmem:[%s9549_s0 + $0x198] sm:$0x3f]  }
  0xa3   : > { %7658 = vmatmul.mubr.msk.bf16.gmra.mrb[4].mxu0 %vm3009_vm4, %v8130_v2  ;;  %7485 = vmatprep.mubr.msk.bf16.mxu1 %vm3009_vm4, %v8131_v3  ;;  %v5659_v30 = vsel %vm3034_vm0, %v8164_v38, 0  ;;  %v8163_v2 = vld [vmem:[#allocation12 + $0x88] sm:$0xff]   ;;  %v6637_v3 = vld [vmem:[%s8408_s16 + $0xa0] sm:%s8433_s10] }
  0xa4   : > { %7661 = vmatprep.mubr.msk.bf16.mxu0 %vm3009_vm4, %v8133_v18  ;;  %7674 = vmatpush3.bf16.msra.mxu0 %v8134_v6  ;;  %v9311_v6 = vld [vmem:[%s9549_s0 + $0x1a0] sm:$0xff]   ;;  %v2713_v18 = vunpack.c.l.bf16 %v6637_v3  ;;  %v8192_v3 = vld [vmem:[%s9549_s0 + $0xd0] sm:$0xff]  }
  0xa5   : > { %8009 = vmatprep.subr.msk.bf16.mxu0 %vm3034_vm0, %v8140_v10  ;;  %v2738_v10 = vunpack.c.l.bf16 %v6639_v9  ;;  %v8189_v9 = vld [vmem:[#allocation12 + $0x40] sm:$0xff]  }
  0xa8   : > { %7676 = vmatpush3.bf16.msra.mxu0 %v5431_v34  ;;  %v2763_v34 = vunpack.c.l.bf16 %v6641_v14  ;;  %v8193_v14 = vld [vmem:[#allocation12 + $0x68] sm:$0xff]  }
  0xa9   : > { %7693 = vmatprep.subr.bf16.mxu0 %v8146_v21 }
  0xaa   : > { %7486 = vmatmul.mubr.msk.bf16.vlgmr.msra.gmra.mrb[0].mxu1 %vm3009_vm4, %v8135_v17  ;;  %v2693_v17 = vsel %vm8429_vm1, %v8306_v1, %v2688_v7  ;;  %v8187_v7 = vld [vmem:[#allocation12 + $0x90] sm:$0xff]  }
  0xab   : > { %7502 = vmatpush3.bf16.msra.mxu1 %v8132_v52  ;;  %7662 = vmatmul.mubr.msk.bf16.gmra.mrb[8].mxu0 %vm3009_vm4, %v8136_v22  ;;  %v2630_v52 = vsel %vm339_vm2, %v2625_v48, %v8306_v1  ;;  %v2698_v22 = vsel %vm339_vm2, %v2693_v17, %v8306_v1  ;;  %v8198_v17 = vld [vmem:[%s9549_s0 + $0xd8] sm:$0x3f]  }
  0xac   : > { %7489 = vmatprep.mubr.msk.bf16.mxu1 %vm3009_vm4, %v8137_v23  ;;  %7503 = vmatprep.subr.bf16.mxu1 %v8138_v24  ;;  %v2656_v56 = vpack.c.bf16 %v2630_v52, %v2580_v46  ;;  %v2718_v23 = vsel %vm358_vm3, %v8306_v1, %v2713_v18  ;;  %v6645_v46 = vld [vmem:[%s8408_s16 + $0xa8] sm:%s8433_s10]  ;;  %v2856_v52 = vunpack.c.l.bf16 %v6647_v50  ;;  %v8218_v50 = vld [vmem:[#allocation12 + $0x80] sm:$0xff]  }
  0xad   : > { %7665 = vmatprep.mubr.msk.bf16.mxu0 %vm3009_vm4, %v8139_v32  ;;  %v8165_v32 = vld [vmem:[#allocation12 + $0x38] sm:$0xff]   ;;  %v2831_v48 = vunpack.c.l.bf16 %v6645_v46 }
  0xae   : > { %v2662_v60 = vmax.bf16 %v2658_v57, %v2656_v56  ;;  %v8215_v46 = vld [vmem:[#allocation12 + $0x58] sm:$0xff]  }
  0xaf   : > { %7504 = vmatpush3.bf16.msra.mxu1 %v8138_v24  ;;  %v2743_v24 = vsel %vm8429_vm1, %v8306_v1, %v2738_v10  ;;  %v2836_v56 = vsel %vm358_vm3, %v8306_v1, %v2831_v48  ;;  %v8191_v10 = vld [vmem:[#allocation12 + $0x48] sm:$0xff]   ;;  %v8217_v48 = vld [vmem:[#allocation12 + $0x60] sm:$0xff]  }
  0xb0   : > { %7505 = vmatprep.subr.bf16.mxu1 %v8144_v25  ;;  %7169 = vst [vmem:[#allocation12 + $0x98] sm:$0xff] %v2662_v60   ;;  %v8182_v60 = vld [vmem:[%s9549_s0 + $0x1b0] sm:$0xff]  }
  0xb2   : > { %7490 = vmatmul.mubr.msk.bf16.gmra.mrb[4].mxu1 %vm3009_vm4, %v8141_v5  ;;  %v2723_v5 = vsel %vm339_vm2, %v2718_v23, %v8306_v1  ;;  %v8197_v23 = vld [vmem:[#allocation12 + $0x58] sm:$0xff]  }
  0xb3   : > { %7666 = vmatmul.mubr.msk.bf16.gmra.mrb[12].mxu0 %vm3009_vm4, %v8142_v26  ;;  %7493 = vmatprep.mubr.msk.bf16.mxu1 %vm3009_vm4, %v8143_v28  ;;  %v2768_v28 = vsel %vm358_vm3, %v8306_v1, %v2763_v34  ;;  %v4291_v34 = vsel %vm3034_vm0, %v8198_v17, 0 }
  0xb4   : > { %7677 = vmatprep.mubr.msk.bf16.mxu0 %vm3009_vm4, %v8145_v29  ;;  %7506 = vmatpush3.bf16.msra.mxu1 %v8144_v25  ;;  %v2748_v25 = vsel %vm339_vm2, %v2743_v24, %v8306_v1  ;;  %v8167_v29 = vld [vmem:[#allocation12 + $0x40] sm:$0xff]   ;;  %v2773_v26 = vsel %vm339_vm2, %v2768_v28, %v8306_v1  ;;  %v8199_v24 = vld [vmem:[#allocation12 + $0x78] sm:$0xff]  }
  0xb5   : > { %8001 = vmatprep.subr.msk.bf16.mxu1 %vm3034_vm0, %v8150_v33  ;;  %v2774_v33 = vpack.c.bf16 %v2748_v25, %v2698_v22  ;;  %v2776_v13 = vpack.c.bf16 %v2773_v26, %v2723_v5  ;;  %v8196_v22 = vld [vmem:[#allocation12 + $0x70] sm:$0xff]   ;;  %v8229_v5 = vld [vmem:[%s9549_s0 + $0xe0] sm:$0xff]  }
  0xb6   : > { %v8205_v25 = vld [vmem:[%s9549_s0 + $0x1d0] sm:$0xff]   ;;  %v8201_v28 = vld [vmem:[#allocation12 + $0x60] sm:$0xff]  }
  0xb7   : > { %v2780_v36 = vmax.bf16 %v2776_v13, %v2774_v33  ;;  %v8190_v18 = vld [vmem:[#allocation12 + $0x98] sm:$0xff]   ;;  %v8203_v26 = vld [vmem:[#allocation12 + $0x30] sm:$0xff]   ;;  %v8204_v33 = vld [vmem:[#allocation12 + $0x88] sm:$0xff]  }
  0xb8   : > { %7508 = vmatpush3.bf16.msra.mxu1 %v3835_v42  ;;  %v8173_v42 = vld [vmem:[#allocation12 + $0x50] sm:$0xff]  }
  0xb9   : > { %7525 = vmatprep.subr.bf16.mxu1 %v8156_v45  ;;  %7173 = vst [vmem:[#allocation12 + $0xa0] sm:$0xff] %v2780_v36   ;;  %v8208_v36 = vld [vmem:[#allocation12 + $0x40] sm:$0xff]  }
  0xba   : > { %7494 = vmatmul.mubr.msk.bf16.gmra.mrb[8].mxu1 %vm3009_vm4, %v8147_v41  ;;  %v8180_v41 = vld [vmem:[%s9549_s0 + $0xc0] sm:$0xff]  }
  0xbb   : > { %7678 = vmatmul.mubr.msk.bf16.vlgmr.msra.gmra.mrb[0].mxu0 %vm3009_vm4, %v8148_v51  ;;  %7497 = vmatprep.mubr.msk.bf16.mxu1 %vm3009_vm4, %v8149_v53  ;;  %v6649_v51 = vld [vmem:[%s8408_s16 + $0xac] sm:%s8433_s10] }
  0xbc   : > { %7694 = vmatpush3.bf16.msra.mxu0 %v8146_v21  ;;  %7681 = vmatprep.mubr.msk.bf16.mxu0 %vm3009_vm4, %v8151_v58  ;;  %v8168_v21 = vld [vmem:[%s9549_s0 + $0xb0] sm:$0xff]   ;;  %v2881_v31 = vunpack.c.l.bf16 %v6649_v51  ;;  %v2841_v58 = vsel %vm339_vm2, %v2836_v56, %v8306_v1  ;;  %v8219_v51 = vld [vmem:[#allocation12 + $0x68] sm:$0xff]   ;;  %v8224_v56 = vld [vmem:[#allocation12 + $0x98] sm:$0xff]  }
  0xbd   : > { %7695 = vmatprep.subr.bf16.mxu0 %v8152_v59 }
  0xc0   : > { %7696 = vmatpush3.bf16.msra.mxu0 %v8152_v59  ;;  %v2861_v59 = vsel %vm8429_vm1, %v8306_v1, %v2856_v52  ;;  %v8220_v52 = vld [vmem:[#allocation12 + $0x88] sm:$0xff]  }
  0xc1   : > { %7697 = vmatprep.subr.bf16.mxu0 %v8158_v8 }
  0xc2   : > { %7498 = vmatmul.mubr.msk.bf16.gmra.mrb[12].mxu1 %vm3009_vm4, %v8153_v55  ;;  %v2866_v55 = vsel %vm339_vm2, %v2861_v59, %v8306_v1  ;;  %v8227_v59 = vld [vmem:[#allocation12 + $0x70] sm:$0xff]  }
  0xc3   : > { %7682 = vmatmul.mubr.msk.bf16.gmra.mrb[4].mxu0 %vm3009_vm4, %v8154_v11  ;;  %7509 = vmatprep.mubr.msk.bf16.mxu1 %vm3009_vm4, %v8155_v54  ;;  %v8177_v11 = vld [vmem:[#allocation12 + $0x58] sm:$0xff]  }
  0xc4   : > { %7685 = vmatprep.mubr.msk.bf16.mxu0 %vm3009_vm4, %v8157_v47  ;;  %7698 = vmatpush3.bf16.msra.mxu0 %v8158_v8  ;;  %v2886_v8 = vsel %vm358_vm3, %v8306_v1, %v2881_v31  ;;  %v8178_v47 = vld [vmem:[#allocation12 + $0x78] sm:$0xff]  }
  0xc5   : > { %8010 = vmatprep.subr.msk.bf16.mxu0 %vm3034_vm0, %v8164_v38  ;;  %v2891_v54 = vsel %vm339_vm2, %v2886_v8, %v8306_v1  ;;  %v8179_v38 = vld [vmem:[#allocation12 + $0x28] sm:$0xff]   ;;  %v8221_v31 = vld [vmem:[#allocation12 + $0x58] sm:$0xff]  }
  0xc8   : > { %7700 = vmatpush3.bf16.msra.mxu0 %v5659_v30  ;;  %v8188_v30 = vld [vmem:[%s9549_s0 + $0x1b8] sm:$0x3f]  }
  0xc9   : > { %7717 = vmatprep.subr.bf16.mxu0 %v9311_v6  ;;  %v5887_v15 = vsel %vm3034_vm0, %v8188_v30, 0 }
  0xca   : > { %7510 = vmatmul.mubr.msk.bf16.vlgmr.msra.gmra.mrb[0].mxu1 %vm3009_vm4, %v8159_v61  ;;  %v2894_v61 = vpack.c.bf16 %v2891_v54, %v2841_v58  ;;  %v8226_v58 = vld [vmem:[#allocation12 + $0xa0] sm:$0xff]  }
  0xcb   : > { %7526 = vmatpush3.bf16.msra.mxu1 %v8156_v45  ;;  %7686 = vmatmul.mubr.msk.bf16.gmra.mrb[8].mxu0 %vm3009_vm4, %v8160_v62  ;;  %v6643_v45 = vld [vmem:[%s8400_s15 + $0xa8] sm:%s8427_s8]  ;;  %v8181_v62 = vld [vmem:[#allocation12 + $0x80] sm:$0xff]  }
  0xcc   : > { %7513 = vmatprep.mubr.msk.bf16.mxu1 %vm3009_vm4, %v8161_v63  ;;  %7527 = vmatprep.subr.bf16.mxu1 %v8162_v0  ;;  %v2806_v49 = vunpack.c.l.bf16 %v6643_v45  ;;  %v8183_v63 = vld [vmem:[#allocation12 + $0x30] sm:$0xff]   ;;  %v8232_v45 = vld [vmem:[%s9549_s0 + $0xf8] sm:$0x3f]  }
  0xcd   : > { %7689 = vmatprep.mubr.msk.bf16.mxu0 %vm3009_vm4, %v8163_v2  ;;  %v8185_v2 = vld [vmem:[#allocation12 + $0x38] sm:$0xff]  }
  0xce   : > { %v2811_v53 = vsel %vm8429_vm1, %v8306_v1, %v2806_v49  ;;  %v8216_v49 = vld [vmem:[#allocation12 + $0x78] sm:$0xff]  }
  0xcf   : > { %7528 = vmatpush3.bf16.msra.mxu1 %v8162_v0  ;;  %v2816_v57 = vsel %vm339_vm2, %v2811_v53, %v8306_v1  ;;  %v8184_v0 = vld [vmem:[#allocation12 + $0x88] sm:$0xff]   ;;  %v8222_v53 = vld [vmem:[#allocation12 + $0x90] sm:$0xff]  }
  0xd0   : > { %7529 = vmatprep.subr.bf16.mxu1 %v8168_v21  ;;  %v2892_v20 = vpack.c.bf16 %v2866_v55, %v2816_v57  ;;  %v8225_v57 = vld [vmem:[#allocation12 + $0x68] sm:$0xff]  }
  0xd2   : > { %7514 = vmatmul.mubr.msk.bf16.gmra.mrb[4].mxu1 %vm3009_vm4, %v8165_v32  ;;  %v8200_v32 = vld [vmem:[%s9549_s0 + $0x1c8] sm:$0xff]  }
  0xd3   : > { %7690 = vmatmul.mubr.msk.bf16.gmra.mrb[12].mxu0 %vm3009_vm4, %v8166_v27  ;;  %7517 = vmatprep.mubr.msk.bf16.mxu1 %vm3009_vm4, %v8167_v29  ;;  %v8202_v29 = vld [vmem:[#allocation12 + $0x80] sm:$0xff]   ;;  %v8210_v27 = vld [vmem:[%s9549_s0 + $0x1d8] sm:$0x3f]  }
  0xd4   : > { %7701 = vmatprep.mubr.msk.bf16.mxu0 %vm3009_vm4, %v8169_v16  ;;  %7530 = vmatpush3.bf16.msra.mxu1 %v8168_v21  ;;  %v8195_v21 = vld [vmem:[#allocation12 + $0x50] sm:$0xff]   ;;  %v6115_v13 = vsel %vm3034_vm0, %v8210_v27, 0  ;;  %v8206_v16 = vld [vmem:[#allocation12 + $0x38] sm:$0xff]  }
  0xd5   : > { %8002 = vmatprep.subr.msk.bf16.mxu1 %vm3034_vm0, %v8174_v35  ;;  %v8207_v35 = vld [vmem:[#allocation12 + $0x90] sm:$0xff]  }
  0xd8   : > { %7532 = vmatpush3.bf16.msra.mxu1 %v4063_v40  ;;  %v8211_v40 = vld [vmem:[#allocation12 + $0x48] sm:$0xff]  }
  0xd9   : > { %7549 = vmatprep.subr.bf16.mxu1 %v8180_v41 }
  0xda   : > { %7518 = vmatmul.mubr.msk.bf16.gmra.mrb[8].mxu1 %vm3009_vm4, %v8171_v37  ;;  %v8209_v37 = vld [vmem:[#allocation12 + $0x98] sm:$0xff]  }
  0xdb   : > { %7702 = vmatmul.mubr.msk.bf16.vlgmr.msra.gmra.mrb[0].mxu0 %vm3009_vm4, %v8172_v39  ;;  %7521 = vmatprep.mubr.msk.bf16.mxu1 %vm3009_vm4, %v8173_v42  ;;  %v8230_v39 = vld [vmem:[%s9549_s0 + $0xe8] sm:$0xff]   ;;  %v8213_v42 = vld [vmem:[#allocation12 + $0x50] sm:$0xff]  }
  0xdc   : > { %7718 = vmatpush3.bf16.msra.mxu0 %v9311_v6  ;;  %7705 = vmatprep.mubr.msk.bf16.mxu0 %vm3009_vm4, %v8175_v44  ;;  %v2898_v6 = vmax.bf16 %v2894_v61, %v2892_v20  ;;  %v8214_v44 = vld [vmem:[#allocation12 + $0x70] sm:$0xff]  }
  0xdd   : > { %7719 = vmatprep.subr.bf16.mxu0 %v8176_v43 }
  0xde   : > { %7177 = vst [vmem:[#allocation12 + $0xa8] sm:$0xff] %v2898_v6  }
  0xe0   : > { %7720 = vmatpush3.bf16.msra.mxu0 %v8176_v43  ;;  %v8231_v43 = vld [vmem:[%s9549_s0 + $0xf0] sm:$0xff]  }
  0xe1   : > { %7721 = vmatprep.subr.bf16.mxu0 %v8182_v60 }
  0xe2   : > { %7522 = vmatmul.mubr.msk.bf16.gmra.mrb[12].mxu1 %vm3009_vm4, %v8177_v11 }
  0xe3   : > { %7706 = vmatmul.mubr.msk.bf16.gmra.mrb[4].mxu0 %vm3009_vm4, %v8178_v47  ;;  %7533 = vmatprep.mubr.msk.bf16.mxu1 %vm3009_vm4, %v8179_v38 }
  0xe4   : > { %7709 = vmatprep.mubr.msk.bf16.mxu0 %vm3009_vm4, %v8181_v62  ;;  %7722 = vmatpush3.bf16.msra.mxu0 %v8182_v60 }
  0xe5   : > { %8011 = vmatprep.subr.msk.bf16.mxu0 %vm3034_vm0, %v8188_v30  ;;  %v8228_v60 = vld [vmem:[#allocation12 + $0xa8] sm:$0xff]   ;;  %v9503_v30 = vld [vmem:[%s9550_s1] ss:$0 sm:$0xff] }
  0xe8   : > { %7724 = vmatpush3.bf16.msra.mxu0 %v5887_v15 }
  0xe9   : > { %7741 = vmatprep.subr.bf16.mxu0 %v8194_v19 }
  0xea   : > { %7534 = vmatmul.mubr.msk.bf16.vlgmr.msra.gmra.mrb[0].mxu1 %vm3009_vm4, %v8183_v63 }
  0xeb   : > { %7550 = vmatpush3.bf16.msra.mxu1 %v8180_v41  ;;  %7710 = vmatmul.mubr.msk.bf16.gmra.mrb[8].mxu0 %vm3009_vm4, %v8184_v0  ;;  %v8212_v41 = vld [vmem:[#allocation12 + $0xa0] sm:$0xff]  }
  0xec   : > { %7537 = vmatprep.mubr.msk.bf16.mxu1 %vm3009_vm4, %v8185_v2  ;;  %7551 = vmatprep.subr.bf16.mxu1 %v8186_v4 }
  0xed   : > { %7713 = vmatprep.mubr.msk.bf16.mxu0 %vm3009_vm4, %v8187_v7 }
  0xef   : > { %7552 = vmatpush3.bf16.msra.mxu1 %v8186_v4 }
  0xf0   : > { %7553 = vmatprep.subr.bf16.mxu1 %v8192_v3 }
  0xf2   : > { %7538 = vmatmul.mubr.msk.bf16.gmra.mrb[4].mxu1 %vm3009_vm4, %v8189_v9 }
  0xf3   : > { %7714 = vmatmul.mubr.msk.bf16.gmra.mrb[12].mxu0 %vm3009_vm4, %v8190_v18  ;;  %7541 = vmatprep.mubr.msk.bf16.mxu1 %vm3009_vm4, %v8191_v10 }
  0xf4   : > { %7725 = vmatprep.mubr.msk.bf16.mxu0 %vm3009_vm4, %v8193_v14  ;;  %7554 = vmatpush3.bf16.msra.mxu1 %v8192_v3 }
  0xf5   : > { %8003 = vmatprep.subr.msk.bf16.mxu1 %vm3034_vm0, %v8198_v17 }
  0xf8   : > { %7556 = vmatpush3.bf16.msra.mxu1 %v4291_v34 }
  0xf9   : > { %7765 = vmatprep.subr.bf16.mxu1 %v8229_v5 }
  0xfa   : > { %7542 = vmatmul.mubr.msk.bf16.gmra.mrb[8].mxu1 %vm3009_vm4, %v8195_v21 }
  0xfb   : > { %7726 = vmatmul.mubr.msk.bf16.vlgmr.msra.gmra.mrb[0].mxu0 %vm3009_vm4, %v8196_v22  ;;  %7545 = vmatprep.mubr.msk.bf16.mxu1 %vm3009_vm4, %v8197_v23 }
  0xfc   : > { %7742 = vmatpush3.bf16.msra.mxu0 %v8194_v19  ;;  %7729 = vmatprep.mubr.msk.bf16.mxu0 %vm3009_vm4, %v8199_v24 }
  0xfd   : > { %7743 = vmatprep.subr.bf16.mxu0 %v8200_v32 }
 0x100   : > { %7744 = vmatpush3.bf16.msra.mxu0 %v8200_v32 }
 0x101   : > { %7745 = vmatprep.subr.bf16.mxu0 %v8205_v25 }
 0x102   : > { %7546 = vmatmul.mubr.msk.bf16.gmra.mrb[12].mxu1 %vm3009_vm4, %v8201_v28 }
 0x103   : > { %7730 = vmatmul.mubr.msk.bf16.gmra.mrb[4].mxu0 %vm3009_vm4, %v8202_v29  ;;  %7557 = vmatprep.mubr.msk.bf16.mxu1 %vm3009_vm4, %v8203_v26 }
 0x104   : > { %7733 = vmatprep.mubr.msk.bf16.mxu0 %vm3009_vm4, %v8204_v33  ;;  %7746 = vmatpush3.bf16.msra.mxu0 %v8205_v25 }
 0x105   : > { %8012 = vmatprep.subr.msk.bf16.mxu0 %vm3034_vm0, %v8210_v27 }
 0x108   : > { %7748 = vmatpush3.bf16.msra.mxu0 %v6115_v13 }
 0x10a   : > { %7558 = vmatmul.mubr.msk.bf16.vlgmr.msra.gmra.mrb[0].mxu1 %vm3009_vm4, %v8206_v16 }
 0x10b   : > { %7769 = vmatpush3.bf16.msra.mxu1 %v8229_v5  ;;  %7734 = vmatmul.mubr.msk.bf16.gmra.mrb[8].mxu0 %vm3009_vm4, %v8207_v35 }
 0x10c   : > { %7561 = vmatprep.mubr.msk.bf16.mxu1 %vm3009_vm4, %v8208_v36  ;;  %7766 = vmatprep.subr.bf16.mxu1 %v8230_v39 }
 0x10d   : > { %7737 = vmatprep.mubr.msk.bf16.mxu0 %vm3009_vm4, %v8209_v37 }
 0x10f   : > { %7770 = vmatpush3.bf16.msra.mxu1 %v8230_v39 }
 0x110   : > { %7767 = vmatprep.subr.bf16.mxu1 %v8231_v43 }
 0x112   : > { %7562 = vmatmul.mubr.msk.bf16.gmra.mrb[4].mxu1 %vm3009_vm4, %v8211_v40 }
 0x113   : > { %7738 = vmatmul.mubr.msk.bf16.gmra.mrb[12].mxu0 %vm3009_vm4, %v8212_v41  ;;  %7565 = vmatprep.mubr.msk.bf16.mxu1 %vm3009_vm4, %v8213_v42 }
 0x114   : > { %7749 = vmatprep.mubr.msk.bf16.mxu0 %vm3009_vm4, %v8214_v44  ;;  %7771 = vmatpush3.bf16.msra.mxu1 %v8231_v43 }
 0x115   : > { %8005 = vmatprep.subr.msk.bf16.mxu1 %vm3034_vm0, %v8232_v45 }
 0x118   : > { %7772 = vmatpush3.bf16.msra.mxu1 %v8386_v12  ;;  %v8223_v12 = vld [vmem:[#allocation12 + $0x60] sm:$0xff]  }
 0x11a   : > { %7566 = vmatmul.mubr.msk.bf16.gmra.mrb[8].mxu1 %vm3009_vm4, %v8215_v46 }
 0x11b   : > { %7750 = vmatmul.mubr.msk.bf16.vlgmr.msra.gmra.mrb[0].mxu0 %vm3009_vm4, %v8216_v49  ;;  %7569 = vmatprep.mubr.msk.bf16.mxu1 %vm3009_vm4, %v8217_v48 }
 0x11c   : > { %7753 = vmatprep.mubr.msk.bf16.mxu0 %vm3009_vm4, %v8218_v50 }
 0x122   : > { %7570 = vmatmul.mubr.msk.bf16.gmra.mrb[12].mxu1 %vm3009_vm4, %v8219_v51 }
 0x123   : > { %7754 = vmatmul.mubr.msk.bf16.gmra.mrb[4].mxu0 %vm3009_vm4, %v8220_v52  ;;  %7589 = vmatprep.mubr.msk.bf16.mxu1 %vm3009_vm4, %v8221_v31 }
 0x124   : > { %7757 = vmatprep.mubr.msk.bf16.mxu0 %vm3009_vm4, %v8222_v53 }
 0x12a   : > { %7590 = vmatmul.mubr.msk.bf16.vlgmr.msra.gmra.mrb[8].mxu1 %vm3009_vm4, %v8223_v12 }
 0x12b   : > { %7758 = vmatmul.mubr.msk.bf16.gmra.mrb[8].mxu0 %vm3009_vm4, %v8224_v56  ;;  %7593 = vmatprep.mubr.msk.bf16.mxu1 %vm3009_vm4, %v8225_v57 }
 0x12c   : > { %7761 = vmatprep.mubr.msk.bf16.mxu0 %vm3009_vm4, %v8226_v58 }
 0x132   : > { %7594 = vmatmul.mubr.msk.bf16.gmra.mrb[12].mxu1 %vm3009_vm4, %v8227_v59 }
 0x133   : > { %7762 = vmatmul.mubr.msk.bf16.gmra.mrb[12].mxu0 %vm3009_vm4, %v8228_v60 }
 0x1dd   : > { %v7559_v55 = vpop.f32.mrb[0].mxu1 }
 0x1de   : > { %v4327_v8 = vpop.f32.mrb[1].mxu1 }
 0x1df   : > { %v7560_v11 = vpop.f32.mrb[2].mxu1 }
 0x1e0   : > { %v4330_v54 = vpop.f32.mrb[3].mxu1 }
 0x1e5   : > { %v7563_v20 = vpop.f32.mrb[4].mxu1 }
 0x1e6   : > { %v4343_v47 = vpop.f32.mrb[5].mxu1 }
 0x1e7   : > { %v7564_v38 = vpop.f32.mrb[6].mxu1 }
 0x1e8   : > { %v4346_v61 = vpop.f32.mrb[7].mxu1 }
 0x1ee   : > { %v7751_v62 = vpop.f32.mrb[0].mxu0 }
 0x1ef   : > { %v7773_v6 = vadd.f32 %v7751_v62, %v7559_v55  ;;  %v6151_v15 = vpop.f32.mrb[1].mxu0 }
 0x1f0   : > { %v7774_v19 = vadd.f32 %v6151_v15, %v4327_v8  ;;  %v7752_v63 = vpop.f32.mrb[2].mxu0 }
 0x1f1   : > { %v6239_v0 = vadd.f32 %v7773_v6, %v9503_v30  ;;  %v7775_v2 = vadd.f32 %v7752_v63, %v7560_v11  ;;  %v6154_v4 = vpop.f32.mrb[3].mxu0 }
 0x1f2   : > { %v6237_v7 = vadd.f32 %v7774_v19, %v9503_v30  ;;  %v7776_v3 = vadd.f32 %v6154_v4, %v4330_v54 }
 0x1f3   : > { %v6240_v9 = vadd.f32 %v7775_v2, %v9503_v30  ;;  %v6255_v10 = vmax.f32 %v6239_v0, 0.0 }
 0x1f4   : > { %v6238_v18 = vadd.f32 %v7776_v3, %v9503_v30  ;;  %v6253_v17 = vmax.f32 %v6237_v7, 0.0 }
 0x1f5   : > { %v6256_v14 = vmax.f32 %v6240_v9, 0.0 }
 0x1f6   : > { %v6254_v34 = vmax.f32 %v6238_v18, 0.0  ;;  %v7755_v21 = vpop.f32.mrb[4].mxu0 }
 0x1f7   : > { %v7186_v22 = vpack.c.bf16 %v6256_v14, %v6255_v10  ;;  %v7777_v23 = vadd.f32 %v7755_v21, %v7563_v20  ;;  %v6167_v24 = vpop.f32.mrb[5].mxu0 }
 0x1f8   : > { %v7181_v32 = vpack.c.bf16 %v6254_v34, %v6253_v17  ;;  %v7778_v5 = vadd.f32 %v6167_v24, %v4343_v47  ;;  %v7756_v25 = vpop.f32.mrb[6].mxu0 }
 0x1f9   : > { %7218 = vst [vmem:[%s9512_s6 + $0x8] sm:$0xff] %v7186_v22   ;;  %v6243_v28 = vadd.f32 %v7777_v23, %v9503_v30  ;;  %v7779_v29 = vadd.f32 %v7756_v25, %v7564_v38  ;;  %v6170_v26 = vpop.f32.mrb[7].mxu0 }
 0x1fa   : > { %7182 = vst [vmem:[%s9512_s6] sm:$0xff] %v7181_v32   ;;  %v6241_v33 = vadd.f32 %v7778_v5, %v9503_v30  ;;  %v7780_v27 = vadd.f32 %v6170_v26, %v4346_v61 }
 0x1fb   : > { %v6244_v13 = vadd.f32 %v7779_v29, %v9503_v30  ;;  %v6259_v35 = vmax.f32 %v6243_v28, 0.0 }
 0x1fc   : > { %v6242_v16 = vadd.f32 %v7780_v27, %v9503_v30  ;;  %v6257_v39 = vmax.f32 %v6241_v33, 0.0 }
 0x1fd   : > { %v6260_v36 = vmax.f32 %v6244_v13, 0.0  ;;  %v7591_v37 = vpop.f32.mrb[8].mxu1 }
 0x1fe   : > { %v6258_v40 = vmax.f32 %v6242_v16, 0.0  ;;  %v7759_v41 = vpop.f32.mrb[8].mxu0  ;;  %v4587_v42 = vpop.f32.mrb[9].mxu1 }
 0x1ff   : > { %v7196_v43 = vpack.c.bf16 %v6260_v36, %v6259_v35  ;;  %v7781_v44 = vadd.f32 %v7759_v41, %v7591_v37  ;;  %v6183_v45 = vpop.f32.mrb[9].mxu0  ;;  %v7592_v46 = vpop.f32.mrb[10].mxu1 }
 0x200   : > { %v7191_v49 = vpack.c.bf16 %v6258_v40, %v6257_v39  ;;  %v7782_v48 = vadd.f32 %v6183_v45, %v4587_v42  ;;  %v7760_v50 = vpop.f32.mrb[10].mxu0  ;;  %v4590_v51 = vpop.f32.mrb[11].mxu1 }
 0x201   : > { %7220 = vst [vmem:[%s9512_s6 + $0x18] sm:$0xff] %v7196_v43   ;;  %v6247_v52 = vadd.f32 %v7781_v44, %v9503_v30  ;;  %v7783_v31 = vadd.f32 %v7760_v50, %v7592_v46  ;;  %v6186_v53 = vpop.f32.mrb[11].mxu0 }
 0x202   : > { %7219 = vst [vmem:[%s9512_s6 + $0x10] sm:$0xff] %v7191_v49   ;;  %v6245_v12 = vadd.f32 %v7782_v48, %v9503_v30  ;;  %v7784_v56 = vadd.f32 %v6186_v53, %v4590_v51 }
 0x203   : > { %v6248_v57 = vadd.f32 %v7783_v31, %v9503_v30  ;;  %v6263_v59 = vmax.f32 %v6247_v52, 0.0 }
 0x204   : > { %v6246_v58 = vadd.f32 %v7784_v56, %v9503_v30  ;;  %v6261_v8 = vmax.f32 %v6245_v12, 0.0 }
 0x205   : > { %v6264_v60 = vmax.f32 %v6248_v57, 0.0  ;;  %v7595_v55 = vpop.f32.mrb[12].mxu1 }
 0x206   : > { %v6262_v11 = vmax.f32 %v6246_v58, 0.0  ;;  %v7763_v54 = vpop.f32.mrb[12].mxu0  ;;  %v4603_v20 = vpop.f32.mrb[13].mxu1 }
 0x207   : > { %v7206_v47 = vpack.c.bf16 %v6264_v60, %v6263_v59  ;;  %v7785_v38 = vadd.f32 %v7763_v54, %v7595_v55  ;;  %v6199_v61 = vpop.f32.mrb[13].mxu0  ;;  %v7596_v62 = vpop.f32.mrb[14].mxu1 }
 0x208   : > { %v7201_v6 = vpack.c.bf16 %v6262_v11, %v6261_v8  ;;  %v7786_v15 = vadd.f32 %v6199_v61, %v4603_v20  ;;  %v7764_v19 = vpop.f32.mrb[14].mxu0  ;;  %v4606_v63 = vpop.f32.mrb[15].mxu1 }
 0x209   : > { %7222 = vst [vmem:[%s9512_s6 + $0x28] sm:$0xff] %v7206_v47   ;;  %v6251_v0 = vadd.f32 %v7785_v38, %v9503_v30  ;;  %v7787_v2 = vadd.f32 %v7764_v19, %v7596_v62  ;;  %v6202_v4 = vpop.f32.mrb[15].mxu0 }
 0x20a   : > { %7221 = vst [vmem:[%s9512_s6 + $0x20] sm:$0xff] %v7201_v6   ;;  %v6249_v7 = vadd.f32 %v7786_v15, %v9503_v30  ;;  %v7788_v3 = vadd.f32 %v6202_v4, %v4606_v63 }
 0x20b   : > { %v6252_v9 = vadd.f32 %v7787_v2, %v9503_v30  ;;  %v6267_v10 = vmax.f32 %v6251_v0, 0.0 }
 0x20c   : > { %v6250_v18 = vadd.f32 %v7788_v3, %v9503_v30  ;;  %v6265_v17 = vmax.f32 %v6249_v7, 0.0 }
 0x20d   : > { %v6268_v14 = vmax.f32 %v6252_v9, 0.0 }
 0x20e   : > { %v6266_v34 = vmax.f32 %v6250_v18, 0.0 }
 0x20f   : > { %v7216_v21 = vpack.c.bf16 %v6268_v14, %v6267_v10 }
 0x210   : > { %v7211_v22 = vpack.c.bf16 %v6266_v34, %v6265_v17 }
 0x211   : > { %7224 = vst [vmem:[%s9512_s6 + $0x38] sm:$0xff] %v7216_v21  }
 0x212   : > { %7223 = vst [vmem:[%s9512_s6 + $0x30] sm:$0xff] %v7211_v22  }
 0x213 PF: > { %s25_s24 = sadd.s32 1, %s8271_s24   ;;  %s9557_s20 = smov %s8263_s22 }
 0x214   : > { %p22_p10 = scmp.ge.s32.totalorder %s25_s24, 6   ;;  %s9558_s21 = smov %s8267_s23 }
 0x215   : > { %s9559_s22 = smov %s9562_s3  ;;  %s9560_s23 = smov %s9566_s25 }
 0x216   :  { %24 = sbr.rel (!%p22_p10) target bundleno = 3 (0x3), region = 212 }

// kernel: conv_block_forward.5
= control target key start
LH: loop header
LB: loop body
LE: loop exit
PB: predicated region body
PF: predicated region fallthrough
CT: control target
= control target key end

     0   :  { %s8370_s20 = smov 0   ;;  %s8372_s21 = smov 0   ;;  %s9370_s0 = inlined_call_operand.vmem [shape: bf16[15,128,128], index: 0, kind: input, shape index: {}]   ;;  %s9371_s1 = inlined_call_operand.vmem [shape: f32[1,128], index: 1, kind: input, shape index: {}]   ;;  %s9372_s2 = inlined_call_operand.vmem [shape: bf16[2,1,352,128], index: 2, kind: input, shape index: {}]   ;;  %s9373_s3 = inlined_call_operand.<no memory space> [shape: bf16[], index: 3, kind: input, shape index: {}]   ;;  %s9374_s4 = inlined_call_operand.vmem [shape: bf16[2,1,352,128], index: 4, kind: input, shape index: {}]   ;;  %s9375_s5 = inlined_call_operand.vmem [shape: bf16[2,2,128,128], index: 5, kind: output, shape index: {}]  }
   0x1   :  { %v10_v0 = vstv %s9373_s3  ;;  %s8374_s22 = smov 0   ;;  %s8376_s23 = smov 0  }
   0x2   :  { %v8368_v1 = vunpack.i.l.bf16 %v10_v0  ;;  %s8378_s24 = smov 0  }
   0x3 LB: > { %s34_s3 = sadd.s32 1, %s8325_s22  ;;  %s37_s25 = sadd.s32 1, %s8329_s23  ;;  %s8333_s24 = sphi %s8378_s24, %s25_s24   ;;  %s8329_s23 = sphi %s8376_s23, %s9381_s23   ;;  %s8325_s22 = sphi %s8374_s22, %s9380_s22   ;;  %s8321_s21 = sphi %s8372_s21, %s9379_s21   ;;  %s8317_s20 = sphi %s8370_s20, %s9378_s20  }
   0x4   : > { %p35_p0 = scmp.ge.s32.totalorder %s34_s3, 2  ;;  %p6251_p1 = scmp.ge.s32.totalorder %s8333_s24, 1 }
   0x5   : > { %p224_p2 = scmp.lt.s32.totalorder %s8333_s24, 5 }
   0x6   : > { %s9383_s3 = smov (%p35_p0, %s34_s3), 0  ;;  %s9385_s25 = smov (!%p35_p0, %s37_s25), %s8329_s23 }
   0x7   : > { %p225_p3 = pnand %p6251_p1, %p224_p2  ;;  %p39_p4 = scmp.ge.s32.totalorder %s9385_s25, 2 }
   0x9   : > { %s9387_s25 = smov (%p39_p4, %s9385_s25), 0  ;;  %228 = sbr.rel (%p225_p3) target bundleno = 526 (0x20e), region = 36 }
  0x10   : > { %v8062_v2 = vld [vmem:[%s9370_s0 + $0x40] sm:$0xff]   ;;  %p279_p5 = scmp.lt.s32.totalorder %s8321_s21, 1  ;;  %s8409_s30 = sadd.s32 4294967295, %s8317_s20  ;;  %v8064_v4 = vld [vmem:[%s9370_s0 + $0x48] sm:$0xff]   ;;  %v8066_v6 = vld [vmem:[%s9370_s0 + $0x50] sm:$0xff]  }
  0x11   : > { %v8063_v3 = vld [vmem:[%s9370_s0 + $0x1c0] sm:$0xff]   ;;  %7299 = vmatprep.subr.bf16.mxu1 %v8062_v2  ;;  %v8065_v5 = vld [vmem:[%s9370_s0 + $0x1c8] sm:$0xff]   ;;  %p282_p6 = scmp.lt.s32.totalorder %s8409_s30, 0  ;;  %v8067_v7 = vld [vmem:[%s9370_s0 + $0x1d0] sm:$0xff]   ;;  %p298_p7 = scmp.lt.s32.totalorder %s8317_s20, 0  ;;  %v333_v17 = vstv %s8409_s30 }
  0x12   : > { %s9389_s21 = smov (!%p279_p5, %s8321_s21), 1  ;;  %7523 = vmatprep.subr.bf16.mxu0 %v8063_v3  ;;  %7300 = vmatpush3.bf16.msra.mxu1 %v8062_v2  ;;  %v8068_v8 = vld [vmem:[%s9370_s0 + $0x58] sm:$0xff]   ;;  %v8070_v10 = vld [vmem:[%s9370_s0 + $0x60] sm:$0xff]   ;;  %s336_s9 = ssub.s32 0, %s8317_s20  ;;  %v8072_v12 = vld [vmem:[%s9370_s0 + $0x68] sm:$0xff]   ;;  %vm8489_vm0 = vcmp.lt.s32.totalorder %v333_v17, 0 }
  0x13   : > { %7524 = vmatpush3.bf16.msra.mxu0 %v8063_v3  ;;  %7301 = vmatprep.subr.bf16.mxu1 %v8064_v4  ;;  %s8020_s12 = smul.u32 44, %s9389_s21  ;;  %v8069_v9 = vld [vmem:[%s9370_s0 + $0x1d8] sm:$0xff]   ;;  %v8071_v11 = vld [vmem:[%s9370_s0 + $0x1e0] sm:$0xff]   ;;  %p337_p8 = scmp.lt.s32.totalorder %s336_s9, 0  ;;  %v8073_v13 = vld [vmem:[%s9370_s0 + $0x1e8] sm:$0xff]   ;;  %v8480_v19 = vstv %s336_s9 }
  0x14   : > { %7525 = vmatprep.subr.bf16.mxu0 %v8065_v5  ;;  %s283_s15 = scalar_select %p282_p6, %s8409_s30, 0  ;;  %v8074_v14 = vld [vmem:[%s9370_s0 + $0x70] sm:$0xff]   ;;  %v8076_v16 = vld [vmem:[%s9370_s0 + $0x78] sm:$0xff]   ;;  %v8487_v20 = vld [vmem:[%s9370_s0] sm:$0xff]   ;;  %vm353_vm1 = vcmp.lt.s32.totalorder %v8480_v19, 0 }
  0x15   : > { %s299_s19 = scalar_select %p298_p7, %s8317_s20, 0  ;;  %v8075_v15 = vld [vmem:[%s9370_s0 + $0x1f0] sm:$0xff]   ;;  %v8077_v18 = vld [vmem:[%s9370_s0 + $0x1f8] sm:$0xff]   ;;  %v8502_v24 = vld [vmem:[%s9370_s0 + $0x200] sm:$0xff]  }
  0x16   : > { %7302 = vmatpush3.bf16.msra.mxu1 %v8064_v4  ;;  %s8019_s16 = smul.u32 44, %s283_s15  ;;  %v8286_v21 = vld [vmem:[%s9370_s0 + $0x3b8] sm:$0xff]   ;;  %p310_p9 = scmp.lt.s32.totalorder %s8317_s20, 1 }
  0x17   : > { %7526 = vmatpush3.bf16.msra.mxu0 %v8065_v5  ;;  %7303 = vmatprep.subr.bf16.mxu1 %v8066_v6  ;;  %s8021_s7 = smul.u32 44, %s299_s19 }
  0x18   : > { %7527 = vmatprep.subr.bf16.mxu0 %v8067_v7  ;;  %s286_s28 = sadd.s32 %s8020_s12, %s8019_s16  ;;  %s9391_s20 = smov (!%p310_p9, %s8317_s20), 1 }
  0x19   : > { %s6253_s8 = sshll.u32 %s286_s28, 2  ;;  %s302_s13 = sadd.s32 %s8021_s7, %s8020_s12 }
  0x1a   : > { %7304 = vmatpush3.bf16.msra.mxu1 %v8066_v6  ;;  %s8453_s18 = scalar_lea.vmem %s9372_s2, %s6253_s8  ;;  %s6254_s19 = sshll.u32 %s302_s13, 2 }
  0x1b   : > { %7528 = vmatpush3.bf16.msra.mxu0 %v8067_v7  ;;  %7305 = vmatprep.subr.bf16.mxu1 %v8068_v8  ;;  %s319_s26 = scalar_select %p282_p6, 0, 255 }
  0x1c   : > { %7529 = vmatprep.subr.bf16.mxu0 %v8069_v9  ;;  %s338_s28 = scalar_select %p337_p8, 0, 255 }
  0x1d   : > { %s8463_s7 = scalar_lea.vmem %s9374_s4, %s6254_s19  ;;  %s320_s10 = sshrl.u32 %s319_s26, 1 }
  0x1e   : > { %7306 = vmatpush3.bf16.msra.mxu1 %v8068_v8  ;;  %s321_s13 = sor.u32 %s320_s10, %s319_s26  ;;  %s339_s14 = sshrl.u32 %s338_s28, 1 }
  0x1f   : > { %7530 = vmatpush3.bf16.msra.mxu0 %v8069_v9  ;;  %7307 = vmatprep.subr.bf16.mxu1 %v8070_v10  ;;  %s322_s17 = sand.u32 85, %s321_s13  ;;  %s340_s27 = sor.u32 %s339_s14, %s338_s28 }
  0x20   : > { %7531 = vmatprep.subr.bf16.mxu0 %v8071_v11  ;;  %s323_s19 = sshrl.u32 %s322_s17, 1  ;;  %s341_s12 = sand.u32 85, %s340_s27 }
  0x21   : > { %s324_s29 = sor.u32 %s323_s19, %s322_s17  ;;  %s342_s6 = sshrl.u32 %s341_s12, 1 }
  0x22   : > { %7308 = vmatpush3.bf16.msra.mxu1 %v8070_v10  ;;  %s325_s8 = sand.u32 51, %s324_s29  ;;  %s343_s11 = sor.u32 %s342_s6, %s341_s12 }
  0x23   : > { %7532 = vmatpush3.bf16.msra.mxu0 %v8071_v11  ;;  %7309 = vmatprep.subr.bf16.mxu1 %v8072_v12  ;;  %s326_s15 = sshrl.u32 %s325_s8, 2  ;;  %s344_s28 = sand.u32 51, %s343_s11 }
  0x24   : > { %7533 = vmatprep.subr.bf16.mxu0 %v8073_v13  ;;  %s327_s16 = sor.u32 %s326_s15, %s325_s8  ;;  %s345_s17 = sshrl.u32 %s344_s28, 2 }
  0x25   : > { %s8482_s27 = sand.u32 15, %s327_s16  ;;  %s346_s19 = sor.u32 %s345_s17, %s344_s28 }
  0x26   : > { %7310 = vmatpush3.bf16.msra.mxu1 %v8072_v12  ;;  %s8493_s9 = sand.u32 15, %s346_s19  ;;  %v6265_v22 = vld [vmem:[%s8453_s18 + $0x8] sm:%s8482_s27]  ;;  %v6313_v31 = vld [vmem:[%s8453_s18 + $0x38] sm:%s8482_s27]  ;;  %s6255_s28 = sshll.u32 %s9391_s20, 4 }
  0x27   : > { %7534 = vmatpush3.bf16.msra.mxu0 %v8073_v13  ;;  %7311 = vmatprep.subr.bf16.mxu1 %v8074_v14  ;;  %v6269_v23 = vld [vmem:[%s8453_s18 + $0xc] sm:%s8482_s27]  ;;  %v426_v25 = vunpack.c.l.bf16 %v6265_v22  ;;  %v6315_v32 = vld [vmem:[%s8463_s7 + $0x38] sm:%s8493_s9]  ;;  %v1014_v35 = vunpack.c.l.bf16 %v6313_v31  ;;  %s6256_s13 = sshll.u32 %s9389_s21, 5 }
  0x28   : > { %7535 = vmatprep.subr.bf16.mxu0 %v8075_v15  ;;  %v6267_v26 = vld [vmem:[%s8463_s7 + $0x8] sm:%s8493_s9]  ;;  %v466_v27 = vunpack.c.l.bf16 %v6269_v23  ;;  %v1034_v36 = vunpack.c.l.bf16 %v6315_v32  ;;  %v6317_v37 = vld [vmem:[%s8453_s18 + $0x3c] sm:%s8482_s27]  ;;  %s314_s17 = sadd.s32 %s6256_s13, %s6255_s28 }
  0x29   : > { %v6271_v28 = vld [vmem:[%s8463_s7 + $0xc] sm:%s8493_s9]  ;;  %v446_v29 = vunpack.c.l.bf16 %v6267_v26  ;;  %v431_v33 = vsel %vm8489_vm0, %v8368_v1, %v426_v25  ;;  %v6319_v38 = vld [vmem:[%s8463_s7 + $0x3c] sm:%s8493_s9]  ;;  %v1054_v42 = vunpack.c.l.bf16 %v6317_v37  ;;  %v1019_v46 = vsel %vm8489_vm0, %v8368_v1, %v1014_v35  ;;  %s6257_s20 = sshll.u32 %s314_s17, 2 }
  0x2a   : > { %7312 = vmatpush3.bf16.msra.mxu1 %v8074_v14  ;;  %v486_v30 = vunpack.c.l.bf16 %v6271_v28  ;;  %v471_v34 = vsel %vm8489_vm0, %v8368_v1, %v466_v27  ;;  %v6273_v43 = vld [vmem:[%s8453_s18 + $0x10] sm:%s8482_s27]  ;;  %v1039_v47 = vsel %vm353_vm1, %v8368_v1, %v1034_v36  ;;  %v1074_v48 = vunpack.c.l.bf16 %v6319_v38  ;;  %v6321_v55 = vld [vmem:[%s8453_s18 + $0x40] sm:%s8482_s27]  ;;  %s9329_s12 = scalar_lea.vmem %s9375_s5, %s6257_s20 }
  0x2b   : > { %7536 = vmatpush3.bf16.msra.mxu0 %v8075_v15  ;;  %7313 = vmatprep.subr.bf16.mxu1 %v8076_v16  ;;  %v451_v39 = vsel %vm353_vm1, %v8368_v1, %v446_v29  ;;  %v492_v41 = vpack.c.bf16 %v471_v34, %v431_v33  ;;  %v6275_v44 = vld [vmem:[%s8463_s7 + $0x10] sm:%s8493_s9]  ;;  %v1059_v51 = vsel %vm8489_vm0, %v8368_v1, %v1054_v42  ;;  %v524_v52 = vunpack.c.l.bf16 %v6273_v43  ;;  %v6323_v56 = vld [vmem:[%s8463_s7 + $0x40] sm:%s8493_s9] }
  0x2c   : > { %7537 = vmatprep.subr.bf16.mxu0 %v8077_v18  ;;  %v491_v40 = vsel %vm353_vm1, %v8368_v1, %v486_v30  ;;  %v6277_v49 = vld [vmem:[%s8453_s18 + $0x14] sm:%s8482_s27]  ;;  %v544_v53 = vunpack.c.l.bf16 %v6275_v44  ;;  %v1079_v58 = vsel %vm353_vm1, %v8368_v1, %v1074_v48  ;;  %v1080_v59 = vpack.c.bf16 %v1059_v51, %v1019_v46  ;;  %v6325_v61 = vld [vmem:[%s8453_s18 + $0x44] sm:%s8482_s27] }
  0x2d   : > { %v494_v45 = vpack.c.bf16 %v491_v40, %v451_v39  ;;  %v6279_v50 = vld [vmem:[%s8463_s7 + $0x14] sm:%s8493_s9]  ;;  %v564_v54 = vunpack.c.l.bf16 %v6277_v49  ;;  %v6327_v62 = vld [vmem:[%s8463_s7 + $0x44] sm:%s8493_s9]  ;;  %v1082_v63 = vpack.c.bf16 %v1079_v58, %v1039_v47  ;;  %v529_v0 = vsel %vm8489_vm0, %v8368_v1, %v524_v52 }
  0x2e   : > { %7314 = vmatpush3.bf16.msra.mxu1 %v8076_v16  ;;  %v584_v60 = vunpack.c.l.bf16 %v6279_v50  ;;  %v549_v2 = vsel %vm353_vm1, %v8368_v1, %v544_v53  ;;  %v6281_v4 = vld [vmem:[%s8453_s18 + $0x18] sm:%s8482_s27]  ;;  %v1112_v8 = vunpack.c.l.bf16 %v6321_v55  ;;  %v1132_v9 = vunpack.c.l.bf16 %v6323_v56  ;;  %v6329_v16 = vld [vmem:[%s8453_s18 + $0x48] sm:%s8482_s27] }
  0x2f   : > { %7538 = vmatpush3.bf16.msra.mxu0 %v8077_v18  ;;  %7331 = vmatprep.subr.bf16.mxu1 %v8487_v20  ;;  %v498_v57 = vmax.bf16 %v494_v45, %v492_v41  ;;  %v569_v3 = vsel %vm8489_vm0, %v8368_v1, %v564_v54  ;;  %v6283_v5 = vld [vmem:[%s8463_s7 + $0x18] sm:%s8493_s9]  ;;  %v1086_v11 = vmax.bf16 %v1082_v63, %v1080_v59  ;;  %v1152_v13 = vunpack.c.l.bf16 %v6325_v61  ;;  %v6331_v25 = vld [vmem:[%s8463_s7 + $0x48] sm:%s8493_s9] }
  0x30   : > { %7555 = vmatprep.subr.bf16.mxu0 %v8502_v24  ;;  %v589_v6 = vsel %vm353_vm1, %v8368_v1, %v584_v60  ;;  %v590_v7 = vpack.c.bf16 %v569_v3, %v529_v0  ;;  %v6285_v10 = vld [vmem:[%s8453_s18 + $0x1c] sm:%s8482_s27]  ;;  %v1172_v14 = vunpack.c.l.bf16 %v6327_v62  ;;  %v1117_v17 = vsel %vm8489_vm0, %v8368_v1, %v1112_v8  ;;  %v6333_v26 = vld [vmem:[%s8453_s18 + $0x4c] sm:%s8482_s27] }
  0x31   : > { %6931 = vst [vmem:[#allocation12 + $0x8] sm:$0xff] %v498_v57   ;;  %v592_v12 = vpack.c.bf16 %v589_v6, %v549_v2  ;;  %v6287_v15 = vld [vmem:[%s8463_s7 + $0x1c] sm:%s8493_s9]  ;;  %v1137_v18 = vsel %vm353_vm1, %v8368_v1, %v1132_v9  ;;  %v622_v22 = vunpack.c.l.bf16 %v6281_v4  ;;  %v642_v23 = vunpack.c.l.bf16 %v6283_v5  ;;  %6955 = vst [vmem:[#allocation12 + $0x38] sm:$0xff] %v1086_v11   ;;  %v6335_v31 = vld [vmem:[%s8463_s7 + $0x4c] sm:%s8493_s9] }
  0x32   : > { %v1157_v28 = vsel %vm8489_vm0, %v8368_v1, %v1152_v13  ;;  %v1177_v29 = vsel %vm353_vm1, %v8368_v1, %v1172_v14  ;;  %v662_v30 = vunpack.c.l.bf16 %v6285_v10  ;;  %v6289_v32 = vld [vmem:[%s8453_s18 + $0x20] sm:%s8482_s27]  ;;  %v682_v40 = vunpack.c.l.bf16 %v6287_v15  ;;  %v6337_v44 = vld [vmem:[%s8453_s18 + $0x50] sm:%s8482_s27] }
  0x33   : > { %v596_v27 = vmax.bf16 %v592_v12, %v590_v7  ;;  %v1178_v33 = vpack.c.bf16 %v1157_v28, %v1117_v17  ;;  %v1180_v34 = vpack.c.bf16 %v1177_v29, %v1137_v18  ;;  %v627_v35 = vsel %vm8489_vm0, %v8368_v1, %v622_v22  ;;  %v6291_v37 = vld [vmem:[%s8463_s7 + $0x20] sm:%s8493_s9]  ;;  %v6339_v49 = vld [vmem:[%s8463_s7 + $0x50] sm:%s8493_s9] }
  0x34   : > { %v647_v36 = vsel %vm353_vm1, %v8368_v1, %v642_v23  ;;  %v6293_v38 = vld [vmem:[%s8453_s18 + $0x24] sm:%s8482_s27]  ;;  %v667_v39 = vsel %vm8489_vm0, %v8368_v1, %v662_v30  ;;  %v1210_v41 = vunpack.c.l.bf16 %v6329_v16  ;;  %v1230_v42 = vunpack.c.l.bf16 %v6331_v25  ;;  %v6341_v50 = vld [vmem:[%s8453_s18 + $0x54] sm:%s8482_s27] }
  0x35   : > { %6935 = vst [vmem:[#allocation12 + $0x10] sm:$0xff] %v596_v27   ;;  %v6295_v43 = vld [vmem:[%s8463_s7 + $0x24] sm:%s8493_s9]  ;;  %v1184_v45 = vmax.bf16 %v1180_v34, %v1178_v33  ;;  %v688_v46 = vpack.c.bf16 %v667_v39, %v627_v35  ;;  %v1250_v47 = vunpack.c.l.bf16 %v6333_v26  ;;  %v1270_v48 = vunpack.c.l.bf16 %v6335_v31  ;;  %v6343_v60 = vld [vmem:[%s8463_s7 + $0x54] sm:%s8493_s9] }
  0x36   : > { %v687_v52 = vsel %vm353_vm1, %v8368_v1, %v682_v40  ;;  %v1215_v53 = vsel %vm8489_vm0, %v8368_v1, %v1210_v41  ;;  %v1235_v54 = vsel %vm353_vm1, %v8368_v1, %v1230_v42  ;;  %v720_v55 = vunpack.c.l.bf16 %v6289_v32  ;;  %v6297_v61 = vld [vmem:[%s8453_s18 + $0x28] sm:%s8482_s27]  ;;  %v6345_v16 = vld [vmem:[%s8453_s18 + $0x58] sm:%s8482_s27] }
  0x37   : > { %6959 = vst [vmem:[#allocation12 + $0x40] sm:$0xff] %v1184_v45   ;;  %v690_v56 = vpack.c.bf16 %v687_v52, %v647_v36  ;;  %v1255_v57 = vsel %vm8489_vm0, %v8368_v1, %v1250_v47  ;;  %v1275_v58 = vsel %vm353_vm1, %v8368_v1, %v1270_v48  ;;  %v740_v59 = vunpack.c.l.bf16 %v6291_v37  ;;  %v6299_v3 = vld [vmem:[%s8463_s7 + $0x28] sm:%s8493_s9]  ;;  %v6347_v17 = vld [vmem:[%s8463_s7 + $0x58] sm:%s8493_s9] }
  0x38   : > { %v8622_v51 = vld [vmem:[#allocation12 + $0x8] sm:$0xff]   ;;  %v1276_v62 = vpack.c.bf16 %v1255_v57, %v1215_v53  ;;  %v1278_v63 = vpack.c.bf16 %v1275_v58, %v1235_v54  ;;  %v725_v0 = vsel %vm8489_vm0, %v8368_v1, %v720_v55  ;;  %v760_v2 = vunpack.c.l.bf16 %v6293_v38  ;;  %v8079_v5 = vld [vmem:[#allocation12 + $0x38] sm:$0xff]   ;;  %v8695_v34 = vld [vmem:[%s9370_s0 + $0x10] sm:$0xff]  }
  0x39   : > { %7315 = vmatprep.mubr.bf16.mxu1 %v8622_v51  ;;  %v6301_v4 = vld [vmem:[%s8453_s18 + $0x2c] sm:%s8482_s27]  ;;  %v694_v7 = vmax.bf16 %v690_v56, %v688_v46  ;;  %v745_v8 = vsel %vm353_vm1, %v8368_v1, %v740_v59  ;;  %v780_v9 = vunpack.c.l.bf16 %v6295_v43  ;;  %v1308_v10 = vunpack.c.l.bf16 %v6337_v44  ;;  %7539 = vmatprep.mubr.bf16.mxu0 %v8079_v5  ;;  %v6349_v32 = vld [vmem:[%s8453_s18 + $0x5c] sm:%s8482_s27] }
  0x3a   : > { %v8654_v6 = vld [vmem:[%s9370_s0 + $0x8] sm:$0xff]   ;;  %v1282_v12 = vmax.bf16 %v1278_v63, %v1276_v62  ;;  %v765_v13 = vsel %vm8489_vm0, %v8368_v1, %v760_v2  ;;  %v1328_v14 = vunpack.c.l.bf16 %v6339_v49  ;;  %v1348_v15 = vunpack.c.l.bf16 %v6341_v50  ;;  %v6351_v33 = vld [vmem:[%s8463_s7 + $0x5c] sm:%s8493_s9]  ;;  %v8722_v53 = vld [vmem:[%s9370_s0 + $0x210] sm:$0xff]  }
  0x3b   : > { %v6303_v11 = vld [vmem:[%s8463_s7 + $0x2c] sm:%s8493_s9]  ;;  %6939 = vst [vmem:[#allocation12 + $0x18] sm:$0xff] %v694_v7   ;;  %v785_v22 = vsel %vm353_vm1, %v8368_v1, %v780_v9  ;;  %v786_v23 = vpack.c.bf16 %v765_v13, %v725_v0  ;;  %v1313_v25 = vsel %vm8489_vm0, %v8368_v1, %v1308_v10  ;;  %v1368_v26 = vunpack.c.l.bf16 %v6343_v60  ;;  %v6309_v49 = vld [vmem:[%s8453_s18 + $0x34] sm:%s8482_s27] }
  0x3c   : > { %v8668_v18 = vld [vmem:[#allocation12 + $0x10] sm:$0xff]   ;;  %v8679_v27 = vld [vmem:[%s9370_s0 + $0x208] sm:$0xff]   ;;  %6963 = vst [vmem:[#allocation12 + $0x48] sm:$0xff] %v1282_v12   ;;  %v788_v28 = vpack.c.bf16 %v785_v22, %v745_v8  ;;  %v1333_v29 = vsel %vm353_vm1, %v8368_v1, %v1328_v14  ;;  %v1353_v30 = vsel %vm8489_vm0, %v8368_v1, %v1348_v15  ;;  %v818_v31 = vunpack.c.l.bf16 %v6297_v61  ;;  %v6353_v57 = vld [vmem:[%s8453_s18 + $0x60] sm:%s8482_s27] }
  0x3d   : > { %7316 = vmatmul.mubr.bf16.vlgmr.msra.gmra.mrb[0].mxu1 %v8668_v18  ;;  %v1373_v35 = vsel %vm353_vm1, %v8368_v1, %v1368_v26  ;;  %v1374_v36 = vpack.c.bf16 %v1353_v30, %v1313_v25  ;;  %v838_v37 = vunpack.c.l.bf16 %v6299_v3  ;;  %v858_v38 = vunpack.c.l.bf16 %v6301_v4  ;;  %v6305_v39 = vld [vmem:[%s8453_s18 + $0x30] sm:%s8482_s27]  ;;  %v6355_v58 = vld [vmem:[%s8463_s7 + $0x60] sm:%s8493_s9] }
  0x3e   : > { %v6307_v40 = vld [vmem:[%s8463_s7 + $0x30] sm:%s8493_s9]  ;;  %v8082_v41 = vld [vmem:[#allocation12 + $0x40] sm:$0xff]   ;;  %7332 = vmatpush3.bf16.msra.mxu1 %v8487_v20  ;;  %v792_v42 = vmax.bf16 %v788_v28, %v786_v23  ;;  %v1376_v43 = vpack.c.bf16 %v1373_v35, %v1333_v29  ;;  %v823_v44 = vsel %vm8489_vm0, %v8368_v1, %v818_v31  ;;  %v878_v45 = vunpack.c.l.bf16 %v6303_v11  ;;  %v8735_v59 = vld [vmem:[%s9370_s0 + $0x18] sm:$0xff]  }
  0x3f   : > { %7333 = vmatprep.subr.bf16.mxu1 %v8654_v6  ;;  %v843_v46 = vsel %vm353_vm1, %v8368_v1, %v838_v37  ;;  %v863_v20 = vsel %vm8489_vm0, %v8368_v1, %v858_v38  ;;  %v1406_v47 = vunpack.c.l.bf16 %v6345_v16  ;;  %v1426_v48 = vunpack.c.l.bf16 %v6347_v17  ;;  %v6311_v50 = vld [vmem:[%s8463_s7 + $0x34] sm:%s8493_s9]  ;;  %7540 = vmatmul.mubr.bf16.vlgmr.msra.gmra.mrb[0].mxu0 %v8082_v41  ;;  %v6357_v0 = vld [vmem:[%s8453_s18 + $0x64] sm:%s8482_s27] }
  0x40   : > { %6943 = vst [vmem:[#allocation12 + $0x20] sm:$0xff] %v792_v42   ;;  %v1380_v52 = vmax.bf16 %v1376_v43, %v1374_v36  ;;  %v883_v54 = vsel %vm353_vm1, %v8368_v1, %v878_v45  ;;  %v884_v55 = vpack.c.bf16 %v863_v20, %v823_v44  ;;  %v1446_v56 = vunpack.c.l.bf16 %v6349_v32  ;;  %7556 = vmatpush3.bf16.msra.mxu0 %v8502_v24  ;;  %v6359_v2 = vld [vmem:[%s8463_s7 + $0x64] sm:%s8493_s9]  ;;  %v8093_v12 = vld [vmem:[%s9370_s0 + $0x218] sm:$0xff]  }
  0x41   : > { %v886_v60 = vpack.c.bf16 %v883_v54, %v843_v46  ;;  %v1411_v61 = vsel %vm8489_vm0, %v8368_v1, %v1406_v47  ;;  %v1431_v62 = vsel %vm353_vm1, %v8368_v1, %v1426_v48  ;;  %v1466_v63 = vunpack.c.l.bf16 %v6351_v33  ;;  %7557 = vmatprep.subr.bf16.mxu0 %v8679_v27  ;;  %v8778_v23 = vld [vmem:[%s9370_s0 + $0x20] sm:$0xff]   ;;  %v6361_v28 = vld [vmem:[%s8453_s18 + $0x68] sm:%s8482_s27] }
  0x42   : > { %7334 = vmatpush3.bf16.msra.mxu1 %v8654_v6  ;;  %v8749_v24 = vld [vmem:[#allocation12 + $0x18] sm:$0xff]   ;;  %6967 = vst [vmem:[#allocation12 + $0x50] sm:$0xff] %v1380_v52   ;;  %v1451_v3 = vsel %vm8489_vm0, %v8368_v1, %v1446_v56  ;;  %v916_v4 = vunpack.c.l.bf16 %v6305_v39  ;;  %v936_v5 = vunpack.c.l.bf16 %v6307_v40  ;;  %v956_v7 = vunpack.c.l.bf16 %v6309_v49  ;;  %v6363_v32 = vld [vmem:[%s8463_s7 + $0x68] sm:%s8493_s9]  ;;  %v8099_v42 = vld [vmem:[%s9370_s0 + $0x220] sm:$0xff]  }
  0x43   : > { %v8087_v8 = vld [vmem:[#allocation12 + $0x48] sm:$0xff]   ;;  %7335 = vmatprep.subr.bf16.mxu1 %v8695_v34  ;;  %v890_v9 = vmax.bf16 %v886_v60, %v884_v55  ;;  %v1471_v10 = vsel %vm353_vm1, %v8368_v1, %v1466_v63  ;;  %v1472_v11 = vpack.c.bf16 %v1451_v3, %v1411_v61  ;;  %v976_v6 = vunpack.c.l.bf16 %v6311_v50  ;;  %7319 = vmatprep.mubr.bf16.mxu1 %v8749_v24 }
  0x44   : > { %v1474_v13 = vpack.c.bf16 %v1471_v10, %v1431_v62  ;;  %v921_v14 = vsel %vm8489_vm0, %v8368_v1, %v916_v4  ;;  %v941_v15 = vsel %vm353_vm1, %v8368_v1, %v936_v5  ;;  %v961_v16 = vsel %vm8489_vm0, %v8368_v1, %v956_v7  ;;  %7558 = vmatpush3.bf16.msra.mxu0 %v8679_v27  ;;  %v6365_v33 = vld [vmem:[%s8453_s18 + $0x6c] sm:%s8482_s27]  ;;  %v8844_v4 = vld [vmem:[#allocation12 + $0x38] sm:$0xff]  }
  0x45   : > { %7543 = vmatprep.mubr.bf16.mxu0 %v8087_v8  ;;  %6947 = vst [vmem:[#allocation12 + $0x28] sm:$0xff] %v890_v9   ;;  %v981_v17 = vsel %vm353_vm1, %v8368_v1, %v976_v6  ;;  %v982_v22 = vpack.c.bf16 %v961_v16, %v921_v14  ;;  %v1504_v25 = vunpack.c.l.bf16 %v6353_v57  ;;  %v1524_v26 = vunpack.c.l.bf16 %v6355_v58  ;;  %7559 = vmatprep.subr.bf16.mxu0 %v8722_v53  ;;  %v6367_v44 = vld [vmem:[%s8463_s7 + $0x6c] sm:%s8493_s9]  ;;  %v329_v16 = vld [vmem:[%s8453_s18] sm:%s8482_s27] }
  0x46   : > { %7336 = vmatpush3.bf16.msra.mxu1 %v8695_v34  ;;  %v1478_v27 = vmax.bf16 %v1474_v13, %v1472_v11  ;;  %v984_v29 = vpack.c.bf16 %v981_v17, %v941_v15  ;;  %v1544_v30 = vunpack.c.l.bf16 %v6357_v0  ;;  %v1564_v31 = vunpack.c.l.bf16 %v6359_v2  ;;  %v8100_v49 = vld [vmem:[%s9370_s0 + $0x28] sm:$0xff]   ;;  %v6371_v58 = vld [vmem:[%s8463_s7 + $0x70] sm:%s8493_s9] }
  0x47   : > { %v8788_v35 = vld [vmem:[#allocation12 + $0x20] sm:$0xff]   ;;  %7337 = vmatprep.subr.bf16.mxu1 %v8735_v59  ;;  %v1509_v36 = vsel %vm8489_vm0, %v8368_v1, %v1504_v25  ;;  %v1529_v34 = vsel %vm353_vm1, %v8368_v1, %v1524_v26  ;;  %v1602_v37 = vunpack.c.l.bf16 %v6361_v28  ;;  %v1622_v38 = vunpack.c.l.bf16 %v6363_v32  ;;  %v6375_v2 = vld [vmem:[%s8463_s7 + $0x74] sm:%s8493_s9]  ;;  %v8101_v3 = vld [vmem:[%s9370_s0 + $0x228] sm:$0xff]  }
  0x48   : > { %6971 = vst [vmem:[#allocation12 + $0x58] sm:$0xff] %v1478_v27   ;;  %v988_v39 = vmax.bf16 %v984_v29, %v982_v22  ;;  %v1549_v40 = vsel %vm8489_vm0, %v8368_v1, %v1544_v30  ;;  %v1569_v41 = vsel %vm353_vm1, %v8368_v1, %v1564_v31  ;;  %v1642_v43 = vunpack.c.l.bf16 %v6365_v33  ;;  %7320 = vmatmul.mubr.bf16.gmra.mrb[4].mxu1 %v8788_v35  ;;  %v8105_v11 = vld [vmem:[%s9370_s0 + $0x30] sm:$0xff]   ;;  %v348_v17 = vld [vmem:[%s8463_s7] sm:%s8493_s9]  ;;  %v8108_v32 = vld [vmem:[%s9370_s0 + $0x38] sm:$0xff]  }
  0x49   : > { %v8090_v45 = vld [vmem:[#allocation12 + $0x50] sm:$0xff]   ;;  %7560 = vmatpush3.bf16.msra.mxu0 %v8722_v53  ;;  %v1570_v46 = vpack.c.bf16 %v1549_v40, %v1509_v36  ;;  %v1572_v20 = vpack.c.bf16 %v1569_v41, %v1529_v34  ;;  %v1607_v47 = vsel %vm8489_vm0, %v8368_v1, %v1602_v37  ;;  %v1662_v48 = vunpack.c.l.bf16 %v6367_v44  ;;  %v6261_v26 = vld [vmem:[%s8453_s18 + $0x4] sm:%s8482_s27]  ;;  %v8109_v34 = vld [vmem:[%s9370_s0 + $0x238] sm:$0xff]  }
  0x4a   : > { %7561 = vmatprep.subr.bf16.mxu0 %v8093_v12  ;;  %7338 = vmatpush3.bf16.msra.mxu1 %v8735_v59  ;;  %6951 = vst [vmem:[#allocation12 + $0x30] sm:$0xff] %v988_v39   ;;  %v1627_v50 = vsel %vm353_vm1, %v8368_v1, %v1622_v38  ;;  %v1647_v52 = vsel %vm8489_vm0, %v8368_v1, %v1642_v43  ;;  %v6369_v53 = vld [vmem:[%s8453_s18 + $0x70] sm:%s8482_s27]  ;;  %v1720_v62 = vunpack.c.l.bf16 %v6371_v58  ;;  %v1760_v9 = vunpack.c.l.bf16 %v6375_v2  ;;  %v6263_v28 = vld [vmem:[%s8463_s7 + $0x4] sm:%s8493_s9] }
  0x4b   : > { %7544 = vmatmul.mubr.bf16.gmra.mrb[4].mxu0 %v8090_v45  ;;  %7339 = vmatprep.subr.bf16.mxu1 %v8778_v23  ;;  %v1576_v54 = vmax.bf16 %v1572_v20, %v1570_v46  ;;  %v1667_v55 = vsel %vm353_vm1, %v8368_v1, %v1662_v48  ;;  %v1668_v56 = vpack.c.bf16 %v1647_v52, %v1607_v47  ;;  %v1700_v57 = vunpack.c.l.bf16 %v6369_v53  ;;  %v6373_v59 = vld [vmem:[%s8453_s18 + $0x74] sm:%s8482_s27]  ;;  %v8104_v31 = vld [vmem:[#allocation12 + $0x40] sm:$0xff]   ;;  %v8113_v20 = vld [vmem:[#allocation12 + $0x48] sm:$0xff]  }
  0x4c   : > { %v8833_v60 = vld [vmem:[#allocation12 + $0x28] sm:$0xff]   ;;  %v1670_v61 = vpack.c.bf16 %v1667_v55, %v1627_v50  ;;  %v1740_v63 = vunpack.c.l.bf16 %v6373_v59  ;;  %v1725_v7 = vsel %vm353_vm1, %v8368_v1, %v1720_v62  ;;  %v8107_v13 = vld [vmem:[%s9370_s0 + $0x230] sm:$0xff]   ;;  %v349_v25 = vunpack.c.l.bf16 %v348_v17  ;;  %v8112_v43 = vld [vmem:[%s9370_s0 + $0x80] sm:$0xff]  }
  0x4d   : > { %7562 = vmatpush3.bf16.msra.mxu0 %v8093_v12  ;;  %6975 = vst [vmem:[#allocation12 + $0x60] sm:$0xff] %v1576_v54   ;;  %v1705_v0 = vsel %vm8489_vm0, %v8368_v1, %v1700_v57  ;;  %7323 = vmatprep.mubr.bf16.mxu1 %v8833_v60  ;;  %v1765_v12 = vsel %vm353_vm1, %v8368_v1, %v1760_v9  ;;  %v369_v29 = vunpack.c.l.bf16 %v6261_v26  ;;  %v389_v30 = vunpack.c.l.bf16 %v6263_v28  ;;  %v8114_v44 = vld [vmem:[%s9370_s0 + $0x240] sm:$0xff]   ;;  %v8115_v48 = vld [vmem:[%s9370_s0 + $0x88] sm:$0xff]   ;;  %v8117_v50 = vld [vmem:[#allocation12 + $0x50] sm:$0xff]  }
  0x4e   : > { %7563 = vmatprep.subr.bf16.mxu0 %v8099_v42  ;;  %v1674_v5 = vmax.bf16 %v1670_v61, %v1668_v56  ;;  %v1745_v8 = vsel %vm8489_vm0, %v8368_v1, %v1740_v63  ;;  %7340 = vmatpush3.bf16.msra.mxu1 %v8778_v23  ;;  %v1768_v15 = vpack.c.bf16 %v1765_v12, %v1725_v7  ;;  %v330_v23 = vunpack.c.l.bf16 %v329_v16  ;;  %v8111_v45 = vld [vmem:[#allocation12 + $0x40] sm:$0xff]   ;;  %v8118_v52 = vld [vmem:[%s9370_s0 + $0x90] sm:$0xff]   ;;  %v8121_v54 = vld [vmem:[%s9370_s0 + $0x98] sm:$0xff]  }
  0x4f   : > { %v8095_v10 = vld [vmem:[#allocation12 + $0x58] sm:$0xff]   ;;  %v1766_v6 = vpack.c.bf16 %v1745_v8, %v1705_v0  ;;  %7341 = vmatprep.subr.bf16.mxu1 %v8100_v49  ;;  %v354_v36 = vsel %vm353_vm1, %v8368_v1, %v349_v25  ;;  %v374_v37 = vsel %vm8489_vm0, %v8368_v1, %v369_v29  ;;  %v394_v38 = vsel %vm353_vm1, %v8368_v1, %v389_v30  ;;  %v8126_v9 = vld [vmem:[%s9370_s0 + $0x260] sm:$0xff]   ;;  %v8127_v12 = vld [vmem:[%s9370_s0 + $0xa8] sm:$0xff]  }
  0x50   : > { %6979 = vst [vmem:[#allocation12 + $0x68] sm:$0xff] %v1674_v5   ;;  %7547 = vmatprep.mubr.bf16.mxu0 %v8095_v10  ;;  %v335_v33 = vsel %vm8489_vm0, %v8368_v1, %v330_v23  ;;  %v397_v41 = vpack.c.bf16 %v394_v38, %v354_v36  ;;  %v8119_v53 = vld [vmem:[#allocation12 + $0x58] sm:$0xff]   ;;  %v8132_v16 = vld [vmem:[%s9370_s0 + $0x270] sm:$0xff]   ;;  %v8138_v26 = vld [vmem:[%s9370_s0 + $0xc0] sm:$0xff]  }
  0x51   : > { %v8862_v14 = vld [vmem:[#allocation12 + $0x30] sm:$0xff]   ;;  %7564 = vmatpush3.bf16.msra.mxu0 %v8099_v42  ;;  %v1772_v22 = vmax.bf16 %v1768_v15, %v1766_v6  ;;  %v395_v40 = vpack.c.bf16 %v374_v37, %v335_v33  ;;  %v8122_v55 = vld [vmem:[%s9370_s0 + $0x258] sm:$0xff]   ;;  %v8140_v28 = vld [vmem:[%s9370_s0 + $0x280] sm:$0xff]  }
  0x52   : > { %7565 = vmatprep.subr.bf16.mxu0 %v8101_v3  ;;  %7324 = vmatmul.mubr.bf16.gmra.mrb[8].mxu1 %v8862_v14  ;;  %v6377_v56 = vld [vmem:[%s8453_s18 + $0x78] sm:%s8482_s27]  ;;  %v8130_v15 = vld [vmem:[%s9370_s0 + $0xb0] sm:$0xff]   ;;  %v8142_v29 = vld [vmem:[%s9370_s0 + $0x288] sm:$0xff]  }
  0x53   : > { %7342 = vmatpush3.bf16.msra.mxu1 %v8100_v49  ;;  %7327 = vmatprep.mubr.bf16.mxu1 %v8844_v4  ;;  %6983 = vst [vmem:[#allocation12 + $0x70] sm:$0xff] %v1772_v22   ;;  %v401_v42 = vmax.bf16 %v397_v41, %v395_v40  ;;  %v8116_v49 = vld [vmem:[%s9370_s0 + $0x248] sm:$0xff]   ;;  %v6379_v57 = vld [vmem:[%s8463_s7 + $0x78] sm:%s8493_s9]  ;;  %v8135_v23 = vld [vmem:[#allocation12 + $0x10] sm:$0xff]  }
  0x54   : > { %v8098_v27 = vld [vmem:[#allocation12 + $0x60] sm:$0xff]   ;;  %7343 = vmatprep.subr.bf16.mxu1 %v8105_v11  ;;  %v1818_v59 = vunpack.c.l.bf16 %v6379_v57  ;;  %v8134_v17 = vld [vmem:[%s9370_s0 + $0x278] sm:$0xff]   ;;  %v8146_v33 = vld [vmem:[%s9370_s0 + $0xd0] sm:$0xff]  }
  0x55   : > { %7566 = vmatpush3.bf16.msra.mxu0 %v8101_v3  ;;  %6927 = vst [vmem:[#allocation12] sm:$0xff] %v401_v42   ;;  %v6381_v58 = vld [vmem:[%s8453_s18 + $0x7c] sm:%s8482_s27]  ;;  %v8157_v57 = vld [vmem:[%s9370_s0 + $0xe8] sm:$0xff]  }
  0x56   : > { %7548 = vmatmul.mubr.bf16.gmra.mrb[8].mxu0 %v8098_v27  ;;  %7567 = vmatprep.subr.bf16.mxu0 %v8107_v13  ;;  %v1838_v61 = vunpack.c.l.bf16 %v6381_v58  ;;  %v6383_v62 = vld [vmem:[%s8463_s7 + $0x7c] sm:%s8493_s9]  ;;  %v1823_v3 = vsel %vm353_vm1, %v8368_v1, %v1818_v59  ;;  %v8139_v27 = vld [vmem:[#allocation12 + $0x50] sm:$0xff]   ;;  %v8158_v58 = vld [vmem:[%s9370_s0 + $0x2a8] sm:$0xff]  }
  0x57   : > { %v8103_v39 = vld [vmem:[#allocation12 + $0x68] sm:$0xff]   ;;  %7344 = vmatpush3.bf16.msra.mxu1 %v8105_v11  ;;  %v8123_v63 = vld [vmem:[#allocation12 + $0x60] sm:$0xff]   ;;  %v1858_v2 = vunpack.c.l.bf16 %v6383_v62  ;;  %v8137_v25 = vld [vmem:[#allocation12 + $0x18] sm:$0xff]  }
  0x58   : > { %7551 = vmatprep.mubr.bf16.mxu0 %v8103_v39  ;;  %7345 = vmatprep.subr.bf16.mxu1 %v8108_v32  ;;  %v1843_v5 = vsel %vm8489_vm0, %v8368_v1, %v1838_v61  ;;  %v8125_v11 = vld [vmem:[#allocation12 + $0x68] sm:$0xff]   ;;  %v8143_v30 = vld [vmem:[#allocation12 + $0x20] sm:$0xff]   ;;  %v8149_v37 = vld [vmem:[%s9370_s0 + $0xd8] sm:$0xff]  }
  0x59   : > { %7568 = vmatpush3.bf16.msra.mxu0 %v8107_v13  ;;  %v1863_v7 = vsel %vm353_vm1, %v8368_v1, %v1858_v2  ;;  %v8147_v36 = vld [vmem:[#allocation12 + $0x60] sm:$0xff]   ;;  %v8150_v38 = vld [vmem:[%s9370_s0 + $0x298] sm:$0xff]   ;;  %v8151_v39 = vld [vmem:[#allocation12 + $0x30] sm:$0xff]  }
  0x5a   : > { %7569 = vmatprep.subr.bf16.mxu0 %v8109_v34  ;;  %7328 = vmatmul.mubr.bf16.gmra.mrb[12].mxu1 %v8104_v31  ;;  %v8106_v46 = vld [vmem:[#allocation12 + $0x70] sm:$0xff]   ;;  %v1866_v10 = vpack.c.bf16 %v1863_v7, %v1823_v3  ;;  %v8144_v31 = vld [vmem:[#allocation12 + $0x58] sm:$0xff]   ;;  %v8152_v40 = vld [vmem:[#allocation12 + $0x68] sm:$0xff]  }
  0x5b   : > { %7346 = vmatpush3.bf16.msra.mxu1 %v8108_v32  ;;  %v8129_v13 = vld [vmem:[#allocation12 + $0x70] sm:$0xff]   ;;  %v8145_v32 = vld [vmem:[#allocation12 + $0x28] sm:$0xff]   ;;  %v6385_v41 = vld [vmem:[%s8453_s18 + $0x80] sm:%s8482_s27] }
  0x5c   : > { %7363 = vmatprep.subr.bf16.mxu1 %v8112_v43  ;;  %v8110_v47 = vld [vmem:[#allocation12] sm:$0xff]   ;;  %v8164_v2 = vld [vmem:[%s9370_s0 + $0x2b0] sm:$0xff]   ;;  %v8165_v3 = vld [vmem:[%s9370_s0 + $0xf8] sm:$0xff]  }
  0x5d   : > { %7570 = vmatpush3.bf16.msra.mxu0 %v8109_v34  ;;  %7347 = vmatprep.mubr.bf16.mxu1 %v8110_v47  ;;  %v8148_v34 = vld [vmem:[%s9370_s0 + $0x290] sm:$0xff]   ;;  %v6387_v42 = vld [vmem:[%s8463_s7 + $0x80] sm:%s8493_s9] }
  0x5e   : > { %7552 = vmatmul.mubr.bf16.gmra.mrb[12].mxu0 %v8106_v46  ;;  %7587 = vmatprep.subr.bf16.mxu0 %v8114_v44  ;;  %v6391_v46 = vld [vmem:[%s8463_s7 + $0x84] sm:%s8493_s9]  ;;  %v8287_v19 = vld [vmem:[#allocation12 + $0x70] sm:$0xff]  }
  0x5f   : > { %7571 = vmatprep.mubr.bf16.mxu0 %v8111_v45  ;;  %v6389_v45 = vld [vmem:[%s8453_s18 + $0x84] sm:%s8482_s27]  ;;  %v1956_v47 = vunpack.c.l.bf16 %v6391_v46 }
  0x60   : > { %v8159_v61 = vld [vmem:[#allocation12 + $0x40] sm:$0xff]  }
  0x62   : > { %7348 = vmatmul.mubr.bf16.vlgmr.msra.gmra.mrb[0].mxu1 %v8622_v51  ;;  %v8120_v51 = vld [vmem:[%s9370_s0 + $0x250] sm:$0xff]  }
  0x63   : > { %7364 = vmatpush3.bf16.msra.mxu1 %v8112_v43  ;;  %7351 = vmatprep.mubr.bf16.mxu1 %v8668_v18  ;;  %v1798_v18 = vunpack.c.l.bf16 %v6377_v56  ;;  %v1896_v43 = vunpack.c.l.bf16 %v6385_v41 }
  0x64   : > { %7365 = vmatprep.subr.bf16.mxu1 %v8115_v48 }
  0x65   : > { %v1803_v0 = vsel %vm8489_vm0, %v8368_v1, %v1798_v18 }
  0x66   : > { %7572 = vmatmul.mubr.bf16.vlgmr.msra.gmra.mrb[0].mxu0 %v8113_v20  ;;  %v1864_v8 = vpack.c.bf16 %v1843_v5, %v1803_v0  ;;  %v1936_v20 = vunpack.c.l.bf16 %v6389_v45  ;;  %v8162_v0 = vld [vmem:[%s9370_s0 + $0xf0] sm:$0xff]   ;;  %v8166_v5 = vld [vmem:[%s9370_s0 + $0x2b8] sm:$0xff]   ;;  %v8190_v45 = vld [vmem:[%s9370_s0 + $0x2e8] sm:$0xff]  }
  0x67   : > { %7588 = vmatpush3.bf16.msra.mxu0 %v8114_v44  ;;  %7575 = vmatprep.mubr.bf16.mxu0 %v8117_v50  ;;  %v1916_v44 = vunpack.c.l.bf16 %v6387_v42  ;;  %v1901_v50 = vsel %vm8489_vm0, %v8368_v1, %v1896_v43  ;;  %v8189_v42 = vld [vmem:[%s9370_s0 + $0x128] sm:$0xff]  }
  0x68   : > { %7589 = vmatprep.subr.bf16.mxu0 %v8116_v49  ;;  %7366 = vmatpush3.bf16.msra.mxu1 %v8115_v48  ;;  %v1870_v6 = vmax.bf16 %v1866_v10, %v1864_v8  ;;  %v8153_v48 = vld [vmem:[#allocation12 + $0x38] sm:$0xff]   ;;  %v8168_v8 = vld [vmem:[#allocation12 + $0x50] sm:$0xff]   ;;  %v8170_v10 = vld [vmem:[%s9370_s0 + $0x100] sm:$0xff]  }
  0x69   : > { %7367 = vmatprep.subr.bf16.mxu1 %v8118_v52 }
  0x6a   : > { %7352 = vmatmul.mubr.bf16.gmra.mrb[4].mxu1 %v8749_v24  ;;  %v8124_v24 = vld [vmem:[%s9370_s0 + $0xa0] sm:$0xff]   ;;  %6987 = vst [vmem:[#allocation12 + $0x78] sm:$0xff] %v1870_v6   ;;  %v8171_v6 = vld [vmem:[#allocation12 + $0x58] sm:$0xff]  }
  0x6b   : > { %7590 = vmatpush3.bf16.msra.mxu0 %v8116_v49  ;;  %7355 = vmatprep.mubr.bf16.mxu1 %v8788_v35  ;;  %v8128_v35 = vld [vmem:[%s9370_s0 + $0x268] sm:$0xff]   ;;  %v8154_v49 = vld [vmem:[%s9370_s0 + $0xe0] sm:$0xff]  }
  0x6c   : > { %7591 = vmatprep.subr.bf16.mxu0 %v8120_v51  ;;  %7368 = vmatpush3.bf16.msra.mxu1 %v8118_v52  ;;  %v1921_v52 = vsel %vm353_vm1, %v8368_v1, %v1916_v44 }
  0x6d   : > { %7369 = vmatprep.subr.bf16.mxu1 %v8121_v54 }
  0x6e   : > { %7576 = vmatmul.mubr.bf16.gmra.mrb[4].mxu0 %v8119_v53  ;;  %v8156_v53 = vld [vmem:[%s9370_s0 + $0x2a0] sm:$0xff]  }
  0x6f   : > { %7592 = vmatpush3.bf16.msra.mxu0 %v8120_v51  ;;  %7579 = vmatprep.mubr.bf16.mxu0 %v8123_v63  ;;  %v1941_v51 = vsel %vm8489_vm0, %v8368_v1, %v1936_v20  ;;  %v8161_v63 = vld [vmem:[#allocation12 + $0x48] sm:$0xff]  }
  0x70   : > { %7593 = vmatprep.subr.bf16.mxu0 %v8122_v55  ;;  %7370 = vmatpush3.bf16.msra.mxu1 %v8121_v54  ;;  %v1961_v54 = vsel %vm353_vm1, %v8368_v1, %v1956_v47  ;;  %v1962_v56 = vpack.c.bf16 %v1941_v51, %v1901_v50  ;;  %v8191_v20 = vld [vmem:[#allocation12 + $0x48] sm:$0xff]   ;;  %v8196_v50 = vld [vmem:[%s9370_s0 + $0x2f0] sm:$0xff]   ;;  %v8197_v51 = vld [vmem:[%s9370_s0 + $0x138] sm:$0xff]  }
  0x71   : > { %7371 = vmatprep.subr.bf16.mxu1 %v8124_v24  ;;  %v8131_v22 = vld [vmem:[#allocation12 + $0x78] sm:$0xff]   ;;  %v1964_v18 = vpack.c.bf16 %v1961_v54, %v1921_v52  ;;  %v8193_v52 = vld [vmem:[#allocation12 + $0x50] sm:$0xff]  }
  0x72   : > { %7356 = vmatmul.mubr.bf16.gmra.mrb[8].mxu1 %v8833_v60  ;;  %v8133_v60 = vld [vmem:[%s9370_s0 + $0xb8] sm:$0xff]  }
  0x73   : > { %7594 = vmatpush3.bf16.msra.mxu0 %v8122_v55  ;;  %7359 = vmatprep.mubr.bf16.mxu1 %v8862_v14  ;;  %v8136_v14 = vld [vmem:[#allocation12 + $0x48] sm:$0xff]   ;;  %v8155_v55 = vld [vmem:[#allocation12 + $0x70] sm:$0xff]   ;;  %v1968_v59 = vmax.bf16 %v1964_v18, %v1962_v56  ;;  %v8160_v62 = vld [vmem:[#allocation12 + $0x78] sm:$0xff]  }
  0x74   : > { %7595 = vmatprep.subr.bf16.mxu0 %v8126_v9  ;;  %7372 = vmatpush3.bf16.msra.mxu1 %v8124_v24  ;;  %v8167_v24 = vld [vmem:[#allocation12 + $0x18] sm:$0xff]   ;;  %v8202_v18 = vld [vmem:[%s9370_s0 + $0x140] sm:$0xff]  }
  0x75   : > { %7373 = vmatprep.subr.bf16.mxu1 %v8127_v12  ;;  %6991 = vst [vmem:[#allocation12 + $0x80] sm:$0xff] %v1968_v59   ;;  %v8198_v54 = vld [vmem:[%s9370_s0 + $0x2f8] sm:$0xff]   ;;  %v8207_v59 = vld [vmem:[#allocation12 + $0x30] sm:$0xff]  }
  0x76   : > { %7580 = vmatmul.mubr.bf16.gmra.mrb[8].mxu0 %v8125_v11  ;;  %v8172_v11 = vld [vmem:[%s9370_s0 + $0x2c0] sm:$0xff]  }
  0x77   : > { %7596 = vmatpush3.bf16.msra.mxu0 %v8126_v9  ;;  %7583 = vmatprep.mubr.bf16.mxu0 %v8129_v13  ;;  %v8169_v9 = vld [vmem:[#allocation12 + $0x20] sm:$0xff]   ;;  %v8175_v13 = vld [vmem:[#allocation12 + $0x28] sm:$0xff]  }
  0x78   : > { %7597 = vmatprep.subr.bf16.mxu0 %v8128_v35  ;;  %7374 = vmatpush3.bf16.msra.mxu1 %v8127_v12  ;;  %v8173_v12 = vld [vmem:[%s9370_s0 + $0x108] sm:$0xff]  }
  0x79   : > { %7375 = vmatprep.subr.bf16.mxu1 %v8130_v15 }
  0x7a   : > { %7360 = vmatmul.mubr.bf16.gmra.mrb[12].mxu1 %v8844_v4  ;;  %v8141_v4 = vld [vmem:[%s9370_s0 + $0xc8] sm:$0xff]  }
  0x7b   : > { %7598 = vmatpush3.bf16.msra.mxu0 %v8128_v35  ;;  %7379 = vmatprep.mubr.bf16.mxu1 %v8135_v23  ;;  %v8174_v35 = vld [vmem:[%s9370_s0 + $0x2c8] sm:$0xff]   ;;  %v8181_v23 = vld [vmem:[%s9370_s0 + $0x118] sm:$0xff]  }
  0x7c   : > { %7599 = vmatprep.subr.bf16.mxu0 %v8132_v16  ;;  %7376 = vmatpush3.bf16.msra.mxu1 %v8130_v15  ;;  %v8163_v7 = vld [vmem:[#allocation12 + $0x80] sm:$0xff]  }
  0x7d   : > { %7377 = vmatprep.subr.bf16.mxu1 %v8133_v60  ;;  %v8176_v15 = vld [vmem:[#allocation12 + $0x60] sm:$0xff]  }
  0x7e   : > { %7584 = vmatmul.mubr.bf16.gmra.mrb[12].mxu0 %v8131_v22  ;;  %v8179_v22 = vld [vmem:[#allocation12 + $0x68] sm:$0xff]   ;;  %v8192_v47 = vld [vmem:[#allocation12 + $0x80] sm:$0xff]  }
  0x7f   : > { %7600 = vmatpush3.bf16.msra.mxu0 %v8132_v16  ;;  %7603 = vmatprep.mubr.bf16.mxu0 %v8136_v14  ;;  %v8177_v16 = vld [vmem:[#allocation12 + $0x30] sm:$0xff]   ;;  %v8182_v14 = vld [vmem:[%s9370_s0 + $0x2d8] sm:$0xff]  }
  0x80   : > { %7601 = vmatprep.subr.bf16.mxu0 %v8134_v17  ;;  %7378 = vmatpush3.bf16.msra.mxu1 %v8133_v60  ;;  %v8178_v60 = vld [vmem:[%s9370_s0 + $0x110] sm:$0xff]  }
  0x81   : > { %7395 = vmatprep.subr.bf16.mxu1 %v8138_v26 }
  0x83   : > { %7602 = vmatpush3.bf16.msra.mxu0 %v8134_v17  ;;  %7380 = vmatmul.mubr.bf16.vlgmr.msra.gmra.mrb[0].mxu1 %v8137_v25  ;;  %v8180_v17 = vld [vmem:[%s9370_s0 + $0x2d0] sm:$0xff]   ;;  %v8183_v25 = vld [vmem:[#allocation12 + $0x38] sm:$0xff]  }
  0x84   : > { %7619 = vmatprep.subr.bf16.mxu0 %v8140_v28  ;;  %7396 = vmatpush3.bf16.msra.mxu1 %v8138_v26  ;;  %v8184_v26 = vld [vmem:[#allocation12 + $0x70] sm:$0xff]  }
  0x85   : > { %7397 = vmatprep.subr.bf16.mxu1 %v8141_v4  ;;  %7383 = vmatprep.mubr.bf16.mxu1 %v8143_v30  ;;  %v8185_v30 = vld [vmem:[#allocation12 + $0x40] sm:$0xff]  }
  0x86   : > { %7604 = vmatmul.mubr.bf16.vlgmr.msra.gmra.mrb[0].mxu0 %v8139_v27 }
  0x87   : > { %7620 = vmatpush3.bf16.msra.mxu0 %v8140_v28  ;;  %7607 = vmatprep.mubr.bf16.mxu0 %v8144_v31  ;;  %v6393_v28 = vld [vmem:[%s8453_s18 + $0x88] sm:%s8482_s27]  ;;  %v8186_v31 = vld [vmem:[%s9370_s0 + $0x120] sm:$0xff]  }
  0x88   : > { %7621 = vmatprep.subr.bf16.mxu0 %v8142_v29  ;;  %7398 = vmatpush3.bf16.msra.mxu1 %v8141_v4  ;;  %v1994_v27 = vunpack.c.l.bf16 %v6393_v28  ;;  %v6395_v4 = vld [vmem:[%s8463_s7 + $0x88] sm:%s8493_s9] }
  0x89   : > { %7399 = vmatprep.subr.bf16.mxu1 %v8146_v33  ;;  %v8221_v28 = vld [vmem:[%s9370_s0 + $0x168] sm:$0xff]  }
  0x8b   : > { %7622 = vmatpush3.bf16.msra.mxu0 %v8142_v29  ;;  %7384 = vmatmul.mubr.bf16.gmra.mrb[4].mxu1 %v8145_v32  ;;  %v6397_v29 = vld [vmem:[%s8453_s18 + $0x8c] sm:%s8482_s27]  ;;  %v2014_v32 = vunpack.c.l.bf16 %v6395_v4 }
  0x8c   : > { %7623 = vmatprep.subr.bf16.mxu0 %v8148_v34  ;;  %7400 = vmatpush3.bf16.msra.mxu1 %v8146_v33  ;;  %v2034_v33 = vunpack.c.l.bf16 %v6397_v29 }
  0x8d   : > { %7401 = vmatprep.subr.bf16.mxu1 %v8149_v37  ;;  %7387 = vmatprep.mubr.bf16.mxu1 %v8151_v39  ;;  %v8187_v39 = vld [vmem:[#allocation12 + $0x78] sm:$0xff]  }
  0x8e   : > { %7608 = vmatmul.mubr.bf16.gmra.mrb[4].mxu0 %v8147_v36  ;;  %v6399_v36 = vld [vmem:[%s8463_s7 + $0x8c] sm:%s8493_s9]  ;;  %v2039_v41 = vsel %vm8489_vm0, %v8368_v1, %v2034_v33 }
  0x8f   : > { %7624 = vmatpush3.bf16.msra.mxu0 %v8148_v34  ;;  %7611 = vmatprep.mubr.bf16.mxu0 %v8152_v40  ;;  %v8188_v34 = vld [vmem:[%s9370_s0 + $0x2e0] sm:$0xff]   ;;  %v2019_v40 = vsel %vm353_vm1, %v8368_v1, %v2014_v32  ;;  %v8222_v33 = vld [vmem:[%s9370_s0 + $0x328] sm:$0xff]  }
  0x90   : > { %7625 = vmatprep.subr.bf16.mxu0 %v8150_v38  ;;  %7402 = vmatpush3.bf16.msra.mxu1 %v8149_v37  ;;  %v1999_v37 = vsel %vm8489_vm0, %v8368_v1, %v1994_v27  ;;  %v8223_v27 = vld [vmem:[#allocation12 + $0x50] sm:$0xff]  }
  0x91   : > { %7403 = vmatprep.subr.bf16.mxu1 %v8154_v49  ;;  %v2060_v44 = vpack.c.bf16 %v2039_v41, %v1999_v37  ;;  %v8225_v37 = vld [vmem:[#allocation12 + $0x58] sm:$0xff]  }
  0x92   : > { %v8230_v41 = vld [vmem:[%s9370_s0 + $0x338] sm:$0xff]  }
  0x93   : > { %7626 = vmatpush3.bf16.msra.mxu0 %v8150_v38  ;;  %7388 = vmatmul.mubr.bf16.gmra.mrb[8].mxu1 %v8153_v48  ;;  %v2054_v38 = vunpack.c.l.bf16 %v6399_v36 }
  0x94   : > { %7627 = vmatprep.subr.bf16.mxu0 %v8156_v53  ;;  %7404 = vmatpush3.bf16.msra.mxu1 %v8154_v49  ;;  %v8194_v49 = vld [vmem:[%s9370_s0 + $0x130] sm:$0xff]  }
  0x95   : > { %7405 = vmatprep.subr.bf16.mxu1 %v8157_v57  ;;  %7391 = vmatprep.mubr.bf16.mxu1 %v8159_v61  ;;  %v2059_v43 = vsel %vm353_vm1, %v8368_v1, %v2054_v38  ;;  %v8205_v61 = vld [vmem:[%s9370_s0 + $0x148] sm:$0xff]   ;;  %v8228_v38 = vld [vmem:[%s9370_s0 + $0x330] sm:$0xff]  }
  0x96   : > { %7612 = vmatmul.mubr.bf16.gmra.mrb[8].mxu0 %v8155_v55  ;;  %v2062_v46 = vpack.c.bf16 %v2059_v43, %v2019_v40  ;;  %v8200_v55 = vld [vmem:[#allocation12 + $0x58] sm:$0xff]   ;;  %v8231_v40 = vld [vmem:[#allocation12 + $0x28] sm:$0xff]  }
  0x97   : > { %7628 = vmatpush3.bf16.msra.mxu0 %v8156_v53  ;;  %7615 = vmatprep.mubr.bf16.mxu0 %v8160_v62  ;;  %v8199_v53 = vld [vmem:[#allocation12 + $0x20] sm:$0xff]  }
  0x98   : > { %7629 = vmatprep.subr.bf16.mxu0 %v8158_v58  ;;  %7406 = vmatpush3.bf16.msra.mxu1 %v8157_v57  ;;  %v2066_v48 = vmax.bf16 %v2062_v46, %v2060_v44  ;;  %v8204_v57 = vld [vmem:[%s9370_s0 + $0x300] sm:$0xff]  }
  0x99   : > { %7407 = vmatprep.subr.bf16.mxu1 %v8162_v0  ;;  %v8203_v62 = vld [vmem:[#allocation12 + $0x60] sm:$0xff]  }
  0x9a   : > { %6995 = vst [vmem:[#allocation12 + $0x88] sm:$0xff] %v2066_v48   ;;  %v8234_v44 = vld [vmem:[%s9370_s0 + $0x180] sm:$0xff]   ;;  %v8235_v48 = vld [vmem:[#allocation12 + $0x68] sm:$0xff]  }
  0x9b   : > { %7630 = vmatpush3.bf16.msra.mxu0 %v8158_v58  ;;  %7392 = vmatmul.mubr.bf16.gmra.mrb[12].mxu1 %v8161_v63  ;;  %v8201_v58 = vld [vmem:[#allocation12 + $0x28] sm:$0xff]   ;;  %v8236_v46 = vld [vmem:[%s9370_s0 + $0x340] sm:$0xff]  }
  0x9c   : > { %7631 = vmatprep.subr.bf16.mxu0 %v8164_v2  ;;  %7408 = vmatpush3.bf16.msra.mxu1 %v8162_v0  ;;  %v8208_v63 = vld [vmem:[#allocation12 + $0x68] sm:$0xff]  }
  0x9d   : > { %7409 = vmatprep.subr.bf16.mxu1 %v8165_v3  ;;  %7411 = vmatprep.mubr.bf16.mxu1 %v8167_v24  ;;  %v8206_v0 = vld [vmem:[%s9370_s0 + $0x308] sm:$0xff]   ;;  %v8211_v24 = vld [vmem:[#allocation12 + $0x70] sm:$0xff]  }
  0x9e   : > { %7616 = vmatmul.mubr.bf16.gmra.mrb[12].mxu0 %v8163_v7  ;;  %v8213_v7 = vld [vmem:[%s9370_s0 + $0x158] sm:$0xff]  }
  0x9f   : > { %7632 = vmatpush3.bf16.msra.mxu0 %v8164_v2  ;;  %7635 = vmatprep.mubr.bf16.mxu0 %v8168_v8  ;;  %v8210_v2 = vld [vmem:[%s9370_s0 + $0x150] sm:$0xff]   ;;  %v8215_v8 = vld [vmem:[#allocation12 + $0x40] sm:$0xff]  }
  0xa0   : > { %7633 = vmatprep.subr.bf16.mxu0 %v8166_v5  ;;  %7410 = vmatpush3.bf16.msra.mxu1 %v8165_v3  ;;  %v8209_v3 = vld [vmem:[#allocation12 + $0x38] sm:$0xff]  }
  0xa1   : > { %7427 = vmatprep.subr.bf16.mxu1 %v8170_v10  ;;  %v8195_v56 = vld [vmem:[#allocation12 + $0x88] sm:$0xff]  }
  0xa2   : > { %v8224_v32 = vld [vmem:[#allocation12 + $0x88] sm:$0xff]  }
  0xa3   : > { %7634 = vmatpush3.bf16.msra.mxu0 %v8166_v5  ;;  %7412 = vmatmul.mubr.bf16.vlgmr.msra.gmra.mrb[0].mxu1 %v8169_v9  ;;  %v8212_v5 = vld [vmem:[%s9370_s0 + $0x310] sm:$0xff]   ;;  %v8214_v9 = vld [vmem:[%s9370_s0 + $0x318] sm:$0xff]  }
  0xa4   : > { %7651 = vmatprep.subr.bf16.mxu0 %v8172_v11  ;;  %7428 = vmatpush3.bf16.msra.mxu1 %v8170_v10  ;;  %v8216_v10 = vld [vmem:[#allocation12 + $0x78] sm:$0xff]  }
  0xa5   : > { %7429 = vmatprep.subr.bf16.mxu1 %v8173_v12  ;;  %7415 = vmatprep.mubr.bf16.mxu1 %v8175_v13  ;;  %v6405_v13 = vld [vmem:[%s8453_s18 + $0x94] sm:%s8482_s27] }
  0xa6   : > { %7636 = vmatmul.mubr.bf16.vlgmr.msra.gmra.mrb[0].mxu0 %v8171_v6  ;;  %v6401_v6 = vld [vmem:[%s8453_s18 + $0x90] sm:%s8482_s27] }
  0xa7   : > { %7652 = vmatpush3.bf16.msra.mxu0 %v8172_v11  ;;  %7639 = vmatprep.mubr.bf16.mxu0 %v8176_v15  ;;  %v8218_v11 = vld [vmem:[%s9370_s0 + $0x160] sm:$0xff]  }
  0xa8   : > { %7653 = vmatprep.subr.bf16.mxu0 %v8174_v35  ;;  %7430 = vmatpush3.bf16.msra.mxu1 %v8173_v12  ;;  %v2092_v12 = vunpack.c.l.bf16 %v6401_v6 }
  0xa9   : > { %7431 = vmatprep.subr.bf16.mxu1 %v8178_v60 }
  0xab   : > { %7654 = vmatpush3.bf16.msra.mxu0 %v8174_v35  ;;  %7416 = vmatmul.mubr.bf16.gmra.mrb[4].mxu1 %v8177_v16  ;;  %v6403_v35 = vld [vmem:[%s8463_s7 + $0x90] sm:%s8493_s9]  ;;  %v2132_v16 = vunpack.c.l.bf16 %v6405_v13 }
  0xac   : > { %7655 = vmatprep.subr.bf16.mxu0 %v8180_v17  ;;  %7432 = vmatpush3.bf16.msra.mxu1 %v8178_v60  ;;  %v2112_v15 = vunpack.c.l.bf16 %v6403_v35  ;;  %v6407_v60 = vld [vmem:[%s8463_s7 + $0x94] sm:%s8493_s9]  ;;  %v8251_v35 = vld [vmem:[#allocation12 + $0x88] sm:$0xff]  }
  0xad   : > { %7433 = vmatprep.subr.bf16.mxu1 %v8181_v23  ;;  %7419 = vmatprep.mubr.bf16.mxu1 %v8183_v25 }
  0xae   : > { %7640 = vmatmul.mubr.bf16.gmra.mrb[4].mxu0 %v8179_v22  ;;  %v2097_v22 = vsel %vm8489_vm0, %v8368_v1, %v2092_v12  ;;  %v2117_v25 = vsel %vm353_vm1, %v8368_v1, %v2112_v15 }
  0xaf   : > { %7656 = vmatpush3.bf16.msra.mxu0 %v8180_v17  ;;  %7643 = vmatprep.mubr.bf16.mxu0 %v8184_v26  ;;  %v8217_v17 = vld [vmem:[#allocation12 + $0x48] sm:$0xff]   ;;  %v2137_v26 = vsel %vm8489_vm0, %v8368_v1, %v2132_v16 }
  0xb0   : > { %7657 = vmatprep.subr.bf16.mxu0 %v8182_v14  ;;  %7434 = vmatpush3.bf16.msra.mxu1 %v8181_v23  ;;  %v2152_v23 = vunpack.c.l.bf16 %v6407_v60  ;;  %v2158_v29 = vpack.c.bf16 %v2137_v26, %v2097_v22  ;;  %v8254_v16 = vld [vmem:[%s9370_s0 + $0x368] sm:$0xff]   ;;  %v8258_v22 = vld [vmem:[%s9370_s0 + $0x1b0] sm:$0xff]  }
  0xb1   : > { %7435 = vmatprep.subr.bf16.mxu1 %v8186_v31  ;;  %v8263_v26 = vld [vmem:[#allocation12 + $0x30] sm:$0xff]  }
  0xb2   : > { %v2157_v4 = vsel %vm353_vm1, %v8368_v1, %v2152_v23  ;;  %v8257_v23 = vld [vmem:[#allocation12 + $0x60] sm:$0xff]  }
  0xb3   : > { %7658 = vmatpush3.bf16.msra.mxu0 %v8182_v14  ;;  %7420 = vmatmul.mubr.bf16.gmra.mrb[8].mxu1 %v8185_v30  ;;  %v8220_v14 = vld [vmem:[%s9370_s0 + $0x320] sm:$0xff]  }
  0xb4   : > { %7659 = vmatprep.subr.bf16.mxu0 %v8188_v34  ;;  %7436 = vmatpush3.bf16.msra.mxu1 %v8186_v31  ;;  %v8219_v30 = vld [vmem:[#allocation12 + $0x80] sm:$0xff]   ;;  %v2160_v31 = vpack.c.bf16 %v2157_v4, %v2117_v25  ;;  %v8261_v25 = vld [vmem:[%s9370_s0 + $0x1b8] sm:$0xff]  }
  0xb5   : > { %7437 = vmatprep.subr.bf16.mxu1 %v8189_v42  ;;  %7423 = vmatprep.mubr.bf16.mxu1 %v8191_v20  ;;  %v8237_v20 = vld [vmem:[%s9370_s0 + $0x188] sm:$0xff]   ;;  %v8267_v4 = vld [vmem:[%s9370_s0 + $0x380] sm:$0xff]  }
  0xb6   : > { %7644 = vmatmul.mubr.bf16.gmra.mrb[8].mxu0 %v8187_v39  ;;  %v2164_v36 = vmax.bf16 %v2160_v31, %v2158_v29  ;;  %v8229_v39 = vld [vmem:[%s9370_s0 + $0x178] sm:$0xff]   ;;  %v8269_v31 = vld [vmem:[#allocation12 + $0x40] sm:$0xff]  }
  0xb7   : > { %7660 = vmatpush3.bf16.msra.mxu0 %v8188_v34  ;;  %7647 = vmatprep.mubr.bf16.mxu0 %v8192_v47  ;;  %v8226_v34 = vld [vmem:[%s9370_s0 + $0x170] sm:$0xff]   ;;  %v8239_v47 = vld [vmem:[#allocation12 + $0x38] sm:$0xff]  }
  0xb8   : > { %7661 = vmatprep.subr.bf16.mxu0 %v8190_v45  ;;  %7438 = vmatpush3.bf16.msra.mxu1 %v8189_v42  ;;  %6999 = vst [vmem:[#allocation12 + $0x90] sm:$0xff] %v2164_v36   ;;  %v8232_v42 = vld [vmem:[#allocation12 + $0x60] sm:$0xff]   ;;  %v8270_v36 = vld [vmem:[#allocation12 + $0x78] sm:$0xff]  }
  0xb9   : > { %7439 = vmatprep.subr.bf16.mxu1 %v8194_v49 }
  0xbb   : > { %7662 = vmatpush3.bf16.msra.mxu0 %v8190_v45  ;;  %7424 = vmatmul.mubr.bf16.gmra.mrb[12].mxu1 %v8193_v52  ;;  %v8233_v45 = vld [vmem:[#allocation12 + $0x30] sm:$0xff]  }
  0xbc   : > { %7663 = vmatprep.subr.bf16.mxu0 %v8196_v50  ;;  %7440 = vmatpush3.bf16.msra.mxu1 %v8194_v49  ;;  %v8238_v49 = vld [vmem:[%s9370_s0 + $0x348] sm:$0xff]   ;;  %v8242_v52 = vld [vmem:[%s9370_s0 + $0x190] sm:$0xff]  }
  0xbd   : > { %7443 = vmatprep.mubr.bf16.mxu1 %v8199_v53  ;;  %7441 = vmatprep.subr.bf16.mxu1 %v8197_v51  ;;  %v8241_v53 = vld [vmem:[#allocation12 + $0x40] sm:$0xff]  }
  0xbe   : > { %7648 = vmatmul.mubr.bf16.gmra.mrb[12].mxu0 %v8195_v56  ;;  %v8247_v56 = vld [vmem:[#allocation12 + $0x48] sm:$0xff]  }
  0xbf   : > { %7664 = vmatpush3.bf16.msra.mxu0 %v8196_v50  ;;  %7667 = vmatprep.mubr.bf16.mxu0 %v8200_v55  ;;  %v8227_v43 = vld [vmem:[#allocation12 + $0x90] sm:$0xff]   ;;  %v8245_v55 = vld [vmem:[%s9370_s0 + $0x198] sm:$0xff]  }
  0xc0   : > { %7665 = vmatprep.subr.bf16.mxu0 %v8198_v54  ;;  %7442 = vmatpush3.bf16.msra.mxu1 %v8197_v51  ;;  %v8240_v50 = vld [vmem:[#allocation12 + $0x70] sm:$0xff]  }
  0xc1   : > { %7459 = vmatprep.subr.bf16.mxu1 %v8202_v18  ;;  %v8244_v51 = vld [vmem:[%s9370_s0 + $0x350] sm:$0xff]  }
  0xc2   : > { %v8256_v60 = vld [vmem:[#allocation12 + $0x90] sm:$0xff]  }
  0xc3   : > { %7666 = vmatpush3.bf16.msra.mxu0 %v8198_v54  ;;  %7444 = vmatmul.mubr.bf16.vlgmr.msra.gmra.mrb[0].mxu1 %v8201_v58  ;;  %v8243_v54 = vld [vmem:[#allocation12 + $0x78] sm:$0xff]   ;;  %v8249_v58 = vld [vmem:[#allocation12 + $0x50] sm:$0xff]  }
  0xc4   : > { %7683 = vmatprep.subr.bf16.mxu0 %v8204_v57  ;;  %7460 = vmatpush3.bf16.msra.mxu1 %v8202_v18  ;;  %v8246_v18 = vld [vmem:[%s9370_s0 + $0x358] sm:$0xff]  }
  0xc5   : > { %7447 = vmatprep.mubr.bf16.mxu1 %v8207_v59  ;;  %7461 = vmatprep.subr.bf16.mxu1 %v8205_v61  ;;  %v8250_v59 = vld [vmem:[%s9370_s0 + $0x1a0] sm:$0xff]  }
  0xc6   : > { %7668 = vmatmul.mubr.bf16.vlgmr.msra.gmra.mrb[0].mxu0 %v8203_v62  ;;  %v6411_v62 = vld [vmem:[%s8463_s7 + $0x98] sm:%s8493_s9] }
  0xc7   : > { %7684 = vmatpush3.bf16.msra.mxu0 %v8204_v57  ;;  %7671 = vmatprep.mubr.bf16.mxu0 %v8208_v63  ;;  %v8248_v57 = vld [vmem:[#allocation12 + $0x80] sm:$0xff]  }
  0xc8   : > { %7685 = vmatprep.subr.bf16.mxu0 %v8206_v0  ;;  %7462 = vmatpush3.bf16.msra.mxu1 %v8205_v61  ;;  %v6409_v61 = vld [vmem:[%s8453_s18 + $0x98] sm:%s8482_s27] }
  0xc9   : > { %7463 = vmatprep.subr.bf16.mxu1 %v8210_v2  ;;  %v2190_v63 = vunpack.c.l.bf16 %v6409_v61 }
  0xcb   : > { %7686 = vmatpush3.bf16.msra.mxu0 %v8206_v0  ;;  %7448 = vmatmul.mubr.bf16.gmra.mrb[4].mxu1 %v8209_v3  ;;  %v2210_v0 = vunpack.c.l.bf16 %v6411_v62  ;;  %v6415_v3 = vld [vmem:[%s8463_s7 + $0x9c] sm:%s8493_s9]  ;;  %v6427_v62 = vld [vmem:[%s8463_s7 + $0xa8] sm:%s8493_s9] }
  0xcc   : > { %7687 = vmatprep.subr.bf16.mxu0 %v8212_v5  ;;  %7464 = vmatpush3.bf16.msra.mxu1 %v8210_v2  ;;  %v6413_v2 = vld [vmem:[%s8453_s18 + $0x9c] sm:%s8482_s27] }
  0xcd   : > { %7465 = vmatprep.subr.bf16.mxu1 %v8213_v7  ;;  %7451 = vmatprep.mubr.bf16.mxu1 %v8215_v8  ;;  %v8253_v8 = vld [vmem:[%s9370_s0 + $0x1a8] sm:$0xff]  }
  0xce   : > { %7672 = vmatmul.mubr.bf16.gmra.mrb[4].mxu0 %v8211_v24  ;;  %v2230_v24 = vunpack.c.l.bf16 %v6413_v2 }
  0xcf   : > { %7688 = vmatpush3.bf16.msra.mxu0 %v8212_v5  ;;  %7675 = vmatprep.mubr.bf16.mxu0 %v8216_v10  ;;  %v8252_v5 = vld [vmem:[%s9370_s0 + $0x360] sm:$0xff]   ;;  %v2215_v10 = vsel %vm353_vm1, %v8368_v1, %v2210_v0  ;;  %v2406_v0 = vunpack.c.l.bf16 %v6427_v62 }
  0xd0   : > { %7689 = vmatprep.subr.bf16.mxu0 %v8214_v9  ;;  %7466 = vmatpush3.bf16.msra.mxu1 %v8213_v7  ;;  %v2250_v7 = vunpack.c.l.bf16 %v6415_v3  ;;  %v2235_v6 = vsel %vm8489_vm0, %v8368_v1, %v2230_v24  ;;  %v6431_v3 = vld [vmem:[%s8463_s7 + $0xac] sm:%s8493_s9] }
  0xd1   : > { %7467 = vmatprep.subr.bf16.mxu1 %v8218_v11 }
  0xd2   : > { %v2255_v12 = vsel %vm353_vm1, %v8368_v1, %v2250_v7  ;;  %v2446_v7 = vunpack.c.l.bf16 %v6431_v3 }
  0xd3   : > { %7690 = vmatpush3.bf16.msra.mxu0 %v8214_v9  ;;  %7452 = vmatmul.mubr.bf16.gmra.mrb[8].mxu1 %v8217_v17  ;;  %v2195_v9 = vsel %vm8489_vm0, %v8368_v1, %v2190_v63  ;;  %v2258_v15 = vpack.c.bf16 %v2255_v12, %v2215_v10  ;;  %v6429_v63 = vld [vmem:[%s8453_s18 + $0xac] sm:%s8482_s27] }
  0xd4   : > { %7691 = vmatprep.subr.bf16.mxu0 %v8220_v14  ;;  %7468 = vmatpush3.bf16.msra.mxu1 %v8218_v11  ;;  %v8255_v11 = vld [vmem:[#allocation12 + $0x58] sm:$0xff]   ;;  %v2256_v13 = vpack.c.bf16 %v2235_v6, %v2195_v9  ;;  %v2426_v2 = vunpack.c.l.bf16 %v6429_v63  ;;  %v2411_v9 = vsel %vm353_vm1, %v8368_v1, %v2406_v0  ;;  %v2451_v6 = vsel %vm353_vm1, %v8368_v1, %v2446_v7 }
  0xd5   : > { %7469 = vmatprep.subr.bf16.mxu1 %v8221_v28  ;;  %7455 = vmatprep.mubr.bf16.mxu1 %v8223_v27  ;;  %v8264_v27 = vld [vmem:[#allocation12 + $0x68] sm:$0xff]  }
  0xd6   : > { %7676 = vmatmul.mubr.bf16.gmra.mrb[8].mxu0 %v8219_v30  ;;  %v2262_v17 = vmax.bf16 %v2258_v15, %v2256_v13  ;;  %v8265_v30 = vld [vmem:[#allocation12 + $0x38] sm:$0xff]   ;;  %v2431_v10 = vsel %vm8489_vm0, %v8368_v1, %v2426_v2  ;;  %v2454_v13 = vpack.c.bf16 %v2451_v6, %v2411_v9  ;;  %v8288_v15 = vld [vmem:[#allocation12 + $0x90] sm:$0xff]  }
  0xd7   : > { %7692 = vmatpush3.bf16.msra.mxu0 %v8220_v14  ;;  %7679 = vmatprep.mubr.bf16.mxu0 %v8224_v32  ;;  %v8260_v14 = vld [vmem:[%s9370_s0 + $0x370] sm:$0xff]   ;;  %v8268_v32 = vld [vmem:[%s9370_s0 + $0x388] sm:$0xff]  }
  0xd8   : > { %7693 = vmatprep.subr.bf16.mxu0 %v8222_v33  ;;  %7470 = vmatpush3.bf16.msra.mxu1 %v8221_v28  ;;  %7003 = vst [vmem:[#allocation12 + $0x98] sm:$0xff] %v2262_v17   ;;  %v8262_v28 = vld [vmem:[%s9370_s0 + $0x378] sm:$0xff]  }
  0xd9   : > { %7471 = vmatprep.subr.bf16.mxu1 %v8226_v34 }
  0xdb   : > { %7694 = vmatpush3.bf16.msra.mxu0 %v8222_v33  ;;  %7456 = vmatmul.mubr.bf16.gmra.mrb[12].mxu1 %v8225_v37  ;;  %v8266_v33 = vld [vmem:[#allocation12 + $0x70] sm:$0xff]  }
  0xdc   : > { %7695 = vmatprep.subr.bf16.mxu0 %v8228_v38  ;;  %7472 = vmatpush3.bf16.msra.mxu1 %v8226_v34  ;;  %v8271_v34 = vld [vmem:[#allocation12 + $0x48] sm:$0xff]   ;;  %v8273_v37 = vld [vmem:[%s9370_s0 + $0x390] sm:$0xff]  }
  0xdd   : > { %7473 = vmatprep.subr.bf16.mxu1 %v8229_v39  ;;  %7475 = vmatprep.mubr.bf16.mxu1 %v8231_v40  ;;  %v6417_v40 = vld [vmem:[%s8453_s18 + $0xa0] sm:%s8482_s27] }
  0xde   : > { %7680 = vmatmul.mubr.bf16.gmra.mrb[12].mxu0 %v8227_v43 }
  0xdf   : > { %7696 = vmatpush3.bf16.msra.mxu0 %v8228_v38  ;;  %7699 = vmatprep.mubr.bf16.mxu0 %v8232_v42  ;;  %v8259_v29 = vld [vmem:[#allocation12 + $0x98] sm:$0xff]   ;;  %v2288_v42 = vunpack.c.l.bf16 %v6417_v40 }
  0xe0   : > { %7474 = vmatpush3.bf16.msra.mxu1 %v8229_v39  ;;  %7697 = vmatprep.subr.bf16.mxu0 %v8230_v41  ;;  %v8274_v38 = vld [vmem:[%s9370_s0 + $0x398] sm:$0xff]   ;;  %v8275_v39 = vld [vmem:[#allocation12 + $0x50] sm:$0xff]  }
  0xe1   : > { %7491 = vmatprep.subr.bf16.mxu1 %v8234_v44  ;;  %v8290_v17 = vld [vmem:[#allocation12 + $0x98] sm:$0xff]  }
  0xe3   : > { %7476 = vmatmul.mubr.bf16.vlgmr.msra.gmra.mrb[0].mxu1 %v8233_v45  ;;  %7698 = vmatpush3.bf16.msra.mxu0 %v8230_v41  ;;  %v6419_v41 = vld [vmem:[%s8463_s7 + $0xa0] sm:%s8493_s9] }
  0xe4   : > { %7492 = vmatpush3.bf16.msra.mxu1 %v8234_v44  ;;  %7715 = vmatprep.subr.bf16.mxu0 %v8236_v46  ;;  %v2308_v43 = vunpack.c.l.bf16 %v6419_v41  ;;  %v6421_v44 = vld [vmem:[%s8453_s18 + $0xa4] sm:%s8482_s27] }
  0xe5   : > { %7493 = vmatprep.subr.bf16.mxu1 %v8237_v20  ;;  %7479 = vmatprep.mubr.bf16.mxu1 %v8239_v47  ;;  %v6423_v45 = vld [vmem:[%s8463_s7 + $0xa4] sm:%s8493_s9]  ;;  %v2293_v47 = vsel %vm8489_vm0, %v8368_v1, %v2288_v42 }
  0xe6   : > { %7700 = vmatmul.mubr.bf16.vlgmr.msra.gmra.mrb[0].mxu0 %v8235_v48  ;;  %v2313_v48 = vsel %vm353_vm1, %v8368_v1, %v2308_v43 }
  0xe7   : > { %7716 = vmatpush3.bf16.msra.mxu0 %v8236_v46  ;;  %7703 = vmatprep.mubr.bf16.mxu0 %v8240_v50  ;;  %v2328_v46 = vunpack.c.l.bf16 %v6421_v44 }
  0xe8   : > { %7494 = vmatpush3.bf16.msra.mxu1 %v8237_v20  ;;  %7717 = vmatprep.subr.bf16.mxu0 %v8238_v49  ;;  %v2348_v20 = vunpack.c.l.bf16 %v6423_v45 }
  0xe9   : > { %7495 = vmatprep.subr.bf16.mxu1 %v8242_v52  ;;  %v2333_v50 = vsel %vm8489_vm0, %v8368_v1, %v2328_v46 }
  0xeb   : > { %7480 = vmatmul.mubr.bf16.gmra.mrb[4].mxu1 %v8241_v53  ;;  %7718 = vmatpush3.bf16.msra.mxu0 %v8238_v49  ;;  %v8272_v49 = vld [vmem:[#allocation12 + $0x80] sm:$0xff]   ;;  %v8276_v53 = vld [vmem:[#allocation12 + $0x88] sm:$0xff]  }
  0xec   : > { %7496 = vmatpush3.bf16.msra.mxu1 %v8242_v52  ;;  %7719 = vmatprep.subr.bf16.mxu0 %v8244_v51  ;;  %v2353_v52 = vsel %vm353_vm1, %v8368_v1, %v2348_v20 }
  0xed   : > { %7497 = vmatprep.subr.bf16.mxu1 %v8245_v55  ;;  %7483 = vmatprep.mubr.bf16.mxu1 %v8247_v56  ;;  %v8277_v56 = vld [vmem:[#allocation12 + $0x58] sm:$0xff]  }
  0xee   : > { %7704 = vmatmul.mubr.bf16.gmra.mrb[4].mxu0 %v8243_v54  ;;  %v2356_v54 = vpack.c.bf16 %v2353_v52, %v2313_v48 }
  0xef   : > { %7720 = vmatpush3.bf16.msra.mxu0 %v8244_v51  ;;  %7707 = vmatprep.mubr.bf16.mxu0 %v8248_v57  ;;  %v2354_v51 = vpack.c.bf16 %v2333_v50, %v2293_v47  ;;  %v8281_v57 = vld [vmem:[#allocation12 + $0x60] sm:$0xff]  }
  0xf0   : > { %7498 = vmatpush3.bf16.msra.mxu1 %v8245_v55  ;;  %7721 = vmatprep.subr.bf16.mxu0 %v8246_v18  ;;  %v8279_v55 = vld [vmem:[%s9370_s0 + $0x3a0] sm:$0xff]  }
  0xf1   : > { %7499 = vmatprep.subr.bf16.mxu1 %v8250_v59 }
  0xf3   : > { %7484 = vmatmul.mubr.bf16.gmra.mrb[8].mxu1 %v8249_v58  ;;  %7722 = vmatpush3.bf16.msra.mxu0 %v8246_v18  ;;  %v2360_v18 = vmax.bf16 %v2356_v54, %v2354_v51  ;;  %v8280_v58 = vld [vmem:[%s9370_s0 + $0x3a8] sm:$0xff]  }
  0xf4   : > { %7500 = vmatpush3.bf16.msra.mxu1 %v8250_v59  ;;  %7723 = vmatprep.subr.bf16.mxu0 %v8252_v5  ;;  %v6425_v59 = vld [vmem:[%s8453_s18 + $0xa8] sm:%s8482_s27] }
  0xf5   : > { %7501 = vmatprep.subr.bf16.mxu1 %v8253_v8  ;;  %7487 = vmatprep.mubr.bf16.mxu1 %v8255_v11  ;;  %7007 = vst [vmem:[#allocation12 + $0xa0] sm:$0xff] %v2360_v18   ;;  %v2386_v61 = vunpack.c.l.bf16 %v6425_v59  ;;  %v8285_v11 = vld [vmem:[%s9370_s0 + $0x3b0] sm:$0xff]   ;;  %v9319_v18 = vld [vmem:[%s9371_s1] ss:$0 sm:$0xff] }
  0xf6   : > { %7708 = vmatmul.mubr.bf16.gmra.mrb[8].mxu0 %v8251_v35  ;;  %v8283_v35 = vld [vmem:[#allocation12 + $0x68] sm:$0xff]  }
  0xf7   : > { %7724 = vmatpush3.bf16.msra.mxu0 %v8252_v5  ;;  %7711 = vmatprep.mubr.bf16.mxu0 %v8256_v60  ;;  %v8278_v5 = vld [vmem:[#allocation12 + $0x90] sm:$0xff]   ;;  %v2391_v24 = vsel %vm8489_vm0, %v8368_v1, %v2386_v61 }
  0xf8   : > { %7502 = vmatpush3.bf16.msra.mxu1 %v8253_v8  ;;  %7725 = vmatprep.subr.bf16.mxu0 %v8254_v16  ;;  %v8282_v8 = vld [vmem:[#allocation12 + $0x98] sm:$0xff]   ;;  %v2452_v12 = vpack.c.bf16 %v2431_v10, %v2391_v24 }
  0xf9   : > { %7503 = vmatprep.subr.bf16.mxu1 %v8258_v22 }
  0xfb   : > { %7488 = vmatmul.mubr.bf16.gmra.mrb[12].mxu1 %v8257_v23  ;;  %7726 = vmatpush3.bf16.msra.mxu0 %v8254_v16  ;;  %v2458_v16 = vmax.bf16 %v2454_v13, %v2452_v12  ;;  %v8289_v23 = vld [vmem:[#allocation12 + $0x78] sm:$0xff]  }
  0xfc   : > { %7504 = vmatpush3.bf16.msra.mxu1 %v8258_v22  ;;  %7727 = vmatprep.subr.bf16.mxu0 %v8260_v14  ;;  %v8284_v60 = vld [vmem:[#allocation12 + $0xa0] sm:$0xff]  }
  0xfd   : > { %7505 = vmatprep.subr.bf16.mxu1 %v8261_v25  ;;  %7507 = vmatprep.mubr.bf16.mxu1 %v8263_v26  ;;  %7011 = vst [vmem:[#allocation12 + $0xa8] sm:$0xff] %v2458_v16   ;;  %v8292_v22 = vld [vmem:[#allocation12 + $0xa0] sm:$0xff]   ;;  %v8293_v26 = vld [vmem:[#allocation12 + $0x88] sm:$0xff]  }
  0xfe   : > { %7712 = vmatmul.mubr.bf16.gmra.mrb[12].mxu0 %v8259_v29 }
  0xff   : > { %7728 = vmatpush3.bf16.msra.mxu0 %v8260_v14  ;;  %7731 = vmatprep.mubr.bf16.mxu0 %v8264_v27  ;;  %v8291_v14 = vld [vmem:[#allocation12 + $0x80] sm:$0xff]  }
 0x100   : > { %7506 = vmatpush3.bf16.msra.mxu1 %v8261_v25  ;;  %7729 = vmatprep.subr.bf16.mxu0 %v8262_v28 }
 0x101   : > { %7779 = vmatprep.subr.bf16.mxu1 %v8267_v4 }
 0x103   : > { %7508 = vmatmul.mubr.bf16.vlgmr.msra.gmra.mrb[0].mxu1 %v8265_v30  ;;  %7730 = vmatpush3.bf16.msra.mxu0 %v8262_v28 }
 0x104   : > { %7787 = vmatpush3.bf16.msra.mxu1 %v8267_v4  ;;  %7511 = vmatprep.mubr.bf16.mxu1 %v8269_v31  ;;  %v8294_v25 = vld [vmem:[#allocation12 + $0xa8] sm:$0xff]  }
 0x105   : > { %7780 = vmatprep.subr.bf16.mxu1 %v8268_v32  ;;  %7747 = vmatprep.subr.bf16.mxu0 %v8267_v4 }
 0x106   : > { %7732 = vmatmul.mubr.bf16.vlgmr.msra.gmra.mrb[0].mxu0 %v8266_v33 }
 0x107   : > { %7748 = vmatpush3.bf16.msra.mxu0 %v8267_v4  ;;  %7735 = vmatprep.mubr.bf16.mxu0 %v8270_v36 }
 0x108   : > { %7788 = vmatpush3.bf16.msra.mxu1 %v8268_v32  ;;  %7749 = vmatprep.subr.bf16.mxu0 %v8268_v32 }
 0x109   : > { %7781 = vmatprep.subr.bf16.mxu1 %v8273_v37 }
 0x10b   : > { %7512 = vmatmul.mubr.bf16.gmra.mrb[4].mxu1 %v8271_v34  ;;  %7750 = vmatpush3.bf16.msra.mxu0 %v8268_v32 }
 0x10c   : > { %7789 = vmatpush3.bf16.msra.mxu1 %v8273_v37  ;;  %7515 = vmatprep.mubr.bf16.mxu1 %v8275_v39 }
 0x10d   : > { %7782 = vmatprep.subr.bf16.mxu1 %v8274_v38  ;;  %7751 = vmatprep.subr.bf16.mxu0 %v8273_v37 }
 0x10e   : > { %7736 = vmatmul.mubr.bf16.gmra.mrb[4].mxu0 %v8272_v49 }
 0x10f   : > { %7752 = vmatpush3.bf16.msra.mxu0 %v8273_v37  ;;  %7739 = vmatprep.mubr.bf16.mxu0 %v8276_v53 }
 0x110   : > { %7790 = vmatpush3.bf16.msra.mxu1 %v8274_v38  ;;  %7753 = vmatprep.subr.bf16.mxu0 %v8274_v38 }
 0x111   : > { %7783 = vmatprep.subr.bf16.mxu1 %v8279_v55 }
 0x113   : > { %7516 = vmatmul.mubr.bf16.gmra.mrb[8].mxu1 %v8277_v56  ;;  %7754 = vmatpush3.bf16.msra.mxu0 %v8274_v38 }
 0x114   : > { %7791 = vmatpush3.bf16.msra.mxu1 %v8279_v55  ;;  %7519 = vmatprep.mubr.bf16.mxu1 %v8281_v57 }
 0x115   : > { %7784 = vmatprep.subr.bf16.mxu1 %v8280_v58  ;;  %7755 = vmatprep.subr.bf16.mxu0 %v8279_v55 }
 0x116   : > { %7740 = vmatmul.mubr.bf16.gmra.mrb[8].mxu0 %v8278_v5 }
 0x117   : > { %7756 = vmatpush3.bf16.msra.mxu0 %v8279_v55  ;;  %7743 = vmatprep.mubr.bf16.mxu0 %v8282_v8 }
 0x118   : > { %7792 = vmatpush3.bf16.msra.mxu1 %v8280_v58  ;;  %7757 = vmatprep.subr.bf16.mxu0 %v8280_v58 }
 0x119   : > { %7785 = vmatprep.subr.bf16.mxu1 %v8285_v11 }
 0x11b   : > { %7520 = vmatmul.mubr.bf16.gmra.mrb[12].mxu1 %v8283_v35  ;;  %7758 = vmatpush3.bf16.msra.mxu0 %v8280_v58 }
 0x11c   : > { %7793 = vmatpush3.bf16.msra.mxu1 %v8285_v11  ;;  %7771 = vmatprep.mubr.bf16.mxu1 %v8288_v15 }
 0x11d   : > { %7786 = vmatprep.subr.bf16.mxu1 %v8286_v21  ;;  %7759 = vmatprep.subr.bf16.mxu0 %v8285_v11 }
 0x11e   : > { %7744 = vmatmul.mubr.bf16.gmra.mrb[12].mxu0 %v8284_v60 }
 0x11f   : > { %7760 = vmatpush3.bf16.msra.mxu0 %v8285_v11  ;;  %7763 = vmatprep.mubr.bf16.mxu0 %v8287_v19 }
 0x120   : > { %7794 = vmatpush3.bf16.msra.mxu1 %v8286_v21  ;;  %7761 = vmatprep.subr.bf16.mxu0 %v8286_v21 }
 0x123   : > { %7772 = vmatmul.mubr.bf16.vlgmr.msra.gmra.mrb[16].mxu1 %v8290_v17  ;;  %7762 = vmatpush3.bf16.msra.mxu0 %v8286_v21 }
 0x124   : > { %7775 = vmatprep.mubr.bf16.mxu1 %v8292_v22 }
 0x126   : > { %7764 = vmatmul.mubr.bf16.vlgmr.msra.gmra.mrb[0].mxu0 %v8289_v23 }
 0x127   : > { %7767 = vmatprep.mubr.bf16.mxu0 %v8291_v14 }
 0x12b   : > { %7776 = vmatmul.mubr.bf16.gmra.mrb[20].mxu1 %v8294_v25 }
 0x12e   : > { %7768 = vmatmul.mubr.bf16.gmra.mrb[4].mxu0 %v8293_v26 }
 0x1d6   : > { %v7509_v28 = vpop.f32.mrb[0].mxu1 }
 0x1d7   : > { %v3997_v27 = vpop.f32.mrb[1].mxu1 }
 0x1d8   : > { %v7510_v4 = vpop.f32.mrb[2].mxu1 }
 0x1d9   : > { %v9303_v29 = vpop.f32.mrb[3].mxu1 }
 0x1de   : > { %v9305_v30 = vpop.f32.mrb[4].mxu1 }
 0x1df   : > { %v9307_v31 = vpop.f32.mrb[5].mxu1 }
 0x1e0   : > { %v9309_v32 = vpop.f32.mrb[6].mxu1 }
 0x1e1   : > { %v9311_v33 = vpop.f32.mrb[7].mxu1 }
 0x1e6   : > { %v7517_v36 = vpop.f32.mrb[8].mxu1 }
 0x1e7   : > { %v4029_v34 = vpop.f32.mrb[9].mxu1 }
 0x1e8   : > { %v7518_v37 = vpop.f32.mrb[10].mxu1 }
 0x1e9   : > { %v4032_v38 = vpop.f32.mrb[11].mxu1  ;;  %v7741_v39 = vpop.f32.mrb[8].mxu0 }
 0x1ea   : > { %v7803_v40 = vadd.f32 %v7741_v39, %v7517_v36  ;;  %v5723_v41 = vpop.f32.mrb[9].mxu0 }
 0x1eb   : > { %v7805_v42 = vadd.f32 %v5723_v41, %v4029_v34  ;;  %v7742_v43 = vpop.f32.mrb[10].mxu0 }
 0x1ec   : > { %v7807_v44 = vadd.f32 %v7742_v43, %v7518_v37  ;;  %v5726_v45 = vpop.f32.mrb[11].mxu0 }
 0x1ed   : > { %v7809_v20 = vadd.f32 %v5726_v45, %v4032_v38 }
 0x1ee   : > { %v7521_v46 = vpop.f32.mrb[12].mxu1 }
 0x1ef   : > { %v4045_v47 = vpop.f32.mrb[13].mxu1 }
 0x1f0   : > { %v7522_v48 = vpop.f32.mrb[14].mxu1 }
 0x1f1   : > { %v4048_v49 = vpop.f32.mrb[15].mxu1  ;;  %v7745_v50 = vpop.f32.mrb[12].mxu0 }
 0x1f2   : > { %v7811_v52 = vadd.f32 %v7745_v50, %v7521_v46  ;;  %v5739_v53 = vpop.f32.mrb[13].mxu0 }
 0x1f3   : > { %v7813_v51 = vadd.f32 %v5739_v53, %v4045_v47  ;;  %v7746_v54 = vpop.f32.mrb[14].mxu0 }
 0x1f4   : > { %v7815_v55 = vadd.f32 %v7746_v54, %v7522_v48  ;;  %v5742_v56 = vpop.f32.mrb[15].mxu0 }
 0x1f5   : > { %v7817_v58 = vadd.f32 %v5742_v56, %v4048_v49 }
 0x1f6   : > { %v7773_v57 = vpop.f32.mrb[16].mxu1 }
 0x1f7   : > { %v7804_v59 = vadd.f32 %v7803_v40, %v7773_v57  ;;  %v5965_v61 = vpop.f32.mrb[17].mxu1 }
 0x1f8   : > { %v7806_v62 = vadd.f32 %v7805_v42, %v5965_v61  ;;  %v7774_v63 = vpop.f32.mrb[18].mxu1 }
 0x1f9   : > { %v6029_v0 = vadd.f32 %v7804_v59, %v9319_v18  ;;  %v7808_v2 = vadd.f32 %v7807_v44, %v7774_v63  ;;  %v5968_v3 = vpop.f32.mrb[19].mxu1  ;;  %v7765_v7 = vpop.f32.mrb[0].mxu0 }
 0x1fa   : > { %v6027_v5 = vadd.f32 %v7806_v62, %v9319_v18  ;;  %v7810_v24 = vadd.f32 %v7809_v20, %v5968_v3  ;;  %v7795_v9 = vadd.f32 %v7765_v7, %v7509_v28  ;;  %v5933_v10 = vpop.f32.mrb[1].mxu0 }
 0x1fb   : > { %v6030_v8 = vadd.f32 %v7808_v2, %v9319_v18  ;;  %v6045_v6 = vmax.f32 %v6029_v0, 0.0  ;;  %v7796_v12 = vadd.f32 %v5933_v10, %v3997_v27  ;;  %v7766_v35 = vpop.f32.mrb[2].mxu0 }
 0x1fc   : > { %v6028_v11 = vadd.f32 %v7810_v24, %v9319_v18  ;;  %v6021_v15 = vadd.f32 %v7795_v9, %v9319_v18  ;;  %v6043_v21 = vmax.f32 %v6027_v5, 0.0  ;;  %v7797_v16 = vadd.f32 %v7766_v35, %v7510_v4  ;;  %v5936_v60 = vpop.f32.mrb[3].mxu0 }
 0x1fd   : > { %v6046_v13 = vmax.f32 %v6030_v8, 0.0  ;;  %v6019_v22 = vadd.f32 %v7796_v12, %v9319_v18  ;;  %v7798_v14 = vadd.f32 %v5936_v60, %v9303_v29 }
 0x1fe   : > { %v6044_v19 = vmax.f32 %v6028_v11, 0.0  ;;  %v7777_v17 = vpop.f32.mrb[20].mxu1  ;;  %v6022_v28 = vadd.f32 %v7797_v16, %v9319_v18  ;;  %v6037_v40 = vmax.f32 %v6021_v15, 0.0 }
 0x1ff   : > { %v7040_v23 = vpack.c.bf16 %v6046_v13, %v6045_v6  ;;  %v7812_v25 = vadd.f32 %v7811_v52, %v7777_v17  ;;  %v5981_v26 = vpop.f32.mrb[21].mxu1  ;;  %v6020_v37 = vadd.f32 %v7798_v14, %v9319_v18  ;;  %v6035_v43 = vmax.f32 %v6019_v22, 0.0 }
 0x200   : > { %v7035_v27 = vpack.c.bf16 %v6044_v19, %v6043_v21  ;;  %v7814_v36 = vadd.f32 %v7813_v51, %v5981_v26  ;;  %v7778_v34 = vpop.f32.mrb[22].mxu1  ;;  %v6038_v41 = vmax.f32 %v6022_v28, 0.0 }
 0x201   : > { %7056 = vst [vmem:[%s9329_s12 + $0x28] sm:$0xff] %v7040_v23   ;;  %v6033_v4 = vadd.f32 %v7812_v25, %v9319_v18  ;;  %v7816_v38 = vadd.f32 %v7815_v55, %v7778_v34  ;;  %v5984_v39 = vpop.f32.mrb[23].mxu1  ;;  %v6036_v44 = vmax.f32 %v6020_v37, 0.0  ;;  %v7769_v45 = vpop.f32.mrb[4].mxu0 }
 0x202   : > { %7055 = vst [vmem:[%s9329_s12 + $0x20] sm:$0xff] %v7035_v27   ;;  %v6031_v29 = vadd.f32 %v7814_v36, %v9319_v18  ;;  %v7818_v42 = vadd.f32 %v7817_v58, %v5984_v39  ;;  %v7020_v20 = vpack.c.bf16 %v6038_v41, %v6037_v40  ;;  %v7799_v47 = vadd.f32 %v7769_v45, %v9305_v30  ;;  %v5949_v48 = vpop.f32.mrb[5].mxu0 }
 0x203   : > { %v6034_v46 = vadd.f32 %v7816_v38, %v9319_v18  ;;  %v7015_v50 = vpack.c.bf16 %v6036_v44, %v6035_v43  ;;  %v6049_v52 = vmax.f32 %v6033_v4, 0.0  ;;  %v7800_v53 = vadd.f32 %v5949_v48, %v9307_v31  ;;  %v7770_v51 = vpop.f32.mrb[6].mxu0 }
 0x204   : > { %v6032_v49 = vadd.f32 %v7818_v42, %v9319_v18  ;;  %7052 = vst [vmem:[%s9329_s12 + $0x8] sm:$0xff] %v7020_v20   ;;  %v6025_v55 = vadd.f32 %v7799_v47, %v9319_v18  ;;  %v6047_v56 = vmax.f32 %v6031_v29, 0.0  ;;  %v7801_v57 = vadd.f32 %v7770_v51, %v9309_v32  ;;  %v5952_v58 = vpop.f32.mrb[7].mxu0 }
 0x205   : > { %v6050_v54 = vmax.f32 %v6034_v46, 0.0  ;;  %7016 = vst [vmem:[%s9329_s12] sm:$0xff] %v7015_v50   ;;  %v6023_v30 = vadd.f32 %v7800_v53, %v9319_v18  ;;  %v7802_v62 = vadd.f32 %v5952_v58, %v9311_v33 }
 0x206   : > { %v6048_v59 = vmax.f32 %v6032_v49, 0.0  ;;  %v6026_v31 = vadd.f32 %v7801_v57, %v9319_v18  ;;  %v6041_v2 = vmax.f32 %v6025_v55, 0.0 }
 0x207   : > { %v7050_v61 = vpack.c.bf16 %v6050_v54, %v6049_v52  ;;  %v6024_v0 = vadd.f32 %v7802_v62, %v9319_v18  ;;  %v6039_v32 = vmax.f32 %v6023_v30, 0.0 }
 0x208   : > { %v7045_v63 = vpack.c.bf16 %v6048_v59, %v6047_v56  ;;  %v6042_v3 = vmax.f32 %v6026_v31, 0.0 }
 0x209   : > { %7058 = vst [vmem:[%s9329_s12 + $0x38] sm:$0xff] %v7050_v61   ;;  %v6040_v5 = vmax.f32 %v6024_v0, 0.0 }
 0x20a   : > { %7057 = vst [vmem:[%s9329_s12 + $0x30] sm:$0xff] %v7045_v63   ;;  %v7030_v24 = vpack.c.bf16 %v6042_v3, %v6041_v2 }
 0x20b   : > { %v7025_v7 = vpack.c.bf16 %v6040_v5, %v6039_v32 }
 0x20c   : > { %7054 = vst [vmem:[%s9329_s12 + $0x18] sm:$0xff] %v7030_v24  }
 0x20d   : > { %7053 = vst [vmem:[%s9329_s12 + $0x10] sm:$0xff] %v7025_v7  }
 0x20e PF: > { %s25_s24 = sadd.s32 1, %s8333_s24   ;;  %s9378_s20 = smov %s8325_s22 }
 0x20f   : > { %p22_p10 = scmp.ge.s32.totalorder %s25_s24, 6   ;;  %s9379_s21 = smov %s8329_s23 }
 0x210   : > { %s9380_s22 = smov %s9383_s3  ;;  %s9381_s23 = smov %s9387_s25 }
 0x211   :  { %24 = sbr.rel (!%p22_p10) target bundleno = 3 (0x3), region = 212 }

</bundles_post_ra>
